<compile_context>
chip_gen: v7x
topology: tpu7x:2x2x1
jax: 0.10.0
libtpu: 0.0.40
codegen_flags: <defaults>
</compile_context>

<pallas_src>
import functools

import jax
import jax.numpy as jnp
from jax import lax
from jax.experimental import pallas as pl
from jax.experimental.pallas import tpu as pltpu

ALPHA = 0.25  # nn.PReLU() default init (single shared parameter)


def _prelu(x, alpha):
    return jnp.where(x > 0.0, x, alpha * x)


# ----------------------- kernel 1: fused conv stack + linear_pre -----------------------
def _conv_stack_kernel(x_ref, dw1w_ref, dw1b_ref, pw1w_ref, pw1b_ref,
                       dw2w_ref, dw2b_ref, pw2w_ref, pw2b_ref,
                       prew_ref, preb_ref, seq_ref, xpad_sc, *, kF, kT, alpha):
    # x_ref:   (F, T, C2) channels-last block for one batch element
    # dw*w:    (kF, kT, C2) depthwise weights, dw*b: (1, C2)
    # pw1w:    (C2, C2), pw2w: (C2, D); prew: (F, D, H) per-frequency slices; preb: (1, H)
    # seq_ref: (T, H) output block; xpad_sc: (F+2pF, T+2pT, C2) VMEM halo scratch
    F, T, C2 = x_ref.shape
    pF, pT = kF // 2, kT // 2
    H = prew_ref.shape[2]

    # zero the scratch once per invocation; only the interior is ever overwritten so
    # the halo stays 0 (kept unconditional: the scratch is per-core and tiny).
    xpad_sc[...] = jnp.zeros_like(xpad_sc)

    def depthwise(v, w, b):
        # v: (F, T, C2) value -> depthwise kFxkT conv ('same' padding) + bias + PReLU
        # w: (kF, kT, C2) value (hoisted load), b: (1, C2) value
        xpad_sc[pF:pF + F, pT:pT + T, :] = v
        acc = jnp.zeros((F, T, C2), jnp.float32)
        for di in range(kF):
            for dj in range(kT):
                acc = acc + xpad_sc[di:di + F, dj:dj + T, :] * w[di, dj:dj + 1, :]
        return _prelu(acc + b, alpha)

    h = depthwise(x_ref[...], dw1w_ref[...], dw1b_ref[...])             # (F, T, C2)
    h = _prelu(jnp.dot(h.reshape(F * T, C2), pw1w_ref[...],
                       preferred_element_type=jnp.float32) + pw1b_ref[...], alpha)
    h = depthwise(h.reshape(F, T, C2), dw2w_ref[...], dw2b_ref[...])    # (F, T, C2)
    h = _prelu(jnp.dot(h.reshape(F * T, C2), pw2w_ref[...],
                       preferred_element_type=jnp.float32) + pw2b_ref[...], alpha)  # (F*T, D)

    # linear_pre: seq[t, :] = sum_f h[f*T:(f+1)*T, :] @ pre_w[f]
    # (the 'B D F T -> B (D F) T' rearrange lives in the per-frequency weight slices;
    #  only static, sublane-aligned slices are used -- no lane-axis reshape/transpose)
    acc = jnp.zeros((T, H), jnp.float32)
    for f in range(F):
        acc = acc + jnp.dot(h[f * T:(f + 1) * T, :], prew_ref[f],
                            preferred_element_type=jnp.float32)
    seq_ref[...] = acc + preb_ref[...]


def conv_stack_pre(x, p):
    # x: (B, F, T, C2) channels-last -> seq (B, T, H)
    B, F, T, C2 = x.shape
    kF, kT, _ = p['dw1_w'].shape
    D = p['pw2_wt'].shape[1]
    H = p['pre_w3'].shape[2]
    pF, pT = kF // 2, kT // 2

    def wspec2(s):
        return pl.BlockSpec(s, lambda b: (0, 0))

    def wspec3(s):
        return pl.BlockSpec(s, lambda b: (0, 0, 0))

    kern = functools.partial(_conv_stack_kernel, kF=kF, kT=kT, alpha=ALPHA)
    return pl.pallas_call(
        kern,
        out_shape=jax.ShapeDtypeStruct((B, T, H), jnp.float32),
        grid=(B,),
        in_specs=[
            pl.BlockSpec((None, F, T, C2), lambda b: (b, 0, 0, 0)),
            wspec3((kF, kT, C2)), wspec2((1, C2)),
            wspec2((C2, C2)), wspec2((1, C2)),
            wspec3((kF, kT, C2)), wspec2((1, C2)),
            wspec2((C2, D)), wspec2((1, D)),
            wspec3((F, D, H)), wspec2((1, H)),
        ],
        out_specs=pl.BlockSpec((None, T, H), lambda b: (b, 0, 0)),
        scratch_shapes=[pltpu.VMEM((F + 2 * pF, T + 2 * pT, C2), jnp.float32)],
        compiler_params=pltpu.CompilerParams(
            dimension_semantics=("parallel",)),
    )(x, p['dw1_w'], p['dw1_b'], p['pw1_wt'], p['pw1_b'],
      p['dw2_w'], p['dw2_b'], p['pw2_wt'], p['pw2_b'],
      p['pre_w3'], p['pre_b'])


# --------- kernel 2: batched BiLSTM + fused Linear/filter_gen/bias_gen epilogue ---------
def _bilstm_head_kernel(seq_ref, wxf_ref, whf_ref, bf_ref,
                        wxb_ref, whb_ref, bb_ref,
                        linw_ref, linb_ref, out_ref):
    # seq_ref: (B, T, Hin); wx*: (Hin, 4H); wh*: (H, 4H); b*: (1, 4H) (= b_ih + b_hh)
    # linw: (2H, 2*D*F) pre-folded Linear @ [filter_gen|bias_gen]; linb: (1, 2*D*F)
    # out_ref: (B, 2*D*F).  Gate order: i, f, g, o.
    B, T, Hin = seq_ref.shape
    Hh = whf_ref.shape[0]

    # hoist the input->gate projections of every timestep out of the serial
    # recurrence: one (B*T, Hin) x (Hin, 4H) MXU matmul per direction.
    seq2 = seq_ref[...].reshape(B * T, Hin)
    gx_f = (jnp.dot(seq2, wxf_ref[...], preferred_element_type=jnp.float32)
            + bf_ref[...]).reshape(B, T, 4 * Hh)
    gx_b = (jnp.dot(seq2, wxb_ref[...], preferred_element_type=jnp.float32)
            + bb_ref[...]).reshape(B, T, 4 * Hh)
    wh_f = whf_ref[...]
    wh_b = whb_ref[...]

    def cell(gx_t, h, c, wh):
        g = gx_t + jnp.dot(h, wh, preferred_element_type=jnp.float32)   # (B, 4H)
        i = jax.nn.sigmoid(g[:, 0:Hh])
        f = jax.nn.sigmoid(g[:, Hh:2 * Hh])
        gg = jnp.tanh(g[:, 2 * Hh:3 * Hh])
        o = jax.nn.sigmoid(g[:, 3 * Hh:4 * Hh])
        c = f * c + i * gg
        h = o * jnp.tanh(c)
        return h, c

    zero = jnp.zeros((B, Hh), jnp.float32)
    hf = cf = hb = cb = zero
    hf_first = hb_last = zero
    # fully unrolled (T is small & static); forward and backward chains are
    # independent and interleaved per step for ILP.
    # TODO(synk): for long sequences switch to lax.fori_loop(..., unroll=k).
    for s in range(T):
        hf, cf = cell(gx_f[:, s, :], hf, cf, wh_f)
        hb, cb = cell(gx_b[:, T - 1 - s, :], hb, cb, wh_b)
        if s == 0:
            hf_first, hb_last = hf, hb

    # feature = rnn[:, 0] + rnn[:, -1] = [hf(0)+hf(T-1) | hb(0)+hb(T-1)]
    # Linear(2H -> D*F) and filter_gen/bias_gen are pre-folded into linw/linb,
    # so this single matmul pair produces the final (B, 2*D*F) head directly.
    feat_f = hf_first + hf
    feat_b = hb + hb_last
    linw = linw_ref[...]
    out_ref[...] = (jnp.dot(feat_f, linw[0:Hh, :], preferred_element_type=jnp.float32)
                    + jnp.dot(feat_b, linw[Hh:2 * Hh, :], preferred_element_type=jnp.float32)
                    + linb_ref[...])


def bilstm_head(seq, p):
    B = seq.shape[0]
    DF2 = p['lin2_wt'].shape[1]
    return pl.pallas_call(
        _bilstm_head_kernel,
        out_shape=jax.ShapeDtypeStruct((B, DF2), jnp.float32),
    )(seq, p['lstm_wxf'], p['lstm_whf'], p['lstm_bf'],
      p['lstm_wxb'], p['lstm_whb'], p['lstm_bb'],
      p['lin2_wt'], p['lin2_b'])


# ------------------------------ full forward pass ------------------------------
def sequence_embed_forward(x, ref, p):
    # x, ref: (B, D, F, T) -> (f, b) each (B, D, F, 1)
    B, D, F, T = x.shape
    inp = jnp.concatenate([x, ref], axis=1)                     # (B, 2D, F, T)
    h = jnp.transpose(inp, (0, 2, 3, 1))                        # (B, F, T, 2D)
    seq = conv_stack_pre(h, p)                                  # (B, T, H)
    head = bilstm_head(seq, p).reshape(B, 2 * D, F)             # (B, 2D, F)
    f_out = head[:, :D, :, None]                                # (B, D, F, 1)
    b_out = head[:, D:, :, None]
    return f_out, b_out


# ------------------------------ parameter packing ------------------------------
def pack_params(p, D, F):
    C2 = 2 * D
    H = p['pre_wt'].shape[1]
    hp = lax.Precision.HIGHEST

    def pack_lstm(wih, whh, b):
        hin, hh = wih.shape[1], whh.shape[1]
        wx = jnp.transpose(wih, (1, 0, 2)).reshape(hin, 4 * hh)   # [i|f|g|o] on cols
        wh = jnp.transpose(whh, (1, 0, 2)).reshape(hh, 4 * hh)
        return wx, wh, b.reshape(1, 4 * hh)

    wxf, whf, bf = pack_lstm(p['wih_f'], p['whh_f'], p['b_f'])
    wxb, whb, bb = pack_lstm(p['wih_b'], p['whh_b'], p['b_b'])

    # Fold filter_gen / bias_gen (two 1x1 Conv1d on the D axis) into the
    # Linear(2H -> D*F) epilogue: (Linear then per-freq D->2D map) == one
    # (2H, 2*D*F) matmul with pre-multiplied weights.  Exact (f32 constant fold).
    head_wt = jnp.concatenate([p['fg_wt'], p['bg_wt']], axis=1)        # (D, 2D)
    head_b = jnp.concatenate([p['fg_b'], p['bg_b']])                   # (2D,)
    lin3 = p['lin_wt'].reshape(2 * H, D, F)                            # rows d*F+f
    lin2_wt = jnp.einsum('hdf,de->hef', lin3, head_wt,
                         precision=hp).reshape(2 * H, 2 * D * F)
    lin2_b = (jnp.einsum('df,de->ef', p['lin_b'].reshape(D, F), head_wt,
                         precision=hp) + head_b[:, None]).reshape(1, 2 * D * F)

    return {
        'dw1_w': p['dw1_w'], 'dw1_b': p['dw1_b'].reshape(1, C2),
        'pw1_wt': p['pw1_wt'], 'pw1_b': p['pw1_b'].reshape(1, C2),
        'dw2_w': p['dw2_w'], 'dw2_b': p['dw2_b'].reshape(1, C2),
        'pw2_wt': p['pw2_wt'], 'pw2_b': p['pw2_b'].reshape(1, D),
        # linear_pre weight (D*F, H) with rows d*F+f -> per-frequency slices (F, D, H)
        'pre_w3': p['pre_wt'].reshape(D, F, H).transpose(1, 0, 2),
        'pre_b': p['pre_b'].reshape(1, H),
        'lstm_wxf': wxf, 'lstm_whf': whf, 'lstm_bf': bf,
        'lstm_wxb': wxb, 'lstm_whb': whb, 'lstm_bb': bb,
        'lin2_wt': lin2_wt, 'lin2_b': lin2_b,
    }


# ------------------------------ deterministic params ------------------------------
def init_params(key, D, F, H, kF, kT):
    C2 = 2 * D
    DF = D * F
    ks = list(jax.random.split(key, 24))

    def nrm(k, shape, s=0.1):
        return jax.random.normal(k, shape, jnp.float32) * s

    p = {}
    # depthwise Conv2d(C2, C2, (kF,kT), groups=C2): PyTorch (C2,1,kF,kT) -> (kF,kT,C2)
    p['dw1_w'] = jnp.transpose(nrm(ks[0], (C2, kF, kT)), (1, 2, 0))
    p['dw1_b'] = nrm(ks[1], (C2,))
    p['pw1_wt'] = nrm(ks[2], (C2, C2))          # (in, out)
    p['pw1_b'] = nrm(ks[3], (C2,))
    p['dw2_w'] = jnp.transpose(nrm(ks[4], (C2, kF, kT)), (1, 2, 0))
    p['dw2_b'] = nrm(ks[5], (C2,))
    p['pw2_wt'] = nrm(ks[6], (C2, D))
    p['pw2_b'] = nrm(ks[7], (D,))
    # linear_pre: Conv1d(D*F -> H, 1)
    p['pre_wt'] = nrm(ks[8], (DF, H))
    p['pre_b'] = nrm(ks[9], (H,))
    # bidirectional LSTM (input size == hidden size == H); gate order i,f,g,o;
    # weights stored per-gate input-major; biases are b_ih + b_hh combined.
    p['wih_f'] = nrm(ks[10], (4, H, H))
    p['whh_f'] = nrm(ks[11], (4, H, H))
    p['b_f'] = nrm(ks[12], (4, 1, H))
    p['wih_b'] = nrm(ks[13], (4, H, H))
    p['whh_b'] = nrm(ks[14], (4, H, H))
    p['b_b'] = nrm(ks[15], (4, 1, H))
    # linear: Linear(2H -> D*F)
    p['lin_wt'] = nrm(ks[16], (2 * H, DF))
    p['lin_b'] = nrm(ks[17], (DF,))
    # filter_gen / bias_gen: Conv1d(D -> D, 1), stored (in, out)
    p['fg_wt'] = nrm(ks[18], (D, D))
    p['fg_b'] = nrm(ks[19], (D,))
    p['bg_wt'] = nrm(ks[20], (D, D))
    p['bg_b'] = nrm(ks[21], (D,))
    return p


# ------------------------------ pure-JAX reference ------------------------------
def _dw_ref(x, w, b, alpha):
    B, F, T, C = x.shape
    kF, kT, _ = w.shape
    pF, pT = kF // 2, kT // 2
    xp = jnp.pad(x, ((0, 0), (pF, pF), (pT, pT), (0, 0)))
    acc = jnp.zeros_like(x)
    for di in range(kF):
        for dj in range(kT):
            acc = acc + xp[:, di:di + F, dj:dj + T, :] * w[di, dj]
    acc = acc + b
    return jnp.where(acc > 0, acc, alpha * acc)


def _mm_ref(a, wt, b, alpha=None):
    y = jnp.einsum('...k,kn->...n', a, wt, precision=jax.lax.Precision.HIGHEST) + b
    if alpha is not None:
        y = jnp.where(y > 0, y, alpha * y)
    return y


def _lstm_dir_ref(x, wih, whh, b):
    B, T, Hin = x.shape
    H = whh.shape[1]

    def step(carry, xt):
        h, c = carry
        g = (jnp.einsum('bi,gih->gbh', xt, wih, precision=jax.lax.Precision.HIGHEST)
             + jnp.einsum('bh,ghk->gbk', h, whh, precision=jax.lax.Precision.HIGHEST)
             + b)
        i = jax.nn.sigmoid(g[0])
        f = jax.nn.sigmoid(g[1])
        gg = jnp.tanh(g[2])
        o = jax.nn.sigmoid(g[3])
        c = f * c + i * gg
        h = o * jnp.tanh(c)
        return (h, c), h

    (_, _), hs = lax.scan(step, (jnp.zeros((B, H)), jnp.zeros((B, H))),
                          jnp.swapaxes(x, 0, 1))
    return jnp.swapaxes(hs, 0, 1)


def reference_forward(x, ref, params):
    B, D, F, T = x.shape
    C2 = 2 * D
    inp = jnp.concatenate([x, ref], axis=1)
    h = jnp.transpose(inp, (0, 2, 3, 1))
    h = _dw_ref(h, params['dw1_w'], params['dw1_b'], ALPHA)
    h = _mm_ref(h.reshape(B, F * T, C2), params['pw1_wt'], params['pw1_b'], ALPHA)
    h = _dw_ref(h.reshape(B, F, T, C2), params['dw2_w'], params['dw2_b'], ALPHA)
    h = _mm_ref(h.reshape(B, F * T, C2), params['pw2_wt'], params['pw2_b'], ALPHA)
    h = h.reshape(B, F, T, D)
    seq = jnp.transpose(h, (0, 2, 3, 1)).reshape(B, T, D * F)
    seq = _mm_ref(seq, params['pre_wt'], params['pre_b'])
    out_f = _lstm_dir_ref(seq, params['wih_f'], params['whh_f'], params['b_f'])
    out_b = _lstm_dir_ref(seq[:, ::-1], params['wih_b'], params['whh_b'], params['b_b'])[:, ::-1]
    rnn = jnp.concatenate([out_f, out_b], axis=-1)
    feature = rnn[:, 0] + rnn[:, -1]
    feature = _mm_ref(feature, params['lin_wt'], params['lin_b'])
    feature = feature.reshape(B, D, F)
    feat_fd = jnp.transpose(feature, (0, 2, 1))
    f_out = jnp.transpose(_mm_ref(feat_fd, params['fg_wt'], params['fg_b']), (0, 2, 1))[..., None]
    b_out = jnp.transpose(_mm_ref(feat_fd, params['bg_wt'], params['bg_b']), (0, 2, 1))[..., None]
    return f_out, b_out


if __name__ == "__main__":
    # small, module-consistent shapes: emb_dim=4, n_fft=14 -> n_freqs=8, hidden=16
    B, D, n_fft, H, kF, kT, T = 2, 4, 14, 16, 5, 5, 8
    F = n_fft // 2 + 1

    key = jax.random.PRNGKey(0)
    kp, kx, kr = jax.random.split(key, 3)
    raw_params = init_params(kp, D, F, H, kF, kT)
    params = pack_params(raw_params, D, F)
    x = jax.random.normal(kx, (B, D, F, T), jnp.float32) * 0.5
    ref = jax.random.normal(kr, (B, D, F, T), jnp.float32) * 0.5

    fwd = jax.jit(sequence_embed_forward)
    f_out, b_out = jax.block_until_ready(fwd(x, ref, params))

    assert f_out.shape == (B, D, F, 1), f_out.shape
    assert b_out.shape == (B, D, F, 1), b_out.shape

    f_exp, b_exp = reference_forward(x, ref, raw_params)
    assert jnp.allclose(f_out, f_exp, atol=5e-3, rtol=5e-2), \
        float(jnp.max(jnp.abs(f_out - f_exp)))
    assert jnp.allclose(b_out, b_exp, atol=5e-3, rtol=5e-2), \
        float(jnp.max(jnp.abs(b_out - b_exp)))

    print("KERNEL_OK")
</pallas_src>

<mosaic_0001>
module attributes {stable_mosaic.version = 11 : i64} {
  func.func @_conv_stack_kernel(%arg0: i32, %arg1: memref<1x8x8x8xf32, #tpu.memory_space<vmem>>, %arg2: memref<5x5x8xf32, #tpu.memory_space<vmem>>, %arg3: memref<1x8xf32, #tpu.memory_space<vmem>>, %arg4: memref<8x8xf32, #tpu.memory_space<vmem>>, %arg5: memref<1x8xf32, #tpu.memory_space<vmem>>, %arg6: memref<5x5x8xf32, #tpu.memory_space<vmem>>, %arg7: memref<1x8xf32, #tpu.memory_space<vmem>>, %arg8: memref<8x4xf32, #tpu.memory_space<vmem>>, %arg9: memref<1x4xf32, #tpu.memory_space<vmem>>, %arg10: memref<8x4x16xf32, #tpu.memory_space<vmem>>, %arg11: memref<1x16xf32, #tpu.memory_space<vmem>>, %arg12: memref<1x8x16xf32, #tpu.memory_space<vmem>>, %arg13: memref<12x12x8xf32, #tpu.memory_space<vmem>>) attributes {dimension_semantics = [#tpu.dimension_semantics<parallel>], iteration_bounds = array<i64: 2>, scalar_prefetch = 0 : i64, scratch_operands = 1 : i64, tpu.core_type = #tpu.core_type<tc>, window_params = [{transform_indices = @transform_0, window_bounds = array<i64: 1, 8, 8, 8>}, {pipeline_mode = #tpu.pipeline_mode<synchronous>, transform_indices = @transform_1, window_bounds = array<i64: 5, 5, 8>}, {pipeline_mode = #tpu.pipeline_mode<synchronous>, transform_indices = @transform_2, window_bounds = array<i64: 1, 8>}, {pipeline_mode = #tpu.pipeline_mode<synchronous>, transform_indices = @transform_3, window_bounds = array<i64: 8, 8>}, {pipeline_mode = #tpu.pipeline_mode<synchronous>, transform_indices = @transform_4, window_bounds = array<i64: 1, 8>}, {pipeline_mode = #tpu.pipeline_mode<synchronous>, transform_indices = @transform_5, window_bounds = array<i64: 5, 5, 8>}, {pipeline_mode = #tpu.pipeline_mode<synchronous>, transform_indices = @transform_6, window_bounds = array<i64: 1, 8>}, {pipeline_mode = #tpu.pipeline_mode<synchronous>, transform_indices = @transform_7, window_bounds = array<i64: 8, 4>}, {pipeline_mode = #tpu.pipeline_mode<synchronous>, transform_indices = @transform_8, window_bounds = array<i64: 1, 4>}, {pipeline_mode = #tpu.pipeline_mode<synchronous>, transform_indices = @transform_9, window_bounds = array<i64: 8, 4, 16>}, {pipeline_mode = #tpu.pipeline_mode<synchronous>, transform_indices = @transform_10, window_bounds = array<i64: 1, 16>}, {transform_indices = @transform_11, window_bounds = array<i64: 1, 8, 16>}]} {
    %cst = arith.constant 0.000000e+00 : f32
    %0 = vector.broadcast %cst : f32 to vector<12x12x8xf32>
    %c0 = arith.constant 0 : index
    %c0_0 = arith.constant 0 : index
    %c0_1 = arith.constant 0 : index
    %1 = vector.load %arg13[%c0, %c0_0, %c0_1] : memref<12x12x8xf32, #tpu.memory_space<vmem>>, vector<12x12x8xf32>
    tpu.vector_store %arg13[%c0, %c0_0, %c0_1], %0 {strides = array<i32>} : memref<12x12x8xf32, #tpu.memory_space<vmem>>, vector<12x12x8xf32>,
    %c0_2 = arith.constant 0 : index
    %c0_3 = arith.constant 0 : index
    %c0_4 = arith.constant 0 : index
    %c0_5 = arith.constant 0 : index
    %2 = vector.load %arg1[%c0_2, %c0_3, %c0_4, %c0_5] : memref<1x8x8x8xf32, #tpu.memory_space<vmem>>, vector<1x8x8x8xf32>
    %3 = vector.shape_cast %2 : vector<1x8x8x8xf32> to vector<8x8x8xf32>
    %c0_6 = arith.constant 0 : index
    %c0_7 = arith.constant 0 : index
    %c0_8 = arith.constant 0 : index
    %4 = vector.load %arg2[%c0_6, %c0_7, %c0_8] : memref<5x5x8xf32, #tpu.memory_space<vmem>>, vector<5x5x8xf32>
    %c0_9 = arith.constant 0 : index
    %c0_10 = arith.constant 0 : index
    %5 = vector.load %arg3[%c0_9, %c0_10] : memref<1x8xf32, #tpu.memory_space<vmem>>, vector<1x8xf32>
    %c2 = arith.constant 2 : index
    %c2_11 = arith.constant 2 : index
    %c0_12 = arith.constant 0 : index
    %6 = vector.load %arg13[%c2, %c2_11, %c0_12] : memref<12x12x8xf32, #tpu.memory_space<vmem>>, vector<8x8x8xf32>
    tpu.vector_store %arg13[%c2, %c2_11, %c0_12], %3 {strides = array<i32>} : memref<12x12x8xf32, #tpu.memory_space<vmem>>, vector<8x8x8xf32>,
    %cst_13 = arith.constant 0.000000e+00 : f32
    %7 = vector.broadcast %cst_13 : f32 to vector<8x8x8xf32>
    %c0_14 = arith.constant 0 : index
    %c0_15 = arith.constant 0 : index
    %c0_16 = arith.constant 0 : index
    %8 = vector.load %arg13[%c0_14, %c0_15, %c0_16] : memref<12x12x8xf32, #tpu.memory_space<vmem>>, vector<8x8x8xf32>
    %9 = vector.extract_strided_slice %4 {offsets = [0, 0, 0], sizes = [1, 1, 8], strides = [1, 1, 1]} : vector<5x5x8xf32> to vector<1x1x8xf32>
    %10 = vector.shape_cast %9 : vector<1x1x8xf32> to vector<1x8xf32>
    %11 = vector.shape_cast %10 : vector<1x8xf32> to vector<1x1x8xf32>
    %12 = vector.broadcast %11 : vector<1x1x8xf32> to vector<8x8x8xf32>
    %13 = arith.mulf %8, %12 : vector<8x8x8xf32>
    %14 = arith.addf %7, %13 : vector<8x8x8xf32>
    %c0_17 = arith.constant 0 : index
    %c1 = arith.constant 1 : index
    %c0_18 = arith.constant 0 : index
    %15 = vector.load %arg13[%c0_17, %c1, %c0_18] : memref<12x12x8xf32, #tpu.memory_space<vmem>>, vector<8x8x8xf32>
    %16 = vector.extract_strided_slice %4 {offsets = [0, 1, 0], sizes = [1, 1, 8], strides = [1, 1, 1]} : vector<5x5x8xf32> to vector<1x1x8xf32>
    %17 = vector.shape_cast %16 : vector<1x1x8xf32> to vector<1x8xf32>
    %18 = vector.shape_cast %17 : vector<1x8xf32> to vector<1x1x8xf32>
    %19 = vector.broadcast %18 : vector<1x1x8xf32> to vector<8x8x8xf32>
    %20 = arith.mulf %15, %19 : vector<8x8x8xf32>
    %21 = arith.addf %14, %20 : vector<8x8x8xf32>
    %c0_19 = arith.constant 0 : index
    %c2_20 = arith.constant 2 : index
    %c0_21 = arith.constant 0 : index
    %22 = vector.load %arg13[%c0_19, %c2_20, %c0_21] : memref<12x12x8xf32, #tpu.memory_space<vmem>>, vector<8x8x8xf32>
    %23 = vector.extract_strided_slice %4 {offsets = [0, 2, 0], sizes = [1, 1, 8], strides = [1, 1, 1]} : vector<5x5x8xf32> to vector<1x1x8xf32>
    %24 = vector.shape_cast %23 : vector<1x1x8xf32> to vector<1x8xf32>
    %25 = vector.shape_cast %24 : vector<1x8xf32> to vector<1x1x8xf32>
    %26 = vector.broadcast %25 : vector<1x1x8xf32> to vector<8x8x8xf32>
    %27 = arith.mulf %22, %26 : vector<8x8x8xf32>
    %28 = arith.addf %21, %27 : vector<8x8x8xf32>
    %c0_22 = arith.constant 0 : index
    %c3 = arith.constant 3 : index
    %c0_23 = arith.constant 0 : index
    %29 = vector.load %arg13[%c0_22, %c3, %c0_23] : memref<12x12x8xf32, #tpu.memory_space<vmem>>, vector<8x8x8xf32>
    %30 = vector.extract_strided_slice %4 {offsets = [0, 3, 0], sizes = [1, 1, 8], strides = [1, 1, 1]} : vector<5x5x8xf32> to vector<1x1x8xf32>
    %31 = vector.shape_cast %30 : vector<1x1x8xf32> to vector<1x8xf32>
    %32 = vector.shape_cast %31 : vector<1x8xf32> to vector<1x1x8xf32>
    %33 = vector.broadcast %32 : vector<1x1x8xf32> to vector<8x8x8xf32>
    %34 = arith.mulf %29, %33 : vector<8x8x8xf32>
    %35 = arith.addf %28, %34 : vector<8x8x8xf32>
    %c0_24 = arith.constant 0 : index
    %c4 = arith.constant 4 : index
    %c0_25 = arith.constant 0 : index
    %36 = vector.load %arg13[%c0_24, %c4, %c0_25] : memref<12x12x8xf32, #tpu.memory_space<vmem>>, vector<8x8x8xf32>
    %37 = vector.extract_strided_slice %4 {offsets = [0, 4, 0], sizes = [1, 1, 8], strides = [1, 1, 1]} : vector<5x5x8xf32> to vector<1x1x8xf32>
    %38 = vector.shape_cast %37 : vector<1x1x8xf32> to vector<1x8xf32>
    %39 = vector.shape_cast %38 : vector<1x8xf32> to vector<1x1x8xf32>
    %40 = vector.broadcast %39 : vector<1x1x8xf32> to vector<8x8x8xf32>
    %41 = arith.mulf %36, %40 : vector<8x8x8xf32>
    %42 = arith.addf %35, %41 : vector<8x8x8xf32>
    %c1_26 = arith.constant 1 : index
    %c0_27 = arith.constant 0 : index
    %c0_28 = arith.constant 0 : index
    %43 = vector.load %arg13[%c1_26, %c0_27, %c0_28] : memref<12x12x8xf32, #tpu.memory_space<vmem>>, vector<8x8x8xf32>
    %44 = vector.extract_strided_slice %4 {offsets = [1, 0, 0], sizes = [1, 1, 8], strides = [1, 1, 1]} : vector<5x5x8xf32> to vector<1x1x8xf32>
    %45 = vector.shape_cast %44 : vector<1x1x8xf32> to vector<1x8xf32>
    %46 = vector.shape_cast %45 : vector<1x8xf32> to vector<1x1x8xf32>
    %47 = vector.broadcast %46 : vector<1x1x8xf32> to vector<8x8x8xf32>
    %48 = arith.mulf %43, %47 : vector<8x8x8xf32>
    %49 = arith.addf %42, %48 : vector<8x8x8xf32>
    %c1_29 = arith.constant 1 : index
    %c1_30 = arith.constant 1 : index
    %c0_31 = arith.constant 0 : index
    %50 = vector.load %arg13[%c1_29, %c1_30, %c0_31] : memref<12x12x8xf32, #tpu.memory_space<vmem>>, vector<8x8x8xf32>
    %51 = vector.extract_strided_slice %4 {offsets = [1, 1, 0], sizes = [1, 1, 8], strides = [1, 1, 1]} : vector<5x5x8xf32> to vector<1x1x8xf32>
    %52 = vector.shape_cast %51 : vector<1x1x8xf32> to vector<1x8xf32>
    %53 = vector.shape_cast %52 : vector<1x8xf32> to vector<1x1x8xf32>
    %54 = vector.broadcast %53 : vector<1x1x8xf32> to vector<8x8x8xf32>
    %55 = arith.mulf %50, %54 : vector<8x8x8xf32>
    %56 = arith.addf %49, %55 : vector<8x8x8xf32>
    %c1_32 = arith.constant 1 : index
    %c2_33 = arith.constant 2 : index
    %c0_34 = arith.constant 0 : index
    %57 = vector.load %arg13[%c1_32, %c2_33, %c0_34] : memref<12x12x8xf32, #tpu.memory_space<vmem>>, vector<8x8x8xf32>
    %58 = vector.extract_strided_slice %4 {offsets = [1, 2, 0], sizes = [1, 1, 8], strides = [1, 1, 1]} : vector<5x5x8xf32> to vector<1x1x8xf32>
    %59 = vector.shape_cast %58 : vector<1x1x8xf32> to vector<1x8xf32>
    %60 = vector.shape_cast %59 : vector<1x8xf32> to vector<1x1x8xf32>
    %61 = vector.broadcast %60 : vector<1x1x8xf32> to vector<8x8x8xf32>
    %62 = arith.mulf %57, %61 : vector<8x8x8xf32>
    %63 = arith.addf %56, %62 : vector<8x8x8xf32>
    %c1_35 = arith.constant 1 : index
    %c3_36 = arith.constant 3 : index
    %c0_37 = arith.constant 0 : index
    %64 = vector.load %arg13[%c1_35, %c3_36, %c0_37] : memref<12x12x8xf32, #tpu.memory_space<vmem>>, vector<8x8x8xf32>
    %65 = vector.extract_strided_slice %4 {offsets = [1, 3, 0], sizes = [1, 1, 8], strides = [1, 1, 1]} : vector<5x5x8xf32> to vector<1x1x8xf32>
    %66 = vector.shape_cast %65 : vector<1x1x8xf32> to vector<1x8xf32>
    %67 = vector.shape_cast %66 : vector<1x8xf32> to vector<1x1x8xf32>
    %68 = vector.broadcast %67 : vector<1x1x8xf32> to vector<8x8x8xf32>
    %69 = arith.mulf %64, %68 : vector<8x8x8xf32>
    %70 = arith.addf %63, %69 : vector<8x8x8xf32>
    %c1_38 = arith.constant 1 : index
    %c4_39 = arith.constant 4 : index
    %c0_40 = arith.constant 0 : index
    %71 = vector.load %arg13[%c1_38, %c4_39, %c0_40] : memref<12x12x8xf32, #tpu.memory_space<vmem>>, vector<8x8x8xf32>
    %72 = vector.extract_strided_slice %4 {offsets = [1, 4, 0], sizes = [1, 1, 8], strides = [1, 1, 1]} : vector<5x5x8xf32> to vector<1x1x8xf32>
    %73 = vector.shape_cast %72 : vector<1x1x8xf32> to vector<1x8xf32>
    %74 = vector.shape_cast %73 : vector<1x8xf32> to vector<1x1x8xf32>
    %75 = vector.broadcast %74 : vector<1x1x8xf32> to vector<8x8x8xf32>
    %76 = arith.mulf %71, %75 : vector<8x8x8xf32>
    %77 = arith.addf %70, %76 : vector<8x8x8xf32>
    %c2_41 = arith.constant 2 : index
    %c0_42 = arith.constant 0 : index
    %c0_43 = arith.constant 0 : index
    %78 = vector.load %arg13[%c2_41, %c0_42, %c0_43] : memref<12x12x8xf32, #tpu.memory_space<vmem>>, vector<8x8x8xf32>
    %79 = vector.extract_strided_slice %4 {offsets = [2, 0, 0], sizes = [1, 1, 8], strides = [1, 1, 1]} : vector<5x5x8xf32> to vector<1x1x8xf32>
    %80 = vector.shape_cast %79 : vector<1x1x8xf32> to vector<1x8xf32>
    %81 = vector.shape_cast %80 : vector<1x8xf32> to vector<1x1x8xf32>
    %82 = vector.broadcast %81 : vector<1x1x8xf32> to vector<8x8x8xf32>
    %83 = arith.mulf %78, %82 : vector<8x8x8xf32>
    %84 = arith.addf %77, %83 : vector<8x8x8xf32>
    %c2_44 = arith.constant 2 : index
    %c1_45 = arith.constant 1 : index
    %c0_46 = arith.constant 0 : index
    %85 = vector.load %arg13[%c2_44, %c1_45, %c0_46] : memref<12x12x8xf32, #tpu.memory_space<vmem>>, vector<8x8x8xf32>
    %86 = vector.extract_strided_slice %4 {offsets = [2, 1, 0], sizes = [1, 1, 8], strides = [1, 1, 1]} : vector<5x5x8xf32> to vector<1x1x8xf32>
    %87 = vector.shape_cast %86 : vector<1x1x8xf32> to vector<1x8xf32>
    %88 = vector.shape_cast %87 : vector<1x8xf32> to vector<1x1x8xf32>
    %89 = vector.broadcast %88 : vector<1x1x8xf32> to vector<8x8x8xf32>
    %90 = arith.mulf %85, %89 : vector<8x8x8xf32>
    %91 = arith.addf %84, %90 : vector<8x8x8xf32>
    %c2_47 = arith.constant 2 : index
    %c2_48 = arith.constant 2 : index
    %c0_49 = arith.constant 0 : index
    %92 = vector.load %arg13[%c2_47, %c2_48, %c0_49] : memref<12x12x8xf32, #tpu.memory_space<vmem>>, vector<8x8x8xf32>
    %93 = vector.extract_strided_slice %4 {offsets = [2, 2, 0], sizes = [1, 1, 8], strides = [1, 1, 1]} : vector<5x5x8xf32> to vector<1x1x8xf32>
    %94 = vector.shape_cast %93 : vector<1x1x8xf32> to vector<1x8xf32>
    %95 = vector.shape_cast %94 : vector<1x8xf32> to vector<1x1x8xf32>
    %96 = vector.broadcast %95 : vector<1x1x8xf32> to vector<8x8x8xf32>
    %97 = arith.mulf %92, %96 : vector<8x8x8xf32>
    %98 = arith.addf %91, %97 : vector<8x8x8xf32>
    %c2_50 = arith.constant 2 : index
    %c3_51 = arith.constant 3 : index
    %c0_52 = arith.constant 0 : index
    %99 = vector.load %arg13[%c2_50, %c3_51, %c0_52] : memref<12x12x8xf32, #tpu.memory_space<vmem>>, vector<8x8x8xf32>
    %100 = vector.extract_strided_slice %4 {offsets = [2, 3, 0], sizes = [1, 1, 8], strides = [1, 1, 1]} : vector<5x5x8xf32> to vector<1x1x8xf32>
    %101 = vector.shape_cast %100 : vector<1x1x8xf32> to vector<1x8xf32>
    %102 = vector.shape_cast %101 : vector<1x8xf32> to vector<1x1x8xf32>
    %103 = vector.broadcast %102 : vector<1x1x8xf32> to vector<8x8x8xf32>
    %104 = arith.mulf %99, %103 : vector<8x8x8xf32>
    %105 = arith.addf %98, %104 : vector<8x8x8xf32>
    %c2_53 = arith.constant 2 : index
    %c4_54 = arith.constant 4 : index
    %c0_55 = arith.constant 0 : index
    %106 = vector.load %arg13[%c2_53, %c4_54, %c0_55] : memref<12x12x8xf32, #tpu.memory_space<vmem>>, vector<8x8x8xf32>
    %107 = vector.extract_strided_slice %4 {offsets = [2, 4, 0], sizes = [1, 1, 8], strides = [1, 1, 1]} : vector<5x5x8xf32> to vector<1x1x8xf32>
    %108 = vector.shape_cast %107 : vector<1x1x8xf32> to vector<1x8xf32>
    %109 = vector.shape_cast %108 : vector<1x8xf32> to vector<1x1x8xf32>
    %110 = vector.broadcast %109 : vector<1x1x8xf32> to vector<8x8x8xf32>
    %111 = arith.mulf %106, %110 : vector<8x8x8xf32>
    %112 = arith.addf %105, %111 : vector<8x8x8xf32>
    %c3_56 = arith.constant 3 : index
    %c0_57 = arith.constant 0 : index
    %c0_58 = arith.constant 0 : index
    %113 = vector.load %arg13[%c3_56, %c0_57, %c0_58] : memref<12x12x8xf32, #tpu.memory_space<vmem>>, vector<8x8x8xf32>
    %114 = vector.extract_strided_slice %4 {offsets = [3, 0, 0], sizes = [1, 1, 8], strides = [1, 1, 1]} : vector<5x5x8xf32> to vector<1x1x8xf32>
    %115 = vector.shape_cast %114 : vector<1x1x8xf32> to vector<1x8xf32>
    %116 = vector.shape_cast %115 : vector<1x8xf32> to vector<1x1x8xf32>
    %117 = vector.broadcast %116 : vector<1x1x8xf32> to vector<8x8x8xf32>
    %118 = arith.mulf %113, %117 : vector<8x8x8xf32>
    %119 = arith.addf %112, %118 : vector<8x8x8xf32>
    %c3_59 = arith.constant 3 : index
    %c1_60 = arith.constant 1 : index
    %c0_61 = arith.constant 0 : index
    %120 = vector.load %arg13[%c3_59, %c1_60, %c0_61] : memref<12x12x8xf32, #tpu.memory_space<vmem>>, vector<8x8x8xf32>
    %121 = vector.extract_strided_slice %4 {offsets = [3, 1, 0], sizes = [1, 1, 8], strides = [1, 1, 1]} : vector<5x5x8xf32> to vector<1x1x8xf32>
    %122 = vector.shape_cast %121 : vector<1x1x8xf32> to vector<1x8xf32>
    %123 = vector.shape_cast %122 : vector<1x8xf32> to vector<1x1x8xf32>
    %124 = vector.broadcast %123 : vector<1x1x8xf32> to vector<8x8x8xf32>
    %125 = arith.mulf %120, %124 : vector<8x8x8xf32>
    %126 = arith.addf %119, %125 : vector<8x8x8xf32>
    %c3_62 = arith.constant 3 : index
    %c2_63 = arith.constant 2 : index
    %c0_64 = arith.constant 0 : index
    %127 = vector.load %arg13[%c3_62, %c2_63, %c0_64] : memref<12x12x8xf32, #tpu.memory_space<vmem>>, vector<8x8x8xf32>
    %128 = vector.extract_strided_slice %4 {offsets = [3, 2, 0], sizes = [1, 1, 8], strides = [1, 1, 1]} : vector<5x5x8xf32> to vector<1x1x8xf32>
    %129 = vector.shape_cast %128 : vector<1x1x8xf32> to vector<1x8xf32>
    %130 = vector.shape_cast %129 : vector<1x8xf32> to vector<1x1x8xf32>
    %131 = vector.broadcast %130 : vector<1x1x8xf32> to vector<8x8x8xf32>
    %132 = arith.mulf %127, %131 : vector<8x8x8xf32>
    %133 = arith.addf %126, %132 : vector<8x8x8xf32>
    %c3_65 = arith.constant 3 : index
    %c3_66 = arith.constant 3 : index
    %c0_67 = arith.constant 0 : index
    %134 = vector.load %arg13[%c3_65, %c3_66, %c0_67] : memref<12x12x8xf32, #tpu.memory_space<vmem>>, vector<8x8x8xf32>
    %135 = vector.extract_strided_slice %4 {offsets = [3, 3, 0], sizes = [1, 1, 8], strides = [1, 1, 1]} : vector<5x5x8xf32> to vector<1x1x8xf32>
    %136 = vector.shape_cast %135 : vector<1x1x8xf32> to vector<1x8xf32>
    %137 = vector.shape_cast %136 : vector<1x8xf32> to vector<1x1x8xf32>
    %138 = vector.broadcast %137 : vector<1x1x8xf32> to vector<8x8x8xf32>
    %139 = arith.mulf %134, %138 : vector<8x8x8xf32>
    %140 = arith.addf %133, %139 : vector<8x8x8xf32>
    %c3_68 = arith.constant 3 : index
    %c4_69 = arith.constant 4 : index
    %c0_70 = arith.constant 0 : index
    %141 = vector.load %arg13[%c3_68, %c4_69, %c0_70] : memref<12x12x8xf32, #tpu.memory_space<vmem>>, vector<8x8x8xf32>
    %142 = vector.extract_strided_slice %4 {offsets = [3, 4, 0], sizes = [1, 1, 8], strides = [1, 1, 1]} : vector<5x5x8xf32> to vector<1x1x8xf32>
    %143 = vector.shape_cast %142 : vector<1x1x8xf32> to vector<1x8xf32>
    %144 = vector.shape_cast %143 : vector<1x8xf32> to vector<1x1x8xf32>
    %145 = vector.broadcast %144 : vector<1x1x8xf32> to vector<8x8x8xf32>
    %146 = arith.mulf %141, %145 : vector<8x8x8xf32>
    %147 = arith.addf %140, %146 : vector<8x8x8xf32>
    %c4_71 = arith.constant 4 : index
    %c0_72 = arith.constant 0 : index
    %c0_73 = arith.constant 0 : index
    %148 = vector.load %arg13[%c4_71, %c0_72, %c0_73] : memref<12x12x8xf32, #tpu.memory_space<vmem>>, vector<8x8x8xf32>
    %149 = vector.extract_strided_slice %4 {offsets = [4, 0, 0], sizes = [1, 1, 8], strides = [1, 1, 1]} : vector<5x5x8xf32> to vector<1x1x8xf32>
    %150 = vector.shape_cast %149 : vector<1x1x8xf32> to vector<1x8xf32>
    %151 = vector.shape_cast %150 : vector<1x8xf32> to vector<1x1x8xf32>
    %152 = vector.broadcast %151 : vector<1x1x8xf32> to vector<8x8x8xf32>
    %153 = arith.mulf %148, %152 : vector<8x8x8xf32>
    %154 = arith.addf %147, %153 : vector<8x8x8xf32>
    %c4_74 = arith.constant 4 : index
    %c1_75 = arith.constant 1 : index
    %c0_76 = arith.constant 0 : index
    %155 = vector.load %arg13[%c4_74, %c1_75, %c0_76] : memref<12x12x8xf32, #tpu.memory_space<vmem>>, vector<8x8x8xf32>
    %156 = vector.extract_strided_slice %4 {offsets = [4, 1, 0], sizes = [1, 1, 8], strides = [1, 1, 1]} : vector<5x5x8xf32> to vector<1x1x8xf32>
    %157 = vector.shape_cast %156 : vector<1x1x8xf32> to vector<1x8xf32>
    %158 = vector.shape_cast %157 : vector<1x8xf32> to vector<1x1x8xf32>
    %159 = vector.broadcast %158 : vector<1x1x8xf32> to vector<8x8x8xf32>
    %160 = arith.mulf %155, %159 : vector<8x8x8xf32>
    %161 = arith.addf %154, %160 : vector<8x8x8xf32>
    %c4_77 = arith.constant 4 : index
    %c2_78 = arith.constant 2 : index
    %c0_79 = arith.constant 0 : index
    %162 = vector.load %arg13[%c4_77, %c2_78, %c0_79] : memref<12x12x8xf32, #tpu.memory_space<vmem>>, vector<8x8x8xf32>
    %163 = vector.extract_strided_slice %4 {offsets = [4, 2, 0], sizes = [1, 1, 8], strides = [1, 1, 1]} : vector<5x5x8xf32> to vector<1x1x8xf32>
    %164 = vector.shape_cast %163 : vector<1x1x8xf32> to vector<1x8xf32>
    %165 = vector.shape_cast %164 : vector<1x8xf32> to vector<1x1x8xf32>
    %166 = vector.broadcast %165 : vector<1x1x8xf32> to vector<8x8x8xf32>
    %167 = arith.mulf %162, %166 : vector<8x8x8xf32>
    %168 = arith.addf %161, %167 : vector<8x8x8xf32>
    %c4_80 = arith.constant 4 : index
    %c3_81 = arith.constant 3 : index
    %c0_82 = arith.constant 0 : index
    %169 = vector.load %arg13[%c4_80, %c3_81, %c0_82] : memref<12x12x8xf32, #tpu.memory_space<vmem>>, vector<8x8x8xf32>
    %170 = vector.extract_strided_slice %4 {offsets = [4, 3, 0], sizes = [1, 1, 8], strides = [1, 1, 1]} : vector<5x5x8xf32> to vector<1x1x8xf32>
    %171 = vector.shape_cast %170 : vector<1x1x8xf32> to vector<1x8xf32>
    %172 = vector.shape_cast %171 : vector<1x8xf32> to vector<1x1x8xf32>
    %173 = vector.broadcast %172 : vector<1x1x8xf32> to vector<8x8x8xf32>
    %174 = arith.mulf %169, %173 : vector<8x8x8xf32>
    %175 = arith.addf %168, %174 : vector<8x8x8xf32>
    %c4_83 = arith.constant 4 : index
    %c4_84 = arith.constant 4 : index
    %c0_85 = arith.constant 0 : index
    %176 = vector.load %arg13[%c4_83, %c4_84, %c0_85] : memref<12x12x8xf32, #tpu.memory_space<vmem>>, vector<8x8x8xf32>
    %177 = vector.extract_strided_slice %4 {offsets = [4, 4, 0], sizes = [1, 1, 8], strides = [1, 1, 1]} : vector<5x5x8xf32> to vector<1x1x8xf32>
    %178 = vector.shape_cast %177 : vector<1x1x8xf32> to vector<1x8xf32>
    %179 = vector.shape_cast %178 : vector<1x8xf32> to vector<1x1x8xf32>
    %180 = vector.broadcast %179 : vector<1x1x8xf32> to vector<8x8x8xf32>
    %181 = arith.mulf %176, %180 : vector<8x8x8xf32>
    %182 = arith.addf %175, %181 : vector<8x8x8xf32>
    %183 = vector.shape_cast %5 : vector<1x8xf32> to vector<1x1x8xf32>
    %184 = vector.broadcast %183 : vector<1x1x8xf32> to vector<8x8x8xf32>
    %185 = arith.addf %182, %184 : vector<8x8x8xf32>
    %cst_86 = arith.constant 0.000000e+00 : f32
    %186 = vector.broadcast %cst_86 : f32 to vector<8x8x8xf32>
    %187 = arith.cmpf ogt, %185, %186 : vector<8x8x8xf32>
    %cst_87 = arith.constant 2.500000e-01 : f32
    %188 = vector.broadcast %cst_87 : f32 to vector<8x8x8xf32>
    %189 = arith.mulf %188, %185 : vector<8x8x8xf32>
    %190 = arith.select %187, %185, %189 : vector<8x8x8xi1>, vector<8x8x8xf32>
    %191 = vector.shape_cast %190 : vector<8x8x8xf32> to vector<64x8xf32>
    %c0_88 = arith.constant 0 : index
    %c0_89 = arith.constant 0 : index
    %192 = vector.load %arg4[%c0_88, %c0_89] : memref<8x8xf32, #tpu.memory_space<vmem>>, vector<8x8xf32>
    %cst_90 = arith.constant dense<0.000000e+00> : vector<64x8xf32>
    %193 = tpu.matmul %191, %192, %cst_90 {dimension_numbers = #tpu.dot_dimension_numbers<[1], [0], [0], [1], [0, 0, 1, 1], [], []>} : vector<64x8xf32>, vector<8x8xf32>, vector<64x8xf32> -> vector<64x8xf32>
    %c0_91 = arith.constant 0 : index
    %c0_92 = arith.constant 0 : index
    %194 = vector.load %arg5[%c0_91, %c0_92] : memref<1x8xf32, #tpu.memory_space<vmem>>, vector<1x8xf32>
    %195 = vector.broadcast %194 : vector<1x8xf32> to vector<64x8xf32>
    %196 = arith.addf %193, %195 : vector<64x8xf32>
    %cst_93 = arith.constant 0.000000e+00 : f32
    %197 = vector.broadcast %cst_93 : f32 to vector<64x8xf32>
    %198 = arith.cmpf ogt, %196, %197 : vector<64x8xf32>
    %cst_94 = arith.constant 2.500000e-01 : f32
    %199 = vector.broadcast %cst_94 : f32 to vector<64x8xf32>
    %200 = arith.mulf %199, %196 : vector<64x8xf32>
    %201 = arith.select %198, %196, %200 : vector<64x8xi1>, vector<64x8xf32>
    %202 = vector.shape_cast %201 : vector<64x8xf32> to vector<8x8x8xf32>
    %c0_95 = arith.constant 0 : index
    %c0_96 = arith.constant 0 : index
    %c0_97 = arith.constant 0 : index
    %203 = vector.load %arg6[%c0_95, %c0_96, %c0_97] : memref<5x5x8xf32, #tpu.memory_space<vmem>>, vector<5x5x8xf32>
    %c0_98 = arith.constant 0 : index
    %c0_99 = arith.constant 0 : index
    %204 = vector.load %arg7[%c0_98, %c0_99] : memref<1x8xf32, #tpu.memory_space<vmem>>, vector<1x8xf32>
    %c2_100 = arith.constant 2 : index
    %c2_101 = arith.constant 2 : index
    %c0_102 = arith.constant 0 : index
    %205 = vector.load %arg13[%c2_100, %c2_101, %c0_102] : memref<12x12x8xf32, #tpu.memory_space<vmem>>, vector<8x8x8xf32>
    tpu.vector_store %arg13[%c2_100, %c2_101, %c0_102], %202 {strides = array<i32>} : memref<12x12x8xf32, #tpu.memory_space<vmem>>, vector<8x8x8xf32>,
    %cst_103 = arith.constant 0.000000e+00 : f32
    %206 = vector.broadcast %cst_103 : f32 to vector<8x8x8xf32>
    %c0_104 = arith.constant 0 : index
    %c0_105 = arith.constant 0 : index
    %c0_106 = arith.constant 0 : index
    %207 = vector.load %arg13[%c0_104, %c0_105, %c0_106] : memref<12x12x8xf32, #tpu.memory_space<vmem>>, vector<8x8x8xf32>
    %208 = vector.extract_strided_slice %203 {offsets = [0, 0, 0], sizes = [1, 1, 8], strides = [1, 1, 1]} : vector<5x5x8xf32> to vector<1x1x8xf32>
    %209 = vector.shape_cast %208 : vector<1x1x8xf32> to vector<1x8xf32>
    %210 = vector.shape_cast %209 : vector<1x8xf32> to vector<1x1x8xf32>
    %211 = vector.broadcast %210 : vector<1x1x8xf32> to vector<8x8x8xf32>
    %212 = arith.mulf %207, %211 : vector<8x8x8xf32>
    %213 = arith.addf %206, %212 : vector<8x8x8xf32>
    %c0_107 = arith.constant 0 : index
    %c1_108 = arith.constant 1 : index
    %c0_109 = arith.constant 0 : index
    %214 = vector.load %arg13[%c0_107, %c1_108, %c0_109] : memref<12x12x8xf32, #tpu.memory_space<vmem>>, vector<8x8x8xf32>
    %215 = vector.extract_strided_slice %203 {offsets = [0, 1, 0], sizes = [1, 1, 8], strides = [1, 1, 1]} : vector<5x5x8xf32> to vector<1x1x8xf32>
    %216 = vector.shape_cast %215 : vector<1x1x8xf32> to vector<1x8xf32>
    %217 = vector.shape_cast %216 : vector<1x8xf32> to vector<1x1x8xf32>
    %218 = vector.broadcast %217 : vector<1x1x8xf32> to vector<8x8x8xf32>
    %219 = arith.mulf %214, %218 : vector<8x8x8xf32>
    %220 = arith.addf %213, %219 : vector<8x8x8xf32>
    %c0_110 = arith.constant 0 : index
    %c2_111 = arith.constant 2 : index
    %c0_112 = arith.constant 0 : index
    %221 = vector.load %arg13[%c0_110, %c2_111, %c0_112] : memref<12x12x8xf32, #tpu.memory_space<vmem>>, vector<8x8x8xf32>
    %222 = vector.extract_strided_slice %203 {offsets = [0, 2, 0], sizes = [1, 1, 8], strides = [1, 1, 1]} : vector<5x5x8xf32> to vector<1x1x8xf32>
    %223 = vector.shape_cast %222 : vector<1x1x8xf32> to vector<1x8xf32>
    %224 = vector.shape_cast %223 : vector<1x8xf32> to vector<1x1x8xf32>
    %225 = vector.broadcast %224 : vector<1x1x8xf32> to vector<8x8x8xf32>
    %226 = arith.mulf %221, %225 : vector<8x8x8xf32>
    %227 = arith.addf %220, %226 : vector<8x8x8xf32>
    %c0_113 = arith.constant 0 : index
    %c3_114 = arith.constant 3 : index
    %c0_115 = arith.constant 0 : index
    %228 = vector.load %arg13[%c0_113, %c3_114, %c0_115] : memref<12x12x8xf32, #tpu.memory_space<vmem>>, vector<8x8x8xf32>
    %229 = vector.extract_strided_slice %203 {offsets = [0, 3, 0], sizes = [1, 1, 8], strides = [1, 1, 1]} : vector<5x5x8xf32> to vector<1x1x8xf32>
    %230 = vector.shape_cast %229 : vector<1x1x8xf32> to vector<1x8xf32>
    %231 = vector.shape_cast %230 : vector<1x8xf32> to vector<1x1x8xf32>
    %232 = vector.broadcast %231 : vector<1x1x8xf32> to vector<8x8x8xf32>
    %233 = arith.mulf %228, %232 : vector<8x8x8xf32>
    %234 = arith.addf %227, %233 : vector<8x8x8xf32>
    %c0_116 = arith.constant 0 : index
    %c4_117 = arith.constant 4 : index
    %c0_118 = arith.constant 0 : index
    %235 = vector.load %arg13[%c0_116, %c4_117, %c0_118] : memref<12x12x8xf32, #tpu.memory_space<vmem>>, vector<8x8x8xf32>
    %236 = vector.extract_strided_slice %203 {offsets = [0, 4, 0], sizes = [1, 1, 8], strides = [1, 1, 1]} : vector<5x5x8xf32> to vector<1x1x8xf32>
    %237 = vector.shape_cast %236 : vector<1x1x8xf32> to vector<1x8xf32>
    %238 = vector.shape_cast %237 : vector<1x8xf32> to vector<1x1x8xf32>
    %239 = vector.broadcast %238 : vector<1x1x8xf32> to vector<8x8x8xf32>
    %240 = arith.mulf %235, %239 : vector<8x8x8xf32>
    %241 = arith.addf %234, %240 : vector<8x8x8xf32>
    %c1_119 = arith.constant 1 : index
    %c0_120 = arith.constant 0 : index
    %c0_121 = arith.constant 0 : index
    %242 = vector.load %arg13[%c1_119, %c0_120, %c0_121] : memref<12x12x8xf32, #tpu.memory_space<vmem>>, vector<8x8x8xf32>
    %243 = vector.extract_strided_slice %203 {offsets = [1, 0, 0], sizes = [1, 1, 8], strides = [1, 1, 1]} : vector<5x5x8xf32> to vector<1x1x8xf32>
    %244 = vector.shape_cast %243 : vector<1x1x8xf32> to vector<1x8xf32>
    %245 = vector.shape_cast %244 : vector<1x8xf32> to vector<1x1x8xf32>
    %246 = vector.broadcast %245 : vector<1x1x8xf32> to vector<8x8x8xf32>
    %247 = arith.mulf %242, %246 : vector<8x8x8xf32>
    %248 = arith.addf %241, %247 : vector<8x8x8xf32>
    %c1_122 = arith.constant 1 : index
    %c1_123 = arith.constant 1 : index
    %c0_124 = arith.constant 0 : index
    %249 = vector.load %arg13[%c1_122, %c1_123, %c0_124] : memref<12x12x8xf32, #tpu.memory_space<vmem>>, vector<8x8x8xf32>
    %250 = vector.extract_strided_slice %203 {offsets = [1, 1, 0], sizes = [1, 1, 8], strides = [1, 1, 1]} : vector<5x5x8xf32> to vector<1x1x8xf32>
    %251 = vector.shape_cast %250 : vector<1x1x8xf32> to vector<1x8xf32>
    %252 = vector.shape_cast %251 : vector<1x8xf32> to vector<1x1x8xf32>
    %253 = vector.broadcast %252 : vector<1x1x8xf32> to vector<8x8x8xf32>
    %254 = arith.mulf %249, %253 : vector<8x8x8xf32>
    %255 = arith.addf %248, %254 : vector<8x8x8xf32>
    %c1_125 = arith.constant 1 : index
    %c2_126 = arith.constant 2 : index
    %c0_127 = arith.constant 0 : index
    %256 = vector.load %arg13[%c1_125, %c2_126, %c0_127] : memref<12x12x8xf32, #tpu.memory_space<vmem>>, vector<8x8x8xf32>
    %257 = vector.extract_strided_slice %203 {offsets = [1, 2, 0], sizes = [1, 1, 8], strides = [1, 1, 1]} : vector<5x5x8xf32> to vector<1x1x8xf32>
    %258 = vector.shape_cast %257 : vector<1x1x8xf32> to vector<1x8xf32>
    %259 = vector.shape_cast %258 : vector<1x8xf32> to vector<1x1x8xf32>
    %260 = vector.broadcast %259 : vector<1x1x8xf32> to vector<8x8x8xf32>
    %261 = arith.mulf %256, %260 : vector<8x8x8xf32>
    %262 = arith.addf %255, %261 : vector<8x8x8xf32>
    %c1_128 = arith.constant 1 : index
    %c3_129 = arith.constant 3 : index
    %c0_130 = arith.constant 0 : index
    %263 = vector.load %arg13[%c1_128, %c3_129, %c0_130] : memref<12x12x8xf32, #tpu.memory_space<vmem>>, vector<8x8x8xf32>
    %264 = vector.extract_strided_slice %203 {offsets = [1, 3, 0], sizes = [1, 1, 8], strides = [1, 1, 1]} : vector<5x5x8xf32> to vector<1x1x8xf32>
    %265 = vector.shape_cast %264 : vector<1x1x8xf32> to vector<1x8xf32>
    %266 = vector.shape_cast %265 : vector<1x8xf32> to vector<1x1x8xf32>
    %267 = vector.broadcast %266 : vector<1x1x8xf32> to vector<8x8x8xf32>
    %268 = arith.mulf %263, %267 : vector<8x8x8xf32>
    %269 = arith.addf %262, %268 : vector<8x8x8xf32>
    %c1_131 = arith.constant 1 : index
    %c4_132 = arith.constant 4 : index
    %c0_133 = arith.constant 0 : index
    %270 = vector.load %arg13[%c1_131, %c4_132, %c0_133] : memref<12x12x8xf32, #tpu.memory_space<vmem>>, vector<8x8x8xf32>
    %271 = vector.extract_strided_slice %203 {offsets = [1, 4, 0], sizes = [1, 1, 8], strides = [1, 1, 1]} : vector<5x5x8xf32> to vector<1x1x8xf32>
    %272 = vector.shape_cast %271 : vector<1x1x8xf32> to vector<1x8xf32>
    %273 = vector.shape_cast %272 : vector<1x8xf32> to vector<1x1x8xf32>
    %274 = vector.broadcast %273 : vector<1x1x8xf32> to vector<8x8x8xf32>
    %275 = arith.mulf %270, %274 : vector<8x8x8xf32>
    %276 = arith.addf %269, %275 : vector<8x8x8xf32>
    %c2_134 = arith.constant 2 : index
    %c0_135 = arith.constant 0 : index
    %c0_136 = arith.constant 0 : index
    %277 = vector.load %arg13[%c2_134, %c0_135, %c0_136] : memref<12x12x8xf32, #tpu.memory_space<vmem>>, vector<8x8x8xf32>
    %278 = vector.extract_strided_slice %203 {offsets = [2, 0, 0], sizes = [1, 1, 8], strides = [1, 1, 1]} : vector<5x5x8xf32> to vector<1x1x8xf32>
    %279 = vector.shape_cast %278 : vector<1x1x8xf32> to vector<1x8xf32>
    %280 = vector.shape_cast %279 : vector<1x8xf32> to vector<1x1x8xf32>
    %281 = vector.broadcast %280 : vector<1x1x8xf32> to vector<8x8x8xf32>
    %282 = arith.mulf %277, %281 : vector<8x8x8xf32>
    %283 = arith.addf %276, %282 : vector<8x8x8xf32>
    %c2_137 = arith.constant 2 : index
    %c1_138 = arith.constant 1 : index
    %c0_139 = arith.constant 0 : index
    %284 = vector.load %arg13[%c2_137, %c1_138, %c0_139] : memref<12x12x8xf32, #tpu.memory_space<vmem>>, vector<8x8x8xf32>
    %285 = vector.extract_strided_slice %203 {offsets = [2, 1, 0], sizes = [1, 1, 8], strides = [1, 1, 1]} : vector<5x5x8xf32> to vector<1x1x8xf32>
    %286 = vector.shape_cast %285 : vector<1x1x8xf32> to vector<1x8xf32>
    %287 = vector.shape_cast %286 : vector<1x8xf32> to vector<1x1x8xf32>
    %288 = vector.broadcast %287 : vector<1x1x8xf32> to vector<8x8x8xf32>
    %289 = arith.mulf %284, %288 : vector<8x8x8xf32>
    %290 = arith.addf %283, %289 : vector<8x8x8xf32>
    %c2_140 = arith.constant 2 : index
    %c2_141 = arith.constant 2 : index
    %c0_142 = arith.constant 0 : index
    %291 = vector.load %arg13[%c2_140, %c2_141, %c0_142] : memref<12x12x8xf32, #tpu.memory_space<vmem>>, vector<8x8x8xf32>
    %292 = vector.extract_strided_slice %203 {offsets = [2, 2, 0], sizes = [1, 1, 8], strides = [1, 1, 1]} : vector<5x5x8xf32> to vector<1x1x8xf32>
    %293 = vector.shape_cast %292 : vector<1x1x8xf32> to vector<1x8xf32>
    %294 = vector.shape_cast %293 : vector<1x8xf32> to vector<1x1x8xf32>
    %295 = vector.broadcast %294 : vector<1x1x8xf32> to vector<8x8x8xf32>
    %296 = arith.mulf %291, %295 : vector<8x8x8xf32>
    %297 = arith.addf %290, %296 : vector<8x8x8xf32>
    %c2_143 = arith.constant 2 : index
    %c3_144 = arith.constant 3 : index
    %c0_145 = arith.constant 0 : index
    %298 = vector.load %arg13[%c2_143, %c3_144, %c0_145] : memref<12x12x8xf32, #tpu.memory_space<vmem>>, vector<8x8x8xf32>
    %299 = vector.extract_strided_slice %203 {offsets = [2, 3, 0], sizes = [1, 1, 8], strides = [1, 1, 1]} : vector<5x5x8xf32> to vector<1x1x8xf32>
    %300 = vector.shape_cast %299 : vector<1x1x8xf32> to vector<1x8xf32>
    %301 = vector.shape_cast %300 : vector<1x8xf32> to vector<1x1x8xf32>
    %302 = vector.broadcast %301 : vector<1x1x8xf32> to vector<8x8x8xf32>
    %303 = arith.mulf %298, %302 : vector<8x8x8xf32>
    %304 = arith.addf %297, %303 : vector<8x8x8xf32>
    %c2_146 = arith.constant 2 : index
    %c4_147 = arith.constant 4 : index
    %c0_148 = arith.constant 0 : index
    %305 = vector.load %arg13[%c2_146, %c4_147, %c0_148] : memref<12x12x8xf32, #tpu.memory_space<vmem>>, vector<8x8x8xf32>
    %306 = vector.extract_strided_slice %203 {offsets = [2, 4, 0], sizes = [1, 1, 8], strides = [1, 1, 1]} : vector<5x5x8xf32> to vector<1x1x8xf32>
    %307 = vector.shape_cast %306 : vector<1x1x8xf32> to vector<1x8xf32>
    %308 = vector.shape_cast %307 : vector<1x8xf32> to vector<1x1x8xf32>
    %309 = vector.broadcast %308 : vector<1x1x8xf32> to vector<8x8x8xf32>
    %310 = arith.mulf %305, %309 : vector<8x8x8xf32>
    %311 = arith.addf %304, %310 : vector<8x8x8xf32>
    %c3_149 = arith.constant 3 : index
    %c0_150 = arith.constant 0 : index
    %c0_151 = arith.constant 0 : index
    %312 = vector.load %arg13[%c3_149, %c0_150, %c0_151] : memref<12x12x8xf32, #tpu.memory_space<vmem>>, vector<8x8x8xf32>
    %313 = vector.extract_strided_slice %203 {offsets = [3, 0, 0], sizes = [1, 1, 8], strides = [1, 1, 1]} : vector<5x5x8xf32> to vector<1x1x8xf32>
    %314 = vector.shape_cast %313 : vector<1x1x8xf32> to vector<1x8xf32>
    %315 = vector.shape_cast %314 : vector<1x8xf32> to vector<1x1x8xf32>
    %316 = vector.broadcast %315 : vector<1x1x8xf32> to vector<8x8x8xf32>
    %317 = arith.mulf %312, %316 : vector<8x8x8xf32>
    %318 = arith.addf %311, %317 : vector<8x8x8xf32>
    %c3_152 = arith.constant 3 : index
    %c1_153 = arith.constant 1 : index
    %c0_154 = arith.constant 0 : index
    %319 = vector.load %arg13[%c3_152, %c1_153, %c0_154] : memref<12x12x8xf32, #tpu.memory_space<vmem>>, vector<8x8x8xf32>
    %320 = vector.extract_strided_slice %203 {offsets = [3, 1, 0], sizes = [1, 1, 8], strides = [1, 1, 1]} : vector<5x5x8xf32> to vector<1x1x8xf32>
    %321 = vector.shape_cast %320 : vector<1x1x8xf32> to vector<1x8xf32>
    %322 = vector.shape_cast %321 : vector<1x8xf32> to vector<1x1x8xf32>
    %323 = vector.broadcast %322 : vector<1x1x8xf32> to vector<8x8x8xf32>
    %324 = arith.mulf %319, %323 : vector<8x8x8xf32>
    %325 = arith.addf %318, %324 : vector<8x8x8xf32>
    %c3_155 = arith.constant 3 : index
    %c2_156 = arith.constant 2 : index
    %c0_157 = arith.constant 0 : index
    %326 = vector.load %arg13[%c3_155, %c2_156, %c0_157] : memref<12x12x8xf32, #tpu.memory_space<vmem>>, vector<8x8x8xf32>
    %327 = vector.extract_strided_slice %203 {offsets = [3, 2, 0], sizes = [1, 1, 8], strides = [1, 1, 1]} : vector<5x5x8xf32> to vector<1x1x8xf32>
    %328 = vector.shape_cast %327 : vector<1x1x8xf32> to vector<1x8xf32>
    %329 = vector.shape_cast %328 : vector<1x8xf32> to vector<1x1x8xf32>
    %330 = vector.broadcast %329 : vector<1x1x8xf32> to vector<8x8x8xf32>
    %331 = arith.mulf %326, %330 : vector<8x8x8xf32>
    %332 = arith.addf %325, %331 : vector<8x8x8xf32>
    %c3_158 = arith.constant 3 : index
    %c3_159 = arith.constant 3 : index
    %c0_160 = arith.constant 0 : index
    %333 = vector.load %arg13[%c3_158, %c3_159, %c0_160] : memref<12x12x8xf32, #tpu.memory_space<vmem>>, vector<8x8x8xf32>
    %334 = vector.extract_strided_slice %203 {offsets = [3, 3, 0], sizes = [1, 1, 8], strides = [1, 1, 1]} : vector<5x5x8xf32> to vector<1x1x8xf32>
    %335 = vector.shape_cast %334 : vector<1x1x8xf32> to vector<1x8xf32>
    %336 = vector.shape_cast %335 : vector<1x8xf32> to vector<1x1x8xf32>
    %337 = vector.broadcast %336 : vector<1x1x8xf32> to vector<8x8x8xf32>
    %338 = arith.mulf %333, %337 : vector<8x8x8xf32>
    %339 = arith.addf %332, %338 : vector<8x8x8xf32>
    %c3_161 = arith.constant 3 : index
    %c4_162 = arith.constant 4 : index
    %c0_163 = arith.constant 0 : index
    %340 = vector.load %arg13[%c3_161, %c4_162, %c0_163] : memref<12x12x8xf32, #tpu.memory_space<vmem>>, vector<8x8x8xf32>
    %341 = vector.extract_strided_slice %203 {offsets = [3, 4, 0], sizes = [1, 1, 8], strides = [1, 1, 1]} : vector<5x5x8xf32> to vector<1x1x8xf32>
    %342 = vector.shape_cast %341 : vector<1x1x8xf32> to vector<1x8xf32>
    %343 = vector.shape_cast %342 : vector<1x8xf32> to vector<1x1x8xf32>
    %344 = vector.broadcast %343 : vector<1x1x8xf32> to vector<8x8x8xf32>
    %345 = arith.mulf %340, %344 : vector<8x8x8xf32>
    %346 = arith.addf %339, %345 : vector<8x8x8xf32>
    %c4_164 = arith.constant 4 : index
    %c0_165 = arith.constant 0 : index
    %c0_166 = arith.constant 0 : index
    %347 = vector.load %arg13[%c4_164, %c0_165, %c0_166] : memref<12x12x8xf32, #tpu.memory_space<vmem>>, vector<8x8x8xf32>
    %348 = vector.extract_strided_slice %203 {offsets = [4, 0, 0], sizes = [1, 1, 8], strides = [1, 1, 1]} : vector<5x5x8xf32> to vector<1x1x8xf32>
    %349 = vector.shape_cast %348 : vector<1x1x8xf32> to vector<1x8xf32>
    %350 = vector.shape_cast %349 : vector<1x8xf32> to vector<1x1x8xf32>
    %351 = vector.broadcast %350 : vector<1x1x8xf32> to vector<8x8x8xf32>
    %352 = arith.mulf %347, %351 : vector<8x8x8xf32>
    %353 = arith.addf %346, %352 : vector<8x8x8xf32>
    %c4_167 = arith.constant 4 : index
    %c1_168 = arith.constant 1 : index
    %c0_169 = arith.constant 0 : index
    %354 = vector.load %arg13[%c4_167, %c1_168, %c0_169] : memref<12x12x8xf32, #tpu.memory_space<vmem>>, vector<8x8x8xf32>
    %355 = vector.extract_strided_slice %203 {offsets = [4, 1, 0], sizes = [1, 1, 8], strides = [1, 1, 1]} : vector<5x5x8xf32> to vector<1x1x8xf32>
    %356 = vector.shape_cast %355 : vector<1x1x8xf32> to vector<1x8xf32>
    %357 = vector.shape_cast %356 : vector<1x8xf32> to vector<1x1x8xf32>
    %358 = vector.broadcast %357 : vector<1x1x8xf32> to vector<8x8x8xf32>
    %359 = arith.mulf %354, %358 : vector<8x8x8xf32>
    %360 = arith.addf %353, %359 : vector<8x8x8xf32>
    %c4_170 = arith.constant 4 : index
    %c2_171 = arith.constant 2 : index
    %c0_172 = arith.constant 0 : index
    %361 = vector.load %arg13[%c4_170, %c2_171, %c0_172] : memref<12x12x8xf32, #tpu.memory_space<vmem>>, vector<8x8x8xf32>
    %362 = vector.extract_strided_slice %203 {offsets = [4, 2, 0], sizes = [1, 1, 8], strides = [1, 1, 1]} : vector<5x5x8xf32> to vector<1x1x8xf32>
    %363 = vector.shape_cast %362 : vector<1x1x8xf32> to vector<1x8xf32>
    %364 = vector.shape_cast %363 : vector<1x8xf32> to vector<1x1x8xf32>
    %365 = vector.broadcast %364 : vector<1x1x8xf32> to vector<8x8x8xf32>
    %366 = arith.mulf %361, %365 : vector<8x8x8xf32>
    %367 = arith.addf %360, %366 : vector<8x8x8xf32>
    %c4_173 = arith.constant 4 : index
    %c3_174 = arith.constant 3 : index
    %c0_175 = arith.constant 0 : index
    %368 = vector.load %arg13[%c4_173, %c3_174, %c0_175] : memref<12x12x8xf32, #tpu.memory_space<vmem>>, vector<8x8x8xf32>
    %369 = vector.extract_strided_slice %203 {offsets = [4, 3, 0], sizes = [1, 1, 8], strides = [1, 1, 1]} : vector<5x5x8xf32> to vector<1x1x8xf32>
    %370 = vector.shape_cast %369 : vector<1x1x8xf32> to vector<1x8xf32>
    %371 = vector.shape_cast %370 : vector<1x8xf32> to vector<1x1x8xf32>
    %372 = vector.broadcast %371 : vector<1x1x8xf32> to vector<8x8x8xf32>
    %373 = arith.mulf %368, %372 : vector<8x8x8xf32>
    %374 = arith.addf %367, %373 : vector<8x8x8xf32>
    %c4_176 = arith.constant 4 : index
    %c4_177 = arith.constant 4 : index
    %c0_178 = arith.constant 0 : index
    %375 = vector.load %arg13[%c4_176, %c4_177, %c0_178] : memref<12x12x8xf32, #tpu.memory_space<vmem>>, vector<8x8x8xf32>
    %376 = vector.extract_strided_slice %203 {offsets = [4, 4, 0], sizes = [1, 1, 8], strides = [1, 1, 1]} : vector<5x5x8xf32> to vector<1x1x8xf32>
    %377 = vector.shape_cast %376 : vector<1x1x8xf32> to vector<1x8xf32>
    %378 = vector.shape_cast %377 : vector<1x8xf32> to vector<1x1x8xf32>
    %379 = vector.broadcast %378 : vector<1x1x8xf32> to vector<8x8x8xf32>
    %380 = arith.mulf %375, %379 : vector<8x8x8xf32>
    %381 = arith.addf %374, %380 : vector<8x8x8xf32>
    %382 = vector.shape_cast %204 : vector<1x8xf32> to vector<1x1x8xf32>
    %383 = vector.broadcast %382 : vector<1x1x8xf32> to vector<8x8x8xf32>
    %384 = arith.addf %381, %383 : vector<8x8x8xf32>
    %cst_179 = arith.constant 0.000000e+00 : f32
    %385 = vector.broadcast %cst_179 : f32 to vector<8x8x8xf32>
    %386 = arith.cmpf ogt, %384, %385 : vector<8x8x8xf32>
    %cst_180 = arith.constant 2.500000e-01 : f32
    %387 = vector.broadcast %cst_180 : f32 to vector<8x8x8xf32>
    %388 = arith.mulf %387, %384 : vector<8x8x8xf32>
    %389 = arith.select %386, %384, %388 : vector<8x8x8xi1>, vector<8x8x8xf32>
    %390 = vector.shape_cast %389 : vector<8x8x8xf32> to vector<64x8xf32>
    %c0_181 = arith.constant 0 : index
    %c0_182 = arith.constant 0 : index
    %391 = vector.load %arg8[%c0_181, %c0_182] : memref<8x4xf32, #tpu.memory_space<vmem>>, vector<8x4xf32>
    %cst_183 = arith.constant dense<0.000000e+00> : vector<64x4xf32>
    %392 = tpu.matmul %390, %391, %cst_183 {dimension_numbers = #tpu.dot_dimension_numbers<[1], [0], [0], [1], [0, 0, 1, 1], [], []>} : vector<64x8xf32>, vector<8x4xf32>, vector<64x4xf32> -> vector<64x4xf32>
    %c0_184 = arith.constant 0 : index
    %c0_185 = arith.constant 0 : index
    %393 = vector.load %arg9[%c0_184, %c0_185] : memref<1x4xf32, #tpu.memory_space<vmem>>, vector<1x4xf32>
    %394 = vector.broadcast %393 : vector<1x4xf32> to vector<64x4xf32>
    %395 = arith.addf %392, %394 : vector<64x4xf32>
    %cst_186 = arith.constant 0.000000e+00 : f32
    %396 = vector.broadcast %cst_186 : f32 to vector<64x4xf32>
    %397 = arith.cmpf ogt, %395, %396 : vector<64x4xf32>
    %cst_187 = arith.constant 2.500000e-01 : f32
    %398 = vector.broadcast %cst_187 : f32 to vector<64x4xf32>
    %399 = arith.mulf %398, %395 : vector<64x4xf32>
    %400 = arith.select %397, %395, %399 : vector<64x4xi1>, vector<64x4xf32>
    %cst_188 = arith.constant 0.000000e+00 : f32
    %401 = vector.broadcast %cst_188 : f32 to vector<8x16xf32>
    %402 = vector.extract_strided_slice %400 {offsets = [0, 0], sizes = [8, 4], strides = [1, 1]} : vector<64x4xf32> to vector<8x4xf32>
    %c0_189 = arith.constant 0 : index
    %c0_190 = arith.constant 0 : index
    %c0_191 = arith.constant 0 : index
    %403 = vector.load %arg10[%c0_189, %c0_190, %c0_191] : memref<8x4x16xf32, #tpu.memory_space<vmem>>, vector<1x4x16xf32>
    %404 = vector.shape_cast %403 : vector<1x4x16xf32> to vector<4x16xf32>
    %cst_192 = arith.constant dense<0.000000e+00> : vector<8x16xf32>
    %405 = tpu.matmul %402, %404, %cst_192 {dimension_numbers = #tpu.dot_dimension_numbers<[1], [0], [0], [1], [0, 0, 1, 1], [], []>} : vector<8x4xf32>, vector<4x16xf32>, vector<8x16xf32> -> vector<8x16xf32>
    %406 = arith.addf %401, %405 : vector<8x16xf32>
    %407 = vector.extract_strided_slice %400 {offsets = [8, 0], sizes = [8, 4], strides = [1, 1]} : vector<64x4xf32> to vector<8x4xf32>
    %c1_193 = arith.constant 1 : index
    %c0_194 = arith.constant 0 : index
    %c0_195 = arith.constant 0 : index
    %408 = vector.load %arg10[%c1_193, %c0_194, %c0_195] : memref<8x4x16xf32, #tpu.memory_space<vmem>>, vector<1x4x16xf32>
    %409 = vector.shape_cast %408 : vector<1x4x16xf32> to vector<4x16xf32>
    %cst_196 = arith.constant dense<0.000000e+00> : vector<8x16xf32>
    %410 = tpu.matmul %407, %409, %cst_196 {dimension_numbers = #tpu.dot_dimension_numbers<[1], [0], [0], [1], [0, 0, 1, 1], [], []>} : vector<8x4xf32>, vector<4x16xf32>, vector<8x16xf32> -> vector<8x16xf32>
    %411 = arith.addf %406, %410 : vector<8x16xf32>
    %412 = vector.extract_strided_slice %400 {offsets = [16, 0], sizes = [8, 4], strides = [1, 1]} : vector<64x4xf32> to vector<8x4xf32>
    %c2_197 = arith.constant 2 : index
    %c0_198 = arith.constant 0 : index
    %c0_199 = arith.constant 0 : index
    %413 = vector.load %arg10[%c2_197, %c0_198, %c0_199] : memref<8x4x16xf32, #tpu.memory_space<vmem>>, vector<1x4x16xf32>
    %414 = vector.shape_cast %413 : vector<1x4x16xf32> to vector<4x16xf32>
    %cst_200 = arith.constant dense<0.000000e+00> : vector<8x16xf32>
    %415 = tpu.matmul %412, %414, %cst_200 {dimension_numbers = #tpu.dot_dimension_numbers<[1], [0], [0], [1], [0, 0, 1, 1], [], []>} : vector<8x4xf32>, vector<4x16xf32>, vector<8x16xf32> -> vector<8x16xf32>
    %416 = arith.addf %411, %415 : vector<8x16xf32>
    %417 = vector.extract_strided_slice %400 {offsets = [24, 0], sizes = [8, 4], strides = [1, 1]} : vector<64x4xf32> to vector<8x4xf32>
    %c3_201 = arith.constant 3 : index
    %c0_202 = arith.constant 0 : index
    %c0_203 = arith.constant 0 : index
    %418 = vector.load %arg10[%c3_201, %c0_202, %c0_203] : memref<8x4x16xf32, #tpu.memory_space<vmem>>, vector<1x4x16xf32>
    %419 = vector.shape_cast %418 : vector<1x4x16xf32> to vector<4x16xf32>
    %cst_204 = arith.constant dense<0.000000e+00> : vector<8x16xf32>
    %420 = tpu.matmul %417, %419, %cst_204 {dimension_numbers = #tpu.dot_dimension_numbers<[1], [0], [0], [1], [0, 0, 1, 1], [], []>} : vector<8x4xf32>, vector<4x16xf32>, vector<8x16xf32> -> vector<8x16xf32>
    %421 = arith.addf %416, %420 : vector<8x16xf32>
    %422 = vector.extract_strided_slice %400 {offsets = [32, 0], sizes = [8, 4], strides = [1, 1]} : vector<64x4xf32> to vector<8x4xf32>
    %c4_205 = arith.constant 4 : index
    %c0_206 = arith.constant 0 : index
    %c0_207 = arith.constant 0 : index
    %423 = vector.load %arg10[%c4_205, %c0_206, %c0_207] : memref<8x4x16xf32, #tpu.memory_space<vmem>>, vector<1x4x16xf32>
    %424 = vector.shape_cast %423 : vector<1x4x16xf32> to vector<4x16xf32>
    %cst_208 = arith.constant dense<0.000000e+00> : vector<8x16xf32>
    %425 = tpu.matmul %422, %424, %cst_208 {dimension_numbers = #tpu.dot_dimension_numbers<[1], [0], [0], [1], [0, 0, 1, 1], [], []>} : vector<8x4xf32>, vector<4x16xf32>, vector<8x16xf32> -> vector<8x16xf32>
    %426 = arith.addf %421, %425 : vector<8x16xf32>
    %427 = vector.extract_strided_slice %400 {offsets = [40, 0], sizes = [8, 4], strides = [1, 1]} : vector<64x4xf32> to vector<8x4xf32>
    %c5 = arith.constant 5 : index
    %c0_209 = arith.constant 0 : index
    %c0_210 = arith.constant 0 : index
    %428 = vector.load %arg10[%c5, %c0_209, %c0_210] : memref<8x4x16xf32, #tpu.memory_space<vmem>>, vector<1x4x16xf32>
    %429 = vector.shape_cast %428 : vector<1x4x16xf32> to vector<4x16xf32>
    %cst_211 = arith.constant dense<0.000000e+00> : vector<8x16xf32>
    %430 = tpu.matmul %427, %429, %cst_211 {dimension_numbers = #tpu.dot_dimension_numbers<[1], [0], [0], [1], [0, 0, 1, 1], [], []>} : vector<8x4xf32>, vector<4x16xf32>, vector<8x16xf32> -> vector<8x16xf32>
    %431 = arith.addf %426, %430 : vector<8x16xf32>
    %432 = vector.extract_strided_slice %400 {offsets = [48, 0], sizes = [8, 4], strides = [1, 1]} : vector<64x4xf32> to vector<8x4xf32>
    %c6 = arith.constant 6 : index
    %c0_212 = arith.constant 0 : index
    %c0_213 = arith.constant 0 : index
    %433 = vector.load %arg10[%c6, %c0_212, %c0_213] : memref<8x4x16xf32, #tpu.memory_space<vmem>>, vector<1x4x16xf32>
    %434 = vector.shape_cast %433 : vector<1x4x16xf32> to vector<4x16xf32>
    %cst_214 = arith.constant dense<0.000000e+00> : vector<8x16xf32>
    %435 = tpu.matmul %432, %434, %cst_214 {dimension_numbers = #tpu.dot_dimension_numbers<[1], [0], [0], [1], [0, 0, 1, 1], [], []>} : vector<8x4xf32>, vector<4x16xf32>, vector<8x16xf32> -> vector<8x16xf32>
    %436 = arith.addf %431, %435 : vector<8x16xf32>
    %437 = vector.extract_strided_slice %400 {offsets = [56, 0], sizes = [8, 4], strides = [1, 1]} : vector<64x4xf32> to vector<8x4xf32>
    %c7 = arith.constant 7 : index
    %c0_215 = arith.constant 0 : index
    %c0_216 = arith.constant 0 : index
    %438 = vector.load %arg10[%c7, %c0_215, %c0_216] : memref<8x4x16xf32, #tpu.memory_space<vmem>>, vector<1x4x16xf32>
    %439 = vector.shape_cast %438 : vector<1x4x16xf32> to vector<4x16xf32>
    %cst_217 = arith.constant dense<0.000000e+00> : vector<8x16xf32>
    %440 = tpu.matmul %437, %439, %cst_217 {dimension_numbers = #tpu.dot_dimension_numbers<[1], [0], [0], [1], [0, 0, 1, 1], [], []>} : vector<8x4xf32>, vector<4x16xf32>, vector<8x16xf32> -> vector<8x16xf32>
    %441 = arith.addf %436, %440 : vector<8x16xf32>
    %c0_218 = arith.constant 0 : index
    %c0_219 = arith.constant 0 : index
    %442 = vector.load %arg11[%c0_218, %c0_219] : memref<1x16xf32, #tpu.memory_space<vmem>>, vector<1x16xf32>
    %443 = vector.broadcast %442 : vector<1x16xf32> to vector<8x16xf32>
    %444 = arith.addf %441, %443 : vector<8x16xf32>
    %c0_220 = arith.constant 0 : index
    %c0_221 = arith.constant 0 : index
    %c0_222 = arith.constant 0 : index
    %445 = vector.load %arg12[%c0_220, %c0_221, %c0_222] : memref<1x8x16xf32, #tpu.memory_space<vmem>>, vector<1x8x16xf32>
    %446 = vector.shape_cast %445 : vector<1x8x16xf32> to vector<8x16xf32>
    %447 = vector.shape_cast %444 : vector<8x16xf32> to vector<1x8x16xf32>
    tpu.vector_store %arg12[%c0_220, %c0_221, %c0_222], %447 {strides = array<i32>} : memref<1x8x16xf32, #tpu.memory_space<vmem>>, vector<1x8x16xf32>,
    return
  }
  func.func @transform_0(%arg0: i32) -> (i32, i32, i32, i32) {
    %c0_i32 = arith.constant 0 : i32
    %c0_i32_0 = arith.constant 0 : i32
    %c0_i32_1 = arith.constant 0 : i32
    %c0_i32_2 = arith.constant 0 : i32
    return %arg0, %c0_i32, %c0_i32_0, %c0_i32_1 : i32, i32, i32, i32
  }
  func.func @transform_1(%arg0: i32) -> (i32, i32, i32) {
    %c0_i32 = arith.constant 0 : i32
    %c0_i32_0 = arith.constant 0 : i32
    %c0_i32_1 = arith.constant 0 : i32
    %c0_i32_2 = arith.constant 0 : i32
    return %c0_i32, %c0_i32_0, %c0_i32_1 : i32, i32, i32
  }
  func.func @transform_2(%arg0: i32) -> (i32, i32) {
    %c0_i32 = arith.constant 0 : i32
    %c0_i32_0 = arith.constant 0 : i32
    %c0_i32_1 = arith.constant 0 : i32
    return %c0_i32, %c0_i32_0 : i32, i32
  }
  func.func @transform_3(%arg0: i32) -> (i32, i32) {
    %c0_i32 = arith.constant 0 : i32
    %c0_i32_0 = arith.constant 0 : i32
    %c0_i32_1 = arith.constant 0 : i32
    return %c0_i32, %c0_i32_0 : i32, i32
  }
  func.func @transform_4(%arg0: i32) -> (i32, i32) {
    %c0_i32 = arith.constant 0 : i32
    %c0_i32_0 = arith.constant 0 : i32
    %c0_i32_1 = arith.constant 0 : i32
    return %c0_i32, %c0_i32_0 : i32, i32
  }
  func.func @transform_5(%arg0: i32) -> (i32, i32, i32) {
    %c0_i32 = arith.constant 0 : i32
    %c0_i32_0 = arith.constant 0 : i32
    %c0_i32_1 = arith.constant 0 : i32
    %c0_i32_2 = arith.constant 0 : i32
    return %c0_i32, %c0_i32_0, %c0_i32_1 : i32, i32, i32
  }
  func.func @transform_6(%arg0: i32) -> (i32, i32) {
    %c0_i32 = arith.constant 0 : i32
    %c0_i32_0 = arith.constant 0 : i32
    %c0_i32_1 = arith.constant 0 : i32
    return %c0_i32, %c0_i32_0 : i32, i32
  }
  func.func @transform_7(%arg0: i32) -> (i32, i32) {
    %c0_i32 = arith.constant 0 : i32
    %c0_i32_0 = arith.constant 0 : i32
    %c0_i32_1 = arith.constant 0 : i32
    return %c0_i32, %c0_i32_0 : i32, i32
  }
  func.func @transform_8(%arg0: i32) -> (i32, i32) {
    %c0_i32 = arith.constant 0 : i32
    %c0_i32_0 = arith.constant 0 : i32
    %c0_i32_1 = arith.constant 0 : i32
    return %c0_i32, %c0_i32_0 : i32, i32
  }
  func.func @transform_9(%arg0: i32) -> (i32, i32, i32) {
    %c0_i32 = arith.constant 0 : i32
    %c0_i32_0 = arith.constant 0 : i32
    %c0_i32_1 = arith.constant 0 : i32
    %c0_i32_2 = arith.constant 0 : i32
    return %c0_i32, %c0_i32_0, %c0_i32_1 : i32, i32, i32
  }
  func.func @transform_10(%arg0: i32) -> (i32, i32) {
    %c0_i32 = arith.constant 0 : i32
    %c0_i32_0 = arith.constant 0 : i32
    %c0_i32_1 = arith.constant 0 : i32
    return %c0_i32, %c0_i32_0 : i32, i32
  }
  func.func @transform_11(%arg0: i32) -> (i32, i32, i32) {
    %c0_i32 = arith.constant 0 : i32
    %c0_i32_0 = arith.constant 0 : i32
    %c0_i32_1 = arith.constant 0 : i32
    return %arg0, %c0_i32, %c0_i32_0 : i32, i32, i32
  }
}

module attributes {stable_mosaic.version = 11 : i64} {
  func.func @_bilstm_head_kernel(%arg0: memref<2x8x16xf32, #tpu.memory_space<vmem>>, %arg1: memref<16x64xf32, #tpu.memory_space<vmem>>, %arg2: memref<16x64xf32, #tpu.memory_space<vmem>>, %arg3: memref<1x64xf32, #tpu.memory_space<vmem>>, %arg4: memref<16x64xf32, #tpu.memory_space<vmem>>, %arg5: memref<16x64xf32, #tpu.memory_space<vmem>>, %arg6: memref<1x64xf32, #tpu.memory_space<vmem>>, %arg7: memref<32x64xf32, #tpu.memory_space<vmem>>, %arg8: memref<1x64xf32, #tpu.memory_space<vmem>>, %arg9: memref<2x64xf32, #tpu.memory_space<vmem>>) attributes {dimension_semantics = [], scalar_prefetch = 0 : i64, scratch_operands = 0 : i64, tpu.core_type = #tpu.core_type<tc>} {
    %c0 = arith.constant 0 : index
    %c0_0 = arith.constant 0 : index
    %c0_1 = arith.constant 0 : index
    %0 = vector.load %arg0[%c0, %c0_0, %c0_1] : memref<2x8x16xf32, #tpu.memory_space<vmem>>, vector<2x8x16xf32>
    %1 = vector.shape_cast %0 : vector<2x8x16xf32> to vector<16x16xf32>
    %c0_2 = arith.constant 0 : index
    %c0_3 = arith.constant 0 : index
    %2 = vector.load %arg1[%c0_2, %c0_3] : memref<16x64xf32, #tpu.memory_space<vmem>>, vector<16x64xf32>
    %cst = arith.constant dense<0.000000e+00> : vector<16x64xf32>
    %3 = tpu.matmul %1, %2, %cst {dimension_numbers = #tpu.dot_dimension_numbers<[1], [0], [0], [1], [0, 0, 1, 1], [], []>} : vector<16x16xf32>, vector<16x64xf32>, vector<16x64xf32> -> vector<16x64xf32>
    %c0_4 = arith.constant 0 : index
    %c0_5 = arith.constant 0 : index
    %4 = vector.load %arg3[%c0_4, %c0_5] : memref<1x64xf32, #tpu.memory_space<vmem>>, vector<1x64xf32>
    %5 = vector.broadcast %4 : vector<1x64xf32> to vector<16x64xf32>
    %6 = arith.addf %3, %5 : vector<16x64xf32>
    %7 = vector.shape_cast %6 : vector<16x64xf32> to vector<2x8x64xf32>
    %c0_6 = arith.constant 0 : index
    %c0_7 = arith.constant 0 : index
    %8 = vector.load %arg4[%c0_6, %c0_7] : memref<16x64xf32, #tpu.memory_space<vmem>>, vector<16x64xf32>
    %cst_8 = arith.constant dense<0.000000e+00> : vector<16x64xf32>
    %9 = tpu.matmul %1, %8, %cst_8 {dimension_numbers = #tpu.dot_dimension_numbers<[1], [0], [0], [1], [0, 0, 1, 1], [], []>} : vector<16x16xf32>, vector<16x64xf32>, vector<16x64xf32> -> vector<16x64xf32>
    %c0_9 = arith.constant 0 : index
    %c0_10 = arith.constant 0 : index
    %10 = vector.load %arg6[%c0_9, %c0_10] : memref<1x64xf32, #tpu.memory_space<vmem>>, vector<1x64xf32>
    %11 = vector.broadcast %10 : vector<1x64xf32> to vector<16x64xf32>
    %12 = arith.addf %9, %11 : vector<16x64xf32>
    %13 = vector.shape_cast %12 : vector<16x64xf32> to vector<2x8x64xf32>
    %c0_11 = arith.constant 0 : index
    %c0_12 = arith.constant 0 : index
    %14 = vector.load %arg2[%c0_11, %c0_12] : memref<16x64xf32, #tpu.memory_space<vmem>>, vector<16x64xf32>
    %c0_13 = arith.constant 0 : index
    %c0_14 = arith.constant 0 : index
    %15 = vector.load %arg5[%c0_13, %c0_14] : memref<16x64xf32, #tpu.memory_space<vmem>>, vector<16x64xf32>
    %cst_15 = arith.constant 0.000000e+00 : f32
    %16 = vector.broadcast %cst_15 : f32 to vector<2x16xf32>
    %17 = vector.extract_strided_slice %7 {offsets = [0, 0, 0], sizes = [2, 1, 64], strides = [1, 1, 1]} : vector<2x8x64xf32> to vector<2x1x64xf32>
    %18 = vector.shape_cast %17 : vector<2x1x64xf32> to vector<2x64xf32>
    %cst_16 = arith.constant dense<0.000000e+00> : vector<2x64xf32>
    %19 = tpu.matmul %16, %14, %cst_16 {dimension_numbers = #tpu.dot_dimension_numbers<[1], [0], [0], [1], [0, 0, 1, 1], [], []>} : vector<2x16xf32>, vector<16x64xf32>, vector<2x64xf32> -> vector<2x64xf32>
    %20 = arith.addf %18, %19 : vector<2x64xf32>
    %21 = vector.extract_strided_slice %20 {offsets = [0, 0], sizes = [2, 16], strides = [1, 1]} : vector<2x64xf32> to vector<2x16xf32>
    %22 = arith.negf %21 : vector<2x16xf32>
    %23 = math.exp %22 : vector<2x16xf32>
    %cst_17 = arith.constant 1.000000e+00 : f32
    %24 = vector.broadcast %cst_17 : f32 to vector<2x16xf32>
    %25 = arith.addf %24, %23 : vector<2x16xf32>
    %26 = arith.divf %24, %25 : vector<2x16xf32>
    %27 = vector.extract_strided_slice %20 {offsets = [0, 16], sizes = [2, 16], strides = [1, 1]} : vector<2x64xf32> to vector<2x16xf32>
    %28 = arith.negf %27 : vector<2x16xf32>
    %29 = math.exp %28 : vector<2x16xf32>
    %cst_18 = arith.constant 1.000000e+00 : f32
    %30 = vector.broadcast %cst_18 : f32 to vector<2x16xf32>
    %31 = arith.addf %30, %29 : vector<2x16xf32>
    %32 = arith.divf %30, %31 : vector<2x16xf32>
    %33 = vector.extract_strided_slice %20 {offsets = [0, 32], sizes = [2, 16], strides = [1, 1]} : vector<2x64xf32> to vector<2x16xf32>
    %34 = math.tanh %33 : vector<2x16xf32>
    %35 = vector.extract_strided_slice %20 {offsets = [0, 48], sizes = [2, 16], strides = [1, 1]} : vector<2x64xf32> to vector<2x16xf32>
    %36 = arith.negf %35 : vector<2x16xf32>
    %37 = math.exp %36 : vector<2x16xf32>
    %cst_19 = arith.constant 1.000000e+00 : f32
    %38 = vector.broadcast %cst_19 : f32 to vector<2x16xf32>
    %39 = arith.addf %38, %37 : vector<2x16xf32>
    %40 = arith.divf %38, %39 : vector<2x16xf32>
    %41 = arith.mulf %32, %16 : vector<2x16xf32>
    %42 = arith.mulf %26, %34 : vector<2x16xf32>
    %43 = arith.addf %41, %42 : vector<2x16xf32>
    %44 = math.tanh %43 : vector<2x16xf32>
    %45 = arith.mulf %40, %44 : vector<2x16xf32>
    %46 = vector.extract_strided_slice %13 {offsets = [0, 7, 0], sizes = [2, 1, 64], strides = [1, 1, 1]} : vector<2x8x64xf32> to vector<2x1x64xf32>
    %47 = vector.shape_cast %46 : vector<2x1x64xf32> to vector<2x64xf32>
    %cst_20 = arith.constant dense<0.000000e+00> : vector<2x64xf32>
    %48 = tpu.matmul %16, %15, %cst_20 {dimension_numbers = #tpu.dot_dimension_numbers<[1], [0], [0], [1], [0, 0, 1, 1], [], []>} : vector<2x16xf32>, vector<16x64xf32>, vector<2x64xf32> -> vector<2x64xf32>
    %49 = arith.addf %47, %48 : vector<2x64xf32>
    %50 = vector.extract_strided_slice %49 {offsets = [0, 0], sizes = [2, 16], strides = [1, 1]} : vector<2x64xf32> to vector<2x16xf32>
    %51 = arith.negf %50 : vector<2x16xf32>
    %52 = math.exp %51 : vector<2x16xf32>
    %cst_21 = arith.constant 1.000000e+00 : f32
    %53 = vector.broadcast %cst_21 : f32 to vector<2x16xf32>
    %54 = arith.addf %53, %52 : vector<2x16xf32>
    %55 = arith.divf %53, %54 : vector<2x16xf32>
    %56 = vector.extract_strided_slice %49 {offsets = [0, 16], sizes = [2, 16], strides = [1, 1]} : vector<2x64xf32> to vector<2x16xf32>
    %57 = arith.negf %56 : vector<2x16xf32>
    %58 = math.exp %57 : vector<2x16xf32>
    %cst_22 = arith.constant 1.000000e+00 : f32
    %59 = vector.broadcast %cst_22 : f32 to vector<2x16xf32>
    %60 = arith.addf %59, %58 : vector<2x16xf32>
    %61 = arith.divf %59, %60 : vector<2x16xf32>
    %62 = vector.extract_strided_slice %49 {offsets = [0, 32], sizes = [2, 16], strides = [1, 1]} : vector<2x64xf32> to vector<2x16xf32>
    %63 = math.tanh %62 : vector<2x16xf32>
    %64 = vector.extract_strided_slice %49 {offsets = [0, 48], sizes = [2, 16], strides = [1, 1]} : vector<2x64xf32> to vector<2x16xf32>
    %65 = arith.negf %64 : vector<2x16xf32>
    %66 = math.exp %65 : vector<2x16xf32>
    %cst_23 = arith.constant 1.000000e+00 : f32
    %67 = vector.broadcast %cst_23 : f32 to vector<2x16xf32>
    %68 = arith.addf %67, %66 : vector<2x16xf32>
    %69 = arith.divf %67, %68 : vector<2x16xf32>
    %70 = arith.mulf %61, %16 : vector<2x16xf32>
    %71 = arith.mulf %55, %63 : vector<2x16xf32>
    %72 = arith.addf %70, %71 : vector<2x16xf32>
    %73 = math.tanh %72 : vector<2x16xf32>
    %74 = arith.mulf %69, %73 : vector<2x16xf32>
    %75 = vector.extract_strided_slice %7 {offsets = [0, 1, 0], sizes = [2, 1, 64], strides = [1, 1, 1]} : vector<2x8x64xf32> to vector<2x1x64xf32>
    %76 = vector.shape_cast %75 : vector<2x1x64xf32> to vector<2x64xf32>
    %cst_24 = arith.constant dense<0.000000e+00> : vector<2x64xf32>
    %77 = tpu.matmul %45, %14, %cst_24 {dimension_numbers = #tpu.dot_dimension_numbers<[1], [0], [0], [1], [0, 0, 1, 1], [], []>} : vector<2x16xf32>, vector<16x64xf32>, vector<2x64xf32> -> vector<2x64xf32>
    %78 = arith.addf %76, %77 : vector<2x64xf32>
    %79 = vector.extract_strided_slice %78 {offsets = [0, 0], sizes = [2, 16], strides = [1, 1]} : vector<2x64xf32> to vector<2x16xf32>
    %80 = arith.negf %79 : vector<2x16xf32>
    %81 = math.exp %80 : vector<2x16xf32>
    %cst_25 = arith.constant 1.000000e+00 : f32
    %82 = vector.broadcast %cst_25 : f32 to vector<2x16xf32>
    %83 = arith.addf %82, %81 : vector<2x16xf32>
    %84 = arith.divf %82, %83 : vector<2x16xf32>
    %85 = vector.extract_strided_slice %78 {offsets = [0, 16], sizes = [2, 16], strides = [1, 1]} : vector<2x64xf32> to vector<2x16xf32>
    %86 = arith.negf %85 : vector<2x16xf32>
    %87 = math.exp %86 : vector<2x16xf32>
    %cst_26 = arith.constant 1.000000e+00 : f32
    %88 = vector.broadcast %cst_26 : f32 to vector<2x16xf32>
    %89 = arith.addf %88, %87 : vector<2x16xf32>
    %90 = arith.divf %88, %89 : vector<2x16xf32>
    %91 = vector.extract_strided_slice %78 {offsets = [0, 32], sizes = [2, 16], strides = [1, 1]} : vector<2x64xf32> to vector<2x16xf32>
    %92 = math.tanh %91 : vector<2x16xf32>
    %93 = vector.extract_strided_slice %78 {offsets = [0, 48], sizes = [2, 16], strides = [1, 1]} : vector<2x64xf32> to vector<2x16xf32>
    %94 = arith.negf %93 : vector<2x16xf32>
    %95 = math.exp %94 : vector<2x16xf32>
    %cst_27 = arith.constant 1.000000e+00 : f32
    %96 = vector.broadcast %cst_27 : f32 to vector<2x16xf32>
    %97 = arith.addf %96, %95 : vector<2x16xf32>
    %98 = arith.divf %96, %97 : vector<2x16xf32>
    %99 = arith.mulf %90, %43 : vector<2x16xf32>
    %100 = arith.mulf %84, %92 : vector<2x16xf32>
    %101 = arith.addf %99, %100 : vector<2x16xf32>
    %102 = math.tanh %101 : vector<2x16xf32>
    %103 = arith.mulf %98, %102 : vector<2x16xf32>
    %104 = vector.extract_strided_slice %13 {offsets = [0, 6, 0], sizes = [2, 1, 64], strides = [1, 1, 1]} : vector<2x8x64xf32> to vector<2x1x64xf32>
    %105 = vector.shape_cast %104 : vector<2x1x64xf32> to vector<2x64xf32>
    %cst_28 = arith.constant dense<0.000000e+00> : vector<2x64xf32>
    %106 = tpu.matmul %74, %15, %cst_28 {dimension_numbers = #tpu.dot_dimension_numbers<[1], [0], [0], [1], [0, 0, 1, 1], [], []>} : vector<2x16xf32>, vector<16x64xf32>, vector<2x64xf32> -> vector<2x64xf32>
    %107 = arith.addf %105, %106 : vector<2x64xf32>
    %108 = vector.extract_strided_slice %107 {offsets = [0, 0], sizes = [2, 16], strides = [1, 1]} : vector<2x64xf32> to vector<2x16xf32>
    %109 = arith.negf %108 : vector<2x16xf32>
    %110 = math.exp %109 : vector<2x16xf32>
    %cst_29 = arith.constant 1.000000e+00 : f32
    %111 = vector.broadcast %cst_29 : f32 to vector<2x16xf32>
    %112 = arith.addf %111, %110 : vector<2x16xf32>
    %113 = arith.divf %111, %112 : vector<2x16xf32>
    %114 = vector.extract_strided_slice %107 {offsets = [0, 16], sizes = [2, 16], strides = [1, 1]} : vector<2x64xf32> to vector<2x16xf32>
    %115 = arith.negf %114 : vector<2x16xf32>
    %116 = math.exp %115 : vector<2x16xf32>
    %cst_30 = arith.constant 1.000000e+00 : f32
    %117 = vector.broadcast %cst_30 : f32 to vector<2x16xf32>
    %118 = arith.addf %117, %116 : vector<2x16xf32>
    %119 = arith.divf %117, %118 : vector<2x16xf32>
    %120 = vector.extract_strided_slice %107 {offsets = [0, 32], sizes = [2, 16], strides = [1, 1]} : vector<2x64xf32> to vector<2x16xf32>
    %121 = math.tanh %120 : vector<2x16xf32>
    %122 = vector.extract_strided_slice %107 {offsets = [0, 48], sizes = [2, 16], strides = [1, 1]} : vector<2x64xf32> to vector<2x16xf32>
    %123 = arith.negf %122 : vector<2x16xf32>
    %124 = math.exp %123 : vector<2x16xf32>
    %cst_31 = arith.constant 1.000000e+00 : f32
    %125 = vector.broadcast %cst_31 : f32 to vector<2x16xf32>
    %126 = arith.addf %125, %124 : vector<2x16xf32>
    %127 = arith.divf %125, %126 : vector<2x16xf32>
    %128 = arith.mulf %119, %72 : vector<2x16xf32>
    %129 = arith.mulf %113, %121 : vector<2x16xf32>
    %130 = arith.addf %128, %129 : vector<2x16xf32>
    %131 = math.tanh %130 : vector<2x16xf32>
    %132 = arith.mulf %127, %131 : vector<2x16xf32>
    %133 = vector.extract_strided_slice %7 {offsets = [0, 2, 0], sizes = [2, 1, 64], strides = [1, 1, 1]} : vector<2x8x64xf32> to vector<2x1x64xf32>
    %134 = vector.shape_cast %133 : vector<2x1x64xf32> to vector<2x64xf32>
    %cst_32 = arith.constant dense<0.000000e+00> : vector<2x64xf32>
    %135 = tpu.matmul %103, %14, %cst_32 {dimension_numbers = #tpu.dot_dimension_numbers<[1], [0], [0], [1], [0, 0, 1, 1], [], []>} : vector<2x16xf32>, vector<16x64xf32>, vector<2x64xf32> -> vector<2x64xf32>
    %136 = arith.addf %134, %135 : vector<2x64xf32>
    %137 = vector.extract_strided_slice %136 {offsets = [0, 0], sizes = [2, 16], strides = [1, 1]} : vector<2x64xf32> to vector<2x16xf32>
    %138 = arith.negf %137 : vector<2x16xf32>
    %139 = math.exp %138 : vector<2x16xf32>
    %cst_33 = arith.constant 1.000000e+00 : f32
    %140 = vector.broadcast %cst_33 : f32 to vector<2x16xf32>
    %141 = arith.addf %140, %139 : vector<2x16xf32>
    %142 = arith.divf %140, %141 : vector<2x16xf32>
    %143 = vector.extract_strided_slice %136 {offsets = [0, 16], sizes = [2, 16], strides = [1, 1]} : vector<2x64xf32> to vector<2x16xf32>
    %144 = arith.negf %143 : vector<2x16xf32>
    %145 = math.exp %144 : vector<2x16xf32>
    %cst_34 = arith.constant 1.000000e+00 : f32
    %146 = vector.broadcast %cst_34 : f32 to vector<2x16xf32>
    %147 = arith.addf %146, %145 : vector<2x16xf32>
    %148 = arith.divf %146, %147 : vector<2x16xf32>
    %149 = vector.extract_strided_slice %136 {offsets = [0, 32], sizes = [2, 16], strides = [1, 1]} : vector<2x64xf32> to vector<2x16xf32>
    %150 = math.tanh %149 : vector<2x16xf32>
    %151 = vector.extract_strided_slice %136 {offsets = [0, 48], sizes = [2, 16], strides = [1, 1]} : vector<2x64xf32> to vector<2x16xf32>
    %152 = arith.negf %151 : vector<2x16xf32>
    %153 = math.exp %152 : vector<2x16xf32>
    %cst_35 = arith.constant 1.000000e+00 : f32
    %154 = vector.broadcast %cst_35 : f32 to vector<2x16xf32>
    %155 = arith.addf %154, %153 : vector<2x16xf32>
    %156 = arith.divf %154, %155 : vector<2x16xf32>
    %157 = arith.mulf %148, %101 : vector<2x16xf32>
    %158 = arith.mulf %142, %150 : vector<2x16xf32>
    %159 = arith.addf %157, %158 : vector<2x16xf32>
    %160 = math.tanh %159 : vector<2x16xf32>
    %161 = arith.mulf %156, %160 : vector<2x16xf32>
    %162 = vector.extract_strided_slice %13 {offsets = [0, 5, 0], sizes = [2, 1, 64], strides = [1, 1, 1]} : vector<2x8x64xf32> to vector<2x1x64xf32>
    %163 = vector.shape_cast %162 : vector<2x1x64xf32> to vector<2x64xf32>
    %cst_36 = arith.constant dense<0.000000e+00> : vector<2x64xf32>
    %164 = tpu.matmul %132, %15, %cst_36 {dimension_numbers = #tpu.dot_dimension_numbers<[1], [0], [0], [1], [0, 0, 1, 1], [], []>} : vector<2x16xf32>, vector<16x64xf32>, vector<2x64xf32> -> vector<2x64xf32>
    %165 = arith.addf %163, %164 : vector<2x64xf32>
    %166 = vector.extract_strided_slice %165 {offsets = [0, 0], sizes = [2, 16], strides = [1, 1]} : vector<2x64xf32> to vector<2x16xf32>
    %167 = arith.negf %166 : vector<2x16xf32>
    %168 = math.exp %167 : vector<2x16xf32>
    %cst_37 = arith.constant 1.000000e+00 : f32
    %169 = vector.broadcast %cst_37 : f32 to vector<2x16xf32>
    %170 = arith.addf %169, %168 : vector<2x16xf32>
    %171 = arith.divf %169, %170 : vector<2x16xf32>
    %172 = vector.extract_strided_slice %165 {offsets = [0, 16], sizes = [2, 16], strides = [1, 1]} : vector<2x64xf32> to vector<2x16xf32>
    %173 = arith.negf %172 : vector<2x16xf32>
    %174 = math.exp %173 : vector<2x16xf32>
    %cst_38 = arith.constant 1.000000e+00 : f32
    %175 = vector.broadcast %cst_38 : f32 to vector<2x16xf32>
    %176 = arith.addf %175, %174 : vector<2x16xf32>
    %177 = arith.divf %175, %176 : vector<2x16xf32>
    %178 = vector.extract_strided_slice %165 {offsets = [0, 32], sizes = [2, 16], strides = [1, 1]} : vector<2x64xf32> to vector<2x16xf32>
    %179 = math.tanh %178 : vector<2x16xf32>
    %180 = vector.extract_strided_slice %165 {offsets = [0, 48], sizes = [2, 16], strides = [1, 1]} : vector<2x64xf32> to vector<2x16xf32>
    %181 = arith.negf %180 : vector<2x16xf32>
    %182 = math.exp %181 : vector<2x16xf32>
    %cst_39 = arith.constant 1.000000e+00 : f32
    %183 = vector.broadcast %cst_39 : f32 to vector<2x16xf32>
    %184 = arith.addf %183, %182 : vector<2x16xf32>
    %185 = arith.divf %183, %184 : vector<2x16xf32>
    %186 = arith.mulf %177, %130 : vector<2x16xf32>
    %187 = arith.mulf %171, %179 : vector<2x16xf32>
    %188 = arith.addf %186, %187 : vector<2x16xf32>
    %189 = math.tanh %188 : vector<2x16xf32>
    %190 = arith.mulf %185, %189 : vector<2x16xf32>
    %191 = vector.extract_strided_slice %7 {offsets = [0, 3, 0], sizes = [2, 1, 64], strides = [1, 1, 1]} : vector<2x8x64xf32> to vector<2x1x64xf32>
    %192 = vector.shape_cast %191 : vector<2x1x64xf32> to vector<2x64xf32>
    %cst_40 = arith.constant dense<0.000000e+00> : vector<2x64xf32>
    %193 = tpu.matmul %161, %14, %cst_40 {dimension_numbers = #tpu.dot_dimension_numbers<[1], [0], [0], [1], [0, 0, 1, 1], [], []>} : vector<2x16xf32>, vector<16x64xf32>, vector<2x64xf32> -> vector<2x64xf32>
    %194 = arith.addf %192, %193 : vector<2x64xf32>
    %195 = vector.extract_strided_slice %194 {offsets = [0, 0], sizes = [2, 16], strides = [1, 1]} : vector<2x64xf32> to vector<2x16xf32>
    %196 = arith.negf %195 : vector<2x16xf32>
    %197 = math.exp %196 : vector<2x16xf32>
    %cst_41 = arith.constant 1.000000e+00 : f32
    %198 = vector.broadcast %cst_41 : f32 to vector<2x16xf32>
    %199 = arith.addf %198, %197 : vector<2x16xf32>
    %200 = arith.divf %198, %199 : vector<2x16xf32>
    %201 = vector.extract_strided_slice %194 {offsets = [0, 16], sizes = [2, 16], strides = [1, 1]} : vector<2x64xf32> to vector<2x16xf32>
    %202 = arith.negf %201 : vector<2x16xf32>
    %203 = math.exp %202 : vector<2x16xf32>
    %cst_42 = arith.constant 1.000000e+00 : f32
    %204 = vector.broadcast %cst_42 : f32 to vector<2x16xf32>
    %205 = arith.addf %204, %203 : vector<2x16xf32>
    %206 = arith.divf %204, %205 : vector<2x16xf32>
    %207 = vector.extract_strided_slice %194 {offsets = [0, 32], sizes = [2, 16], strides = [1, 1]} : vector<2x64xf32> to vector<2x16xf32>
    %208 = math.tanh %207 : vector<2x16xf32>
    %209 = vector.extract_strided_slice %194 {offsets = [0, 48], sizes = [2, 16], strides = [1, 1]} : vector<2x64xf32> to vector<2x16xf32>
    %210 = arith.negf %209 : vector<2x16xf32>
    %211 = math.exp %210 : vector<2x16xf32>
    %cst_43 = arith.constant 1.000000e+00 : f32
    %212 = vector.broadcast %cst_43 : f32 to vector<2x16xf32>
    %213 = arith.addf %212, %211 : vector<2x16xf32>
    %214 = arith.divf %212, %213 : vector<2x16xf32>
    %215 = arith.mulf %206, %159 : vector<2x16xf32>
    %216 = arith.mulf %200, %208 : vector<2x16xf32>
    %217 = arith.addf %215, %216 : vector<2x16xf32>
    %218 = math.tanh %217 : vector<2x16xf32>
    %219 = arith.mulf %214, %218 : vector<2x16xf32>
    %220 = vector.extract_strided_slice %13 {offsets = [0, 4, 0], sizes = [2, 1, 64], strides = [1, 1, 1]} : vector<2x8x64xf32> to vector<2x1x64xf32>
    %221 = vector.shape_cast %220 : vector<2x1x64xf32> to vector<2x64xf32>
    %cst_44 = arith.constant dense<0.000000e+00> : vector<2x64xf32>
    %222 = tpu.matmul %190, %15, %cst_44 {dimension_numbers = #tpu.dot_dimension_numbers<[1], [0], [0], [1], [0, 0, 1, 1], [], []>} : vector<2x16xf32>, vector<16x64xf32>, vector<2x64xf32> -> vector<2x64xf32>
    %223 = arith.addf %221, %222 : vector<2x64xf32>
    %224 = vector.extract_strided_slice %223 {offsets = [0, 0], sizes = [2, 16], strides = [1, 1]} : vector<2x64xf32> to vector<2x16xf32>
    %225 = arith.negf %224 : vector<2x16xf32>
    %226 = math.exp %225 : vector<2x16xf32>
    %cst_45 = arith.constant 1.000000e+00 : f32
    %227 = vector.broadcast %cst_45 : f32 to vector<2x16xf32>
    %228 = arith.addf %227, %226 : vector<2x16xf32>
    %229 = arith.divf %227, %228 : vector<2x16xf32>
    %230 = vector.extract_strided_slice %223 {offsets = [0, 16], sizes = [2, 16], strides = [1, 1]} : vector<2x64xf32> to vector<2x16xf32>
    %231 = arith.negf %230 : vector<2x16xf32>
    %232 = math.exp %231 : vector<2x16xf32>
    %cst_46 = arith.constant 1.000000e+00 : f32
    %233 = vector.broadcast %cst_46 : f32 to vector<2x16xf32>
    %234 = arith.addf %233, %232 : vector<2x16xf32>
    %235 = arith.divf %233, %234 : vector<2x16xf32>
    %236 = vector.extract_strided_slice %223 {offsets = [0, 32], sizes = [2, 16], strides = [1, 1]} : vector<2x64xf32> to vector<2x16xf32>
    %237 = math.tanh %236 : vector<2x16xf32>
    %238 = vector.extract_strided_slice %223 {offsets = [0, 48], sizes = [2, 16], strides = [1, 1]} : vector<2x64xf32> to vector<2x16xf32>
    %239 = arith.negf %238 : vector<2x16xf32>
    %240 = math.exp %239 : vector<2x16xf32>
    %cst_47 = arith.constant 1.000000e+00 : f32
    %241 = vector.broadcast %cst_47 : f32 to vector<2x16xf32>
    %242 = arith.addf %241, %240 : vector<2x16xf32>
    %243 = arith.divf %241, %242 : vector<2x16xf32>
    %244 = arith.mulf %235, %188 : vector<2x16xf32>
    %245 = arith.mulf %229, %237 : vector<2x16xf32>
    %246 = arith.addf %244, %245 : vector<2x16xf32>
    %247 = math.tanh %246 : vector<2x16xf32>
    %248 = arith.mulf %243, %247 : vector<2x16xf32>
    %249 = vector.extract_strided_slice %7 {offsets = [0, 4, 0], sizes = [2, 1, 64], strides = [1, 1, 1]} : vector<2x8x64xf32> to vector<2x1x64xf32>
    %250 = vector.shape_cast %249 : vector<2x1x64xf32> to vector<2x64xf32>
    %cst_48 = arith.constant dense<0.000000e+00> : vector<2x64xf32>
    %251 = tpu.matmul %219, %14, %cst_48 {dimension_numbers = #tpu.dot_dimension_numbers<[1], [0], [0], [1], [0, 0, 1, 1], [], []>} : vector<2x16xf32>, vector<16x64xf32>, vector<2x64xf32> -> vector<2x64xf32>
    %252 = arith.addf %250, %251 : vector<2x64xf32>
    %253 = vector.extract_strided_slice %252 {offsets = [0, 0], sizes = [2, 16], strides = [1, 1]} : vector<2x64xf32> to vector<2x16xf32>
    %254 = arith.negf %253 : vector<2x16xf32>
    %255 = math.exp %254 : vector<2x16xf32>
    %cst_49 = arith.constant 1.000000e+00 : f32
    %256 = vector.broadcast %cst_49 : f32 to vector<2x16xf32>
    %257 = arith.addf %256, %255 : vector<2x16xf32>
    %258 = arith.divf %256, %257 : vector<2x16xf32>
    %259 = vector.extract_strided_slice %252 {offsets = [0, 16], sizes = [2, 16], strides = [1, 1]} : vector<2x64xf32> to vector<2x16xf32>
    %260 = arith.negf %259 : vector<2x16xf32>
    %261 = math.exp %260 : vector<2x16xf32>
    %cst_50 = arith.constant 1.000000e+00 : f32
    %262 = vector.broadcast %cst_50 : f32 to vector<2x16xf32>
    %263 = arith.addf %262, %261 : vector<2x16xf32>
    %264 = arith.divf %262, %263 : vector<2x16xf32>
    %265 = vector.extract_strided_slice %252 {offsets = [0, 32], sizes = [2, 16], strides = [1, 1]} : vector<2x64xf32> to vector<2x16xf32>
    %266 = math.tanh %265 : vector<2x16xf32>
    %267 = vector.extract_strided_slice %252 {offsets = [0, 48], sizes = [2, 16], strides = [1, 1]} : vector<2x64xf32> to vector<2x16xf32>
    %268 = arith.negf %267 : vector<2x16xf32>
    %269 = math.exp %268 : vector<2x16xf32>
    %cst_51 = arith.constant 1.000000e+00 : f32
    %270 = vector.broadcast %cst_51 : f32 to vector<2x16xf32>
    %271 = arith.addf %270, %269 : vector<2x16xf32>
    %272 = arith.divf %270, %271 : vector<2x16xf32>
    %273 = arith.mulf %264, %217 : vector<2x16xf32>
    %274 = arith.mulf %258, %266 : vector<2x16xf32>
    %275 = arith.addf %273, %274 : vector<2x16xf32>
    %276 = math.tanh %275 : vector<2x16xf32>
    %277 = arith.mulf %272, %276 : vector<2x16xf32>
    %278 = vector.extract_strided_slice %13 {offsets = [0, 3, 0], sizes = [2, 1, 64], strides = [1, 1, 1]} : vector<2x8x64xf32> to vector<2x1x64xf32>
    %279 = vector.shape_cast %278 : vector<2x1x64xf32> to vector<2x64xf32>
    %cst_52 = arith.constant dense<0.000000e+00> : vector<2x64xf32>
    %280 = tpu.matmul %248, %15, %cst_52 {dimension_numbers = #tpu.dot_dimension_numbers<[1], [0], [0], [1], [0, 0, 1, 1], [], []>} : vector<2x16xf32>, vector<16x64xf32>, vector<2x64xf32> -> vector<2x64xf32>
    %281 = arith.addf %279, %280 : vector<2x64xf32>
    %282 = vector.extract_strided_slice %281 {offsets = [0, 0], sizes = [2, 16], strides = [1, 1]} : vector<2x64xf32> to vector<2x16xf32>
    %283 = arith.negf %282 : vector<2x16xf32>
    %284 = math.exp %283 : vector<2x16xf32>
    %cst_53 = arith.constant 1.000000e+00 : f32
    %285 = vector.broadcast %cst_53 : f32 to vector<2x16xf32>
    %286 = arith.addf %285, %284 : vector<2x16xf32>
    %287 = arith.divf %285, %286 : vector<2x16xf32>
    %288 = vector.extract_strided_slice %281 {offsets = [0, 16], sizes = [2, 16], strides = [1, 1]} : vector<2x64xf32> to vector<2x16xf32>
    %289 = arith.negf %288 : vector<2x16xf32>
    %290 = math.exp %289 : vector<2x16xf32>
    %cst_54 = arith.constant 1.000000e+00 : f32
    %291 = vector.broadcast %cst_54 : f32 to vector<2x16xf32>
    %292 = arith.addf %291, %290 : vector<2x16xf32>
    %293 = arith.divf %291, %292 : vector<2x16xf32>
    %294 = vector.extract_strided_slice %281 {offsets = [0, 32], sizes = [2, 16], strides = [1, 1]} : vector<2x64xf32> to vector<2x16xf32>
    %295 = math.tanh %294 : vector<2x16xf32>
    %296 = vector.extract_strided_slice %281 {offsets = [0, 48], sizes = [2, 16], strides = [1, 1]} : vector<2x64xf32> to vector<2x16xf32>
    %297 = arith.negf %296 : vector<2x16xf32>
    %298 = math.exp %297 : vector<2x16xf32>
    %cst_55 = arith.constant 1.000000e+00 : f32
    %299 = vector.broadcast %cst_55 : f32 to vector<2x16xf32>
    %300 = arith.addf %299, %298 : vector<2x16xf32>
    %301 = arith.divf %299, %300 : vector<2x16xf32>
    %302 = arith.mulf %293, %246 : vector<2x16xf32>
    %303 = arith.mulf %287, %295 : vector<2x16xf32>
    %304 = arith.addf %302, %303 : vector<2x16xf32>
    %305 = math.tanh %304 : vector<2x16xf32>
    %306 = arith.mulf %301, %305 : vector<2x16xf32>
    %307 = vector.extract_strided_slice %7 {offsets = [0, 5, 0], sizes = [2, 1, 64], strides = [1, 1, 1]} : vector<2x8x64xf32> to vector<2x1x64xf32>
    %308 = vector.shape_cast %307 : vector<2x1x64xf32> to vector<2x64xf32>
    %cst_56 = arith.constant dense<0.000000e+00> : vector<2x64xf32>
    %309 = tpu.matmul %277, %14, %cst_56 {dimension_numbers = #tpu.dot_dimension_numbers<[1], [0], [0], [1], [0, 0, 1, 1], [], []>} : vector<2x16xf32>, vector<16x64xf32>, vector<2x64xf32> -> vector<2x64xf32>
    %310 = arith.addf %308, %309 : vector<2x64xf32>
    %311 = vector.extract_strided_slice %310 {offsets = [0, 0], sizes = [2, 16], strides = [1, 1]} : vector<2x64xf32> to vector<2x16xf32>
    %312 = arith.negf %311 : vector<2x16xf32>
    %313 = math.exp %312 : vector<2x16xf32>
    %cst_57 = arith.constant 1.000000e+00 : f32
    %314 = vector.broadcast %cst_57 : f32 to vector<2x16xf32>
    %315 = arith.addf %314, %313 : vector<2x16xf32>
    %316 = arith.divf %314, %315 : vector<2x16xf32>
    %317 = vector.extract_strided_slice %310 {offsets = [0, 16], sizes = [2, 16], strides = [1, 1]} : vector<2x64xf32> to vector<2x16xf32>
    %318 = arith.negf %317 : vector<2x16xf32>
    %319 = math.exp %318 : vector<2x16xf32>
    %cst_58 = arith.constant 1.000000e+00 : f32
    %320 = vector.broadcast %cst_58 : f32 to vector<2x16xf32>
    %321 = arith.addf %320, %319 : vector<2x16xf32>
    %322 = arith.divf %320, %321 : vector<2x16xf32>
    %323 = vector.extract_strided_slice %310 {offsets = [0, 32], sizes = [2, 16], strides = [1, 1]} : vector<2x64xf32> to vector<2x16xf32>
    %324 = math.tanh %323 : vector<2x16xf32>
    %325 = vector.extract_strided_slice %310 {offsets = [0, 48], sizes = [2, 16], strides = [1, 1]} : vector<2x64xf32> to vector<2x16xf32>
    %326 = arith.negf %325 : vector<2x16xf32>
    %327 = math.exp %326 : vector<2x16xf32>
    %cst_59 = arith.constant 1.000000e+00 : f32
    %328 = vector.broadcast %cst_59 : f32 to vector<2x16xf32>
    %329 = arith.addf %328, %327 : vector<2x16xf32>
    %330 = arith.divf %328, %329 : vector<2x16xf32>
    %331 = arith.mulf %322, %275 : vector<2x16xf32>
    %332 = arith.mulf %316, %324 : vector<2x16xf32>
    %333 = arith.addf %331, %332 : vector<2x16xf32>
    %334 = math.tanh %333 : vector<2x16xf32>
    %335 = arith.mulf %330, %334 : vector<2x16xf32>
    %336 = vector.extract_strided_slice %13 {offsets = [0, 2, 0], sizes = [2, 1, 64], strides = [1, 1, 1]} : vector<2x8x64xf32> to vector<2x1x64xf32>
    %337 = vector.shape_cast %336 : vector<2x1x64xf32> to vector<2x64xf32>
    %cst_60 = arith.constant dense<0.000000e+00> : vector<2x64xf32>
    %338 = tpu.matmul %306, %15, %cst_60 {dimension_numbers = #tpu.dot_dimension_numbers<[1], [0], [0], [1], [0, 0, 1, 1], [], []>} : vector<2x16xf32>, vector<16x64xf32>, vector<2x64xf32> -> vector<2x64xf32>
    %339 = arith.addf %337, %338 : vector<2x64xf32>
    %340 = vector.extract_strided_slice %339 {offsets = [0, 0], sizes = [2, 16], strides = [1, 1]} : vector<2x64xf32> to vector<2x16xf32>
    %341 = arith.negf %340 : vector<2x16xf32>
    %342 = math.exp %341 : vector<2x16xf32>
    %cst_61 = arith.constant 1.000000e+00 : f32
    %343 = vector.broadcast %cst_61 : f32 to vector<2x16xf32>
    %344 = arith.addf %343, %342 : vector<2x16xf32>
    %345 = arith.divf %343, %344 : vector<2x16xf32>
    %346 = vector.extract_strided_slice %339 {offsets = [0, 16], sizes = [2, 16], strides = [1, 1]} : vector<2x64xf32> to vector<2x16xf32>
    %347 = arith.negf %346 : vector<2x16xf32>
    %348 = math.exp %347 : vector<2x16xf32>
    %cst_62 = arith.constant 1.000000e+00 : f32
    %349 = vector.broadcast %cst_62 : f32 to vector<2x16xf32>
    %350 = arith.addf %349, %348 : vector<2x16xf32>
    %351 = arith.divf %349, %350 : vector<2x16xf32>
    %352 = vector.extract_strided_slice %339 {offsets = [0, 32], sizes = [2, 16], strides = [1, 1]} : vector<2x64xf32> to vector<2x16xf32>
    %353 = math.tanh %352 : vector<2x16xf32>
    %354 = vector.extract_strided_slice %339 {offsets = [0, 48], sizes = [2, 16], strides = [1, 1]} : vector<2x64xf32> to vector<2x16xf32>
    %355 = arith.negf %354 : vector<2x16xf32>
    %356 = math.exp %355 : vector<2x16xf32>
    %cst_63 = arith.constant 1.000000e+00 : f32
    %357 = vector.broadcast %cst_63 : f32 to vector<2x16xf32>
    %358 = arith.addf %357, %356 : vector<2x16xf32>
    %359 = arith.divf %357, %358 : vector<2x16xf32>
    %360 = arith.mulf %351, %304 : vector<2x16xf32>
    %361 = arith.mulf %345, %353 : vector<2x16xf32>
    %362 = arith.addf %360, %361 : vector<2x16xf32>
    %363 = math.tanh %362 : vector<2x16xf32>
    %364 = arith.mulf %359, %363 : vector<2x16xf32>
    %365 = vector.extract_strided_slice %7 {offsets = [0, 6, 0], sizes = [2, 1, 64], strides = [1, 1, 1]} : vector<2x8x64xf32> to vector<2x1x64xf32>
    %366 = vector.shape_cast %365 : vector<2x1x64xf32> to vector<2x64xf32>
    %cst_64 = arith.constant dense<0.000000e+00> : vector<2x64xf32>
    %367 = tpu.matmul %335, %14, %cst_64 {dimension_numbers = #tpu.dot_dimension_numbers<[1], [0], [0], [1], [0, 0, 1, 1], [], []>} : vector<2x16xf32>, vector<16x64xf32>, vector<2x64xf32> -> vector<2x64xf32>
    %368 = arith.addf %366, %367 : vector<2x64xf32>
    %369 = vector.extract_strided_slice %368 {offsets = [0, 0], sizes = [2, 16], strides = [1, 1]} : vector<2x64xf32> to vector<2x16xf32>
    %370 = arith.negf %369 : vector<2x16xf32>
    %371 = math.exp %370 : vector<2x16xf32>
    %cst_65 = arith.constant 1.000000e+00 : f32
    %372 = vector.broadcast %cst_65 : f32 to vector<2x16xf32>
    %373 = arith.addf %372, %371 : vector<2x16xf32>
    %374 = arith.divf %372, %373 : vector<2x16xf32>
    %375 = vector.extract_strided_slice %368 {offsets = [0, 16], sizes = [2, 16], strides = [1, 1]} : vector<2x64xf32> to vector<2x16xf32>
    %376 = arith.negf %375 : vector<2x16xf32>
    %377 = math.exp %376 : vector<2x16xf32>
    %cst_66 = arith.constant 1.000000e+00 : f32
    %378 = vector.broadcast %cst_66 : f32 to vector<2x16xf32>
    %379 = arith.addf %378, %377 : vector<2x16xf32>
    %380 = arith.divf %378, %379 : vector<2x16xf32>
    %381 = vector.extract_strided_slice %368 {offsets = [0, 32], sizes = [2, 16], strides = [1, 1]} : vector<2x64xf32> to vector<2x16xf32>
    %382 = math.tanh %381 : vector<2x16xf32>
    %383 = vector.extract_strided_slice %368 {offsets = [0, 48], sizes = [2, 16], strides = [1, 1]} : vector<2x64xf32> to vector<2x16xf32>
    %384 = arith.negf %383 : vector<2x16xf32>
    %385 = math.exp %384 : vector<2x16xf32>
    %cst_67 = arith.constant 1.000000e+00 : f32
    %386 = vector.broadcast %cst_67 : f32 to vector<2x16xf32>
    %387 = arith.addf %386, %385 : vector<2x16xf32>
    %388 = arith.divf %386, %387 : vector<2x16xf32>
    %389 = arith.mulf %380, %333 : vector<2x16xf32>
    %390 = arith.mulf %374, %382 : vector<2x16xf32>
    %391 = arith.addf %389, %390 : vector<2x16xf32>
    %392 = math.tanh %391 : vector<2x16xf32>
    %393 = arith.mulf %388, %392 : vector<2x16xf32>
    %394 = vector.extract_strided_slice %13 {offsets = [0, 1, 0], sizes = [2, 1, 64], strides = [1, 1, 1]} : vector<2x8x64xf32> to vector<2x1x64xf32>
    %395 = vector.shape_cast %394 : vector<2x1x64xf32> to vector<2x64xf32>
    %cst_68 = arith.constant dense<0.000000e+00> : vector<2x64xf32>
    %396 = tpu.matmul %364, %15, %cst_68 {dimension_numbers = #tpu.dot_dimension_numbers<[1], [0], [0], [1], [0, 0, 1, 1], [], []>} : vector<2x16xf32>, vector<16x64xf32>, vector<2x64xf32> -> vector<2x64xf32>
    %397 = arith.addf %395, %396 : vector<2x64xf32>
    %398 = vector.extract_strided_slice %397 {offsets = [0, 0], sizes = [2, 16], strides = [1, 1]} : vector<2x64xf32> to vector<2x16xf32>
    %399 = arith.negf %398 : vector<2x16xf32>
    %400 = math.exp %399 : vector<2x16xf32>
    %cst_69 = arith.constant 1.000000e+00 : f32
    %401 = vector.broadcast %cst_69 : f32 to vector<2x16xf32>
    %402 = arith.addf %401, %400 : vector<2x16xf32>
    %403 = arith.divf %401, %402 : vector<2x16xf32>
    %404 = vector.extract_strided_slice %397 {offsets = [0, 16], sizes = [2, 16], strides = [1, 1]} : vector<2x64xf32> to vector<2x16xf32>
    %405 = arith.negf %404 : vector<2x16xf32>
    %406 = math.exp %405 : vector<2x16xf32>
    %cst_70 = arith.constant 1.000000e+00 : f32
    %407 = vector.broadcast %cst_70 : f32 to vector<2x16xf32>
    %408 = arith.addf %407, %406 : vector<2x16xf32>
    %409 = arith.divf %407, %408 : vector<2x16xf32>
    %410 = vector.extract_strided_slice %397 {offsets = [0, 32], sizes = [2, 16], strides = [1, 1]} : vector<2x64xf32> to vector<2x16xf32>
    %411 = math.tanh %410 : vector<2x16xf32>
    %412 = vector.extract_strided_slice %397 {offsets = [0, 48], sizes = [2, 16], strides = [1, 1]} : vector<2x64xf32> to vector<2x16xf32>
    %413 = arith.negf %412 : vector<2x16xf32>
    %414 = math.exp %413 : vector<2x16xf32>
    %cst_71 = arith.constant 1.000000e+00 : f32
    %415 = vector.broadcast %cst_71 : f32 to vector<2x16xf32>
    %416 = arith.addf %415, %414 : vector<2x16xf32>
    %417 = arith.divf %415, %416 : vector<2x16xf32>
    %418 = arith.mulf %409, %362 : vector<2x16xf32>
    %419 = arith.mulf %403, %411 : vector<2x16xf32>
    %420 = arith.addf %418, %419 : vector<2x16xf32>
    %421 = math.tanh %420 : vector<2x16xf32>
    %422 = arith.mulf %417, %421 : vector<2x16xf32>
    %423 = vector.extract_strided_slice %7 {offsets = [0, 7, 0], sizes = [2, 1, 64], strides = [1, 1, 1]} : vector<2x8x64xf32> to vector<2x1x64xf32>
    %424 = vector.shape_cast %423 : vector<2x1x64xf32> to vector<2x64xf32>
    %cst_72 = arith.constant dense<0.000000e+00> : vector<2x64xf32>
    %425 = tpu.matmul %393, %14, %cst_72 {dimension_numbers = #tpu.dot_dimension_numbers<[1], [0], [0], [1], [0, 0, 1, 1], [], []>} : vector<2x16xf32>, vector<16x64xf32>, vector<2x64xf32> -> vector<2x64xf32>
    %426 = arith.addf %424, %425 : vector<2x64xf32>
    %427 = vector.extract_strided_slice %426 {offsets = [0, 0], sizes = [2, 16], strides = [1, 1]} : vector<2x64xf32> to vector<2x16xf32>
    %428 = arith.negf %427 : vector<2x16xf32>
    %429 = math.exp %428 : vector<2x16xf32>
    %cst_73 = arith.constant 1.000000e+00 : f32
    %430 = vector.broadcast %cst_73 : f32 to vector<2x16xf32>
    %431 = arith.addf %430, %429 : vector<2x16xf32>
    %432 = arith.divf %430, %431 : vector<2x16xf32>
    %433 = vector.extract_strided_slice %426 {offsets = [0, 16], sizes = [2, 16], strides = [1, 1]} : vector<2x64xf32> to vector<2x16xf32>
    %434 = arith.negf %433 : vector<2x16xf32>
    %435 = math.exp %434 : vector<2x16xf32>
    %cst_74 = arith.constant 1.000000e+00 : f32
    %436 = vector.broadcast %cst_74 : f32 to vector<2x16xf32>
    %437 = arith.addf %436, %435 : vector<2x16xf32>
    %438 = arith.divf %436, %437 : vector<2x16xf32>
    %439 = vector.extract_strided_slice %426 {offsets = [0, 32], sizes = [2, 16], strides = [1, 1]} : vector<2x64xf32> to vector<2x16xf32>
    %440 = math.tanh %439 : vector<2x16xf32>
    %441 = vector.extract_strided_slice %426 {offsets = [0, 48], sizes = [2, 16], strides = [1, 1]} : vector<2x64xf32> to vector<2x16xf32>
    %442 = arith.negf %441 : vector<2x16xf32>
    %443 = math.exp %442 : vector<2x16xf32>
    %cst_75 = arith.constant 1.000000e+00 : f32
    %444 = vector.broadcast %cst_75 : f32 to vector<2x16xf32>
    %445 = arith.addf %444, %443 : vector<2x16xf32>
    %446 = arith.divf %444, %445 : vector<2x16xf32>
    %447 = arith.mulf %438, %391 : vector<2x16xf32>
    %448 = arith.mulf %432, %440 : vector<2x16xf32>
    %449 = arith.addf %447, %448 : vector<2x16xf32>
    %450 = math.tanh %449 : vector<2x16xf32>
    %451 = arith.mulf %446, %450 : vector<2x16xf32>
    %452 = vector.extract_strided_slice %13 {offsets = [0, 0, 0], sizes = [2, 1, 64], strides = [1, 1, 1]} : vector<2x8x64xf32> to vector<2x1x64xf32>
    %453 = vector.shape_cast %452 : vector<2x1x64xf32> to vector<2x64xf32>
    %cst_76 = arith.constant dense<0.000000e+00> : vector<2x64xf32>
    %454 = tpu.matmul %422, %15, %cst_76 {dimension_numbers = #tpu.dot_dimension_numbers<[1], [0], [0], [1], [0, 0, 1, 1], [], []>} : vector<2x16xf32>, vector<16x64xf32>, vector<2x64xf32> -> vector<2x64xf32>
    %455 = arith.addf %453, %454 : vector<2x64xf32>
    %456 = vector.extract_strided_slice %455 {offsets = [0, 0], sizes = [2, 16], strides = [1, 1]} : vector<2x64xf32> to vector<2x16xf32>
    %457 = arith.negf %456 : vector<2x16xf32>
    %458 = math.exp %457 : vector<2x16xf32>
    %cst_77 = arith.constant 1.000000e+00 : f32
    %459 = vector.broadcast %cst_77 : f32 to vector<2x16xf32>
    %460 = arith.addf %459, %458 : vector<2x16xf32>
    %461 = arith.divf %459, %460 : vector<2x16xf32>
    %462 = vector.extract_strided_slice %455 {offsets = [0, 16], sizes = [2, 16], strides = [1, 1]} : vector<2x64xf32> to vector<2x16xf32>
    %463 = arith.negf %462 : vector<2x16xf32>
    %464 = math.exp %463 : vector<2x16xf32>
    %cst_78 = arith.constant 1.000000e+00 : f32
    %465 = vector.broadcast %cst_78 : f32 to vector<2x16xf32>
    %466 = arith.addf %465, %464 : vector<2x16xf32>
    %467 = arith.divf %465, %466 : vector<2x16xf32>
    %468 = vector.extract_strided_slice %455 {offsets = [0, 32], sizes = [2, 16], strides = [1, 1]} : vector<2x64xf32> to vector<2x16xf32>
    %469 = math.tanh %468 : vector<2x16xf32>
    %470 = vector.extract_strided_slice %455 {offsets = [0, 48], sizes = [2, 16], strides = [1, 1]} : vector<2x64xf32> to vector<2x16xf32>
    %471 = arith.negf %470 : vector<2x16xf32>
    %472 = math.exp %471 : vector<2x16xf32>
    %cst_79 = arith.constant 1.000000e+00 : f32
    %473 = vector.broadcast %cst_79 : f32 to vector<2x16xf32>
    %474 = arith.addf %473, %472 : vector<2x16xf32>
    %475 = arith.divf %473, %474 : vector<2x16xf32>
    %476 = arith.mulf %467, %420 : vector<2x16xf32>
    %477 = arith.mulf %461, %469 : vector<2x16xf32>
    %478 = arith.addf %476, %477 : vector<2x16xf32>
    %479 = math.tanh %478 : vector<2x16xf32>
    %480 = arith.mulf %475, %479 : vector<2x16xf32>
    %481 = arith.addf %45, %451 : vector<2x16xf32>
    %482 = arith.addf %480, %74 : vector<2x16xf32>
    %c0_80 = arith.constant 0 : index
    %c0_81 = arith.constant 0 : index
    %483 = vector.load %arg7[%c0_80, %c0_81] : memref<32x64xf32, #tpu.memory_space<vmem>>, vector<32x64xf32>
    %484 = vector.extract_strided_slice %483 {offsets = [0, 0], sizes = [16, 64], strides = [1, 1]} : vector<32x64xf32> to vector<16x64xf32>
    %cst_82 = arith.constant dense<0.000000e+00> : vector<2x64xf32>
    %485 = tpu.matmul %481, %484, %cst_82 {dimension_numbers = #tpu.dot_dimension_numbers<[1], [0], [0], [1], [0, 0, 1, 1], [], []>} : vector<2x16xf32>, vector<16x64xf32>, vector<2x64xf32> -> vector<2x64xf32>
    %486 = vector.extract_strided_slice %483 {offsets = [16, 0], sizes = [16, 64], strides = [1, 1]} : vector<32x64xf32> to vector<16x64xf32>
    %cst_83 = arith.constant dense<0.000000e+00> : vector<2x64xf32>
    %487 = tpu.matmul %482, %486, %cst_83 {dimension_numbers = #tpu.dot_dimension_numbers<[1], [0], [0], [1], [0, 0, 1, 1], [], []>} : vector<2x16xf32>, vector<16x64xf32>, vector<2x64xf32> -> vector<2x64xf32>
    %488 = arith.addf %485, %487 : vector<2x64xf32>
    %c0_84 = arith.constant 0 : index
    %c0_85 = arith.constant 0 : index
    %489 = vector.load %arg8[%c0_84, %c0_85] : memref<1x64xf32, #tpu.memory_space<vmem>>, vector<1x64xf32>
    %490 = vector.broadcast %489 : vector<1x64xf32> to vector<2x64xf32>
    %491 = arith.addf %488, %490 : vector<2x64xf32>
    %c0_86 = arith.constant 0 : index
    %c0_87 = arith.constant 0 : index
    %492 = vector.load %arg9[%c0_86, %c0_87] : memref<2x64xf32, #tpu.memory_space<vmem>>, vector<2x64xf32>
    tpu.vector_store %arg9[%c0_86, %c0_87], %491 {strides = array<i32>} : memref<2x64xf32, #tpu.memory_space<vmem>>, vector<2x64xf32>,
    return
  }
}

</mosaic_0001>

<bundles_post_ra>
// kernel: sequence_embed_forward.3
= control target key start
LH: loop header
LB: loop body
LE: loop exit
PB: predicated region body
PF: predicated region fallthrough
CT: control target
= control target key end

     0   :  { %vm43_vm0 = vcmask 130048   ;;  %v3189_v13 = vmov 0.0|0.0   ;;  %vm3190_vm1 = vmmov 0   ;;  %v3191_v15 = vmov 0.0   ;;  %s3194_s28 = smov 32   ;;  %s3195_s29 = smov 80   ;;  %s3695_s1 = inlined_call_operand.vmem [shape: f32[16,64], index: 1, kind: input, shape index: {}]   ;;  %s3696_s4 = inlined_call_operand.vmem [shape: f32[16,64], index: 4, kind: input, shape index: {}]   ;;  %s3697_s0 = inlined_call_operand.vmem [shape: f32[2,8,16], index: 0, kind: input, shape index: {}]   ;;  %s3698_s2 = inlined_call_operand.vmem [shape: f32[16,64], index: 2, kind: input, shape index: {}]   ;;  %s3699_s5 = inlined_call_operand.vmem [shape: f32[16,64], index: 5, kind: input, shape index: {}]   ;;  %s3700_s3 = inlined_call_operand.vmem [shape: f32[1,64], index: 3, kind: input, shape index: {}]   ;;  %s3701_s6 = inlined_call_operand.vmem [shape: f32[1,64], index: 6, kind: input, shape index: {}]   ;;  %s3702_s7 = inlined_call_operand.vmem [shape: f32[32,64], index: 7, kind: input, shape index: {}]   ;;  %s3703_s8 = inlined_call_operand.vmem [shape: f32[1,64], index: 8, kind: input, shape index: {}]   ;;  %s3704_s9 = inlined_call_operand.vmem [shape: f32[2,64], index: 9, kind: output, shape index: {}]  }
   0x1   :  { %v34_v0 = vld [vmem:[%s3695_s1] sm:$0xff]  ;;  %v35_v1 = vld [vmem:[%s3695_s1 + $0x8] sm:$0xff]  ;;  %vm468_vm2 = vcmask 1041409   ;;  %vm2601_vm3 = vcmask 517120  }
   0x2   :  { %v125_v2 = vld [vmem:[%s3696_s4] sm:$0xff]  ;;  %v2864_v3 = vpack.c.bf16 %v35_v1, %v34_v0  ;;  %v126_v4 = vld [vmem:[%s3696_s4 + $0x8] sm:$0xff] }
   0x3   :  { %v32_v5 = vld [vmem:[%s3697_s0] sm:$0xff]  ;;  %v2868_v6 = vpack.c.bf16 %v126_v4, %v125_v2  ;;  %v210_v8 = vld [vmem:[%s3698_s2 + $0x8] sm:$0xff] }
   0x4   :  { %2728 = vmatprep.mubr.msk.f32.mxu0 %vm43_vm0, %v32_v5  ;;  %2735 = vmatprep.mubr.msk.f32.mxu1 %vm43_vm0, %v32_v5  ;;  %v209_v7 = vld [vmem:[%s3698_s2] sm:$0xff]  ;;  %v212_v10 = vld [vmem:[%s3699_s5 + $0x8] sm:$0xff] }
   0x5   :  { %v211_v9 = vld [vmem:[%s3699_s5] sm:$0xff]  ;;  %2865 = vmatprep.subr.bf16.mxu0 %v2864_v3  ;;  %2869 = vmatprep.subr.bf16.mxu1 %v2868_v6  ;;  %v33_v11 = vld [vmem:[%s3697_s0 + $0x8] sm:$0xff]  ;;  %v3278_v12 = vpack.c.bf16 %v210_v8, %v209_v7 }
   0x6   :  { %2867 = vmatpush3.bf16.msra.mxu0 %v2864_v3  ;;  %2871 = vmatpush3.bf16.msra.mxu1 %v2868_v6  ;;  %v3281_v14 = vpack.c.bf16 %v212_v10, %v211_v9  ;;  %v2607_v19 = vld [vmem:[%s3700_s3] ss:$0 sm:$0xff]  ;;  %s3192_s3 = smov 96  }
   0x7   :  { %2872 = vmatprep.subr.bf16.mxu0 %v3189_v13  ;;  %2875 = vmatprep.subr.bf16.mxu1 %v3189_v13  ;;  %v2610_v21 = vld [vmem:[%s3701_s6] ss:$0 sm:$0xff]  ;;  %s3193_s6 = smov 16  }
   0x9   :  { %2729 = vmatmul.mubr.msk.f32.vlgmr.msra.gmra.mrb[0].mxu0 %vm43_vm0, %v33_v11  ;;  %2736 = vmatmul.mubr.msk.f32.vlgmr.msra.gmra.mrb[0].mxu1 %vm43_vm0, %v33_v11 }
   0xa   :  { %2874 = vmatpush3.bf16.msra.mxu0 %v3278_v12  ;;  %2877 = vmatpush3.bf16.msra.mxu1 %v3281_v14 }
   0xb   :  { %2742 = vmatprep.mubr.msk.f32.mxu0 %vm3190_vm1, %v3191_v15  ;;  %2749 = vmatprep.mubr.msk.f32.mxu1 %vm3190_vm1, %v3191_v15 }
   0xc   :  { %2878 = vmatprep.subr.bf16.mxu0 %v3189_v13  ;;  %2881 = vmatprep.subr.bf16.mxu1 %v3189_v13 }
   0xd   :  { %2743 = vmatmul.mubr.f32.vlgmr.msra.gmra.mrb[2].mxu0 %v3191_v15  ;;  %2750 = vmatmul.mubr.f32.vlgmr.msra.gmra.mrb[2].mxu1 %v3191_v15 }
   0xe   :  { %2880 = vmatpush3.bf16.msra.mxu0 %v3278_v12  ;;  %2756 = vmatprep.mubr.msk.f32.mxu0 %vm3190_vm1, %v3191_v15 }
   0xf   :  { %2883 = vmatpush3.bf16.msra.mxu1 %v3281_v14  ;;  %2763 = vmatprep.mubr.msk.f32.mxu1 %vm3190_vm1, %v3191_v15 }
  0x10   :  { %2884 = vmatprep.subr.bf16.mxu0 %v3189_v13  ;;  %2887 = vmatprep.subr.bf16.mxu1 %v3189_v13 }
  0xdc   :  { %v2730_v16 = vpop.f32.mrb[0].mxu0  ;;  %v2737_v18 = vpop.f32.mrb[0].mxu1 }
  0xdd   :  { %v116_v17 = vpop.f32.mrb[1].mxu0  ;;  %v200_v20 = vpop.f32.mrb[1].mxu1  ;;  %v3310_v23 = vadd.f32 %v2730_v16, %v2607_v19  ;;  %v3318_v33 = vadd.f32 %v2737_v18, %v2610_v21 }
  0xde   :  { %v3312_v24 = vadd.f32 %v2607_v19, %v116_v17  ;;  %v3314_v28 = vadd.f32 %v2610_v21, %v200_v20 }
  0xe0   :  { %v282_v22 = vpop.f32.mrb[2].mxu0  ;;  %v406_v26 = vpop.f32.mrb[2].mxu1 }
  0xe1   :  { %v287_v25 = vrot.slane %v282_v22, 1  ;;  %v2744_v27 = vpop.f32.mrb[3].mxu0  ;;  %v411_v29 = vrot.slane %v406_v26, 1  ;;  %v2751_v30 = vpop.f32.mrb[3].mxu1  ;;  %v290_v32 = vadd.f32 %v282_v22, %v3312_v24  ;;  %v412_v34 = vrot.slane %v406_v26, 2 }
  0xe3   :  { %v291_v31 = vadd.f32 %v287_v25, %v3310_v23  ;;  %v415_v35 = vadd.f32 %v411_v29, %v3314_v28  ;;  %v416_v36 = vadd.f32 %v412_v34, %v3318_v33  ;;  %v2613_v42 = vmul.f32 -1.442695, %v290_v32 }
  0xe5   :  { %2933 = vtanh.f32 %v291_v31  ;;  %v2614_v41 = vmul.f32 -1.442695, %v291_v31  ;;  %v2615_v43 = vmul.f32 -1.442695, %v415_v35  ;;  %v2616_v44 = vmul.f32 -1.442695, %v416_v36 }
  0xe6   :  { %2935 = vtanh.f32 %v290_v32 }
  0xe7   :  { %2937 = vtanh.f32 %v415_v35 }
  0xe8   :  { %2939 = vtanh.f32 %v416_v36 }
  0xe9   :  { %2941 = vpow2.f32 %v2614_v41 }
  0xea   :  { %2943 = vpow2.f32 %v2613_v42 }
  0xeb   :  { %2945 = vpow2.f32 %v2615_v43 }
  0xec   :  { %2947 = vpow2.f32 %v2616_v44 }
  0xef   :  { %v2934_v37 = vpop.eup %2933 }
  0xf0   :  { %312 = vrot.lane.b32.xlu0 %v2934_v37, %s3192_s3  ;;  %v2936_v38 = vpop.eup %2935 }
  0xf1   :  { %v2938_v39 = vpop.eup %2937 }
  0xf2   :  { %435 = vrot.lane.b32.xlu1 %v2938_v39, %s3192_s3  ;;  %v2940_v40 = vpop.eup %2939 }
  0xf3   :  { %v2942_v45 = vpop.eup %2941 }
  0xf4   :  { %310 = vrot.lane.b32.xlu0 %v2936_v38, %s3192_s3  ;;  %v2944_v46 = vpop.eup %2943  ;;  %v299_v47 = vadd.f32 1.0, %v2942_v45 }
  0xf5   :  { %v2946_v48 = vpop.eup %2945  ;;  %v298_v49 = vadd.f32 1.0, %v2944_v46 }
  0xf6   :  { %437 = vrot.lane.b32.xlu1 %v2940_v40, %s3192_s3  ;;  %2949 = vrcp.f32 %v299_v47  ;;  %v423_v50 = vadd.f32 1.0, %v2946_v48  ;;  %v2948_v51 = vpop.eup %2947 }
  0xf7   :  { %2951 = vrcp.f32 %v298_v49  ;;  %v424_v52 = vadd.f32 1.0, %v2948_v51 }
  0xf8   :  { %2953 = vrcp.f32 %v423_v50 }
  0xf9   :  { %2955 = vrcp.f32 %v424_v52 }
 0x100   :  { %v2950_v53 = vpop.eup %2949 }
 0x101   :  { %v2952_v56 = vpop.eup %2951  ;;  %v307_v1 = vmul.f32 0.0, %v2950_v53 }
 0x102   :  { %v2954_v57 = vpop.eup %2953  ;;  %v306_v5 = vmul.f32 0.0, %v2952_v56 }
 0x103   :  { %v2956_v62 = vpop.eup %2955  ;;  %v431_v4 = vmul.f32 0.0, %v2954_v57 }
 0x104   :  { %v432_v10 = vmul.f32 0.0, %v2956_v62 }
 0x162   :  { %v313_v54 = vpop.permute.xlu0 %312 }
 0x163   :  { %v317_v55 = vmul.f32 %v2950_v53, %v313_v54 }
 0x164   :  { %v436_v58 = vpop.permute.xlu1 %435 }
 0x165   :  { %322 = vrot.lane.b32.xlu0 %v317_v55, %s3193_s6  ;;  %v441_v60 = vmul.f32 %v2954_v57, %v436_v58 }
 0x166   :  { %v311_v59 = vpop.permute.xlu0 %310 }
 0x167   :  { %v316_v61 = vmul.f32 %v2952_v56, %v311_v59 }
 0x168   :  { %v438_v63 = vpop.permute.xlu1 %437 }
 0x169   :  { %445 = vrot.lane.b32.xlu0 %v441_v60, %s3193_s6  ;;  %320 = vrot.lane.b32.xlu1 %v316_v61, %s3193_s6  ;;  %v442_v0 = vmul.f32 %v2956_v62, %v438_v63 }
 0x16d   :  { %447 = vrot.lane.b32.xlu1 %v442_v0, %s3193_s6 }
 0x1d7   :  { %v323_v2 = vpop.permute.xlu0 %322 }
 0x1d8   :  { %v3330_v3 = vadd.f32 %v323_v2, %v307_v1 }
 0x1da   :  { %2957 = vtanh.f32 %v3330_v3 }
 0x1db   :  { %v446_v6 = vpop.permute.xlu0 %445  ;;  %v321_v7 = vpop.permute.xlu1 %320 }
 0x1dc   :  { %v3333_v8 = vadd.f32 %v446_v6, %v431_v4  ;;  %v3335_v9 = vadd.f32 %v321_v7, %v306_v5 }
 0x1de   :  { %2959 = vtanh.f32 %v3333_v8 }
 0x1df   :  { %2961 = vtanh.f32 %v3335_v9  ;;  %v448_v11 = vpop.permute.xlu1 %447 }
 0x1e0   :  { %v3339_v16 = vadd.f32 %v448_v11, %v432_v10 }
 0x1e2   :  { %2963 = vtanh.f32 %v3339_v16 }
 0x1e4   :  { %v2958_v17 = vpop.eup %2957 }
 0x1e5   :  { %334 = vrot.lane.b32.xlu0 %v2958_v17, %s3194_s28 }
 0x1e8   :  { %v2960_v18 = vpop.eup %2959 }
 0x1e9   :  { %v2962_v19 = vpop.eup %2961  ;;  %457 = vrot.lane.b32.xlu0 %v2960_v18, %s3194_s28 }
 0x1ea   :  { %332 = vrot.lane.b32.xlu1 %v2962_v19, %s3194_s28 }
 0x1ec   :  { %v2964_v20 = vpop.eup %2963 }
 0x1ee   :  { %459 = vrot.lane.b32.xlu1 %v2964_v20, %s3194_s28 }
 0x257   :  { %v335_v21 = vpop.permute.xlu0 %334 }
 0x258   :  { %v3346_v22 = vmul.f32 %v2950_v53, %v335_v21 }
 0x25a   :  { %v467_v27 = vrot.slane %v3346_v22, 7 }
 0x25b   :  { %v458_v25 = vpop.permute.xlu0 %457 }
 0x25c   :  { %v333_v26 = vpop.permute.xlu1 %332  ;;  %v3351_v30 = vmul.f32 %v2954_v57, %v458_v25 }
 0x25d   :  { %v3349_v29 = vmul.f32 %v2952_v56, %v333_v26  ;;  %v567_v26 = vrot.slane %v3330_v3, 7 }
 0x25e   :  { %v606_v35 = vrot.slane %v3351_v30, 7 }
 0x25f   :  { %v469_v31 = vsel %vm468_vm2, %v467_v27, %v3349_v29 }
 0x260   :  { %470 = vrot.lane.b32.xlu0 %v469_v31, %s3195_s29  ;;  %v460_v32 = vpop.permute.xlu1 %459  ;;  %v566_v31 = vrot.slane %v3335_v9, 7 }
 0x261   :  { %v3356_v34 = vmul.f32 %v2956_v62, %v460_v32 }
 0x263   :  { %v607_v36 = vrot.slane %v3356_v34, 6 }
 0x265   :  { %v608_v37 = vsel %vm468_vm2, %v607_v36, %v606_v35 }
 0x266   :  { %609 = vrot.lane.b32.xlu1 %v608_v37, %s3195_s29 }
 0x2d2   :  { %v471_v38 = vpop.permute.xlu0 %470 }
 0x2d3   :  { %2757 = vmatmul.mubr.msk.f32.vlgmr.msra.gmra.mrb[4].mxu0 %vm43_vm0, %v471_v38 }
 0x2d4   :  { %2886 = vmatpush3.bf16.msra.mxu0 %v3278_v12  ;;  %2770 = vmatprep.mubr.msk.f32.mxu0 %vm3190_vm1, %v3191_v15 }
 0x2d5   :  { %2890 = vmatprep.subr.bf16.mxu0 %v3189_v13 }
 0x2d8   :  { %v610_v39 = vpop.permute.xlu1 %609 }
 0x2d9   :  { %2764 = vmatmul.mubr.msk.f32.vlgmr.msra.gmra.mrb[4].mxu1 %vm43_vm0, %v610_v39 }
 0x2da   :  { %2889 = vmatpush3.bf16.msra.mxu1 %v3281_v14  ;;  %2777 = vmatprep.mubr.msk.f32.mxu1 %vm3190_vm1, %v3191_v15 }
 0x2db   :  { %2893 = vmatprep.subr.bf16.mxu1 %v3189_v13 }
 0x3a6   :  { %v540_v40 = vpop.f32.mrb[4].mxu0 }
 0x3a7   :  { %v545_v41 = vrot.slane %v540_v40, 7  ;;  %v549_v42 = vadd.f32 %v540_v40, %v3310_v23  ;;  %v2758_v43 = vpop.f32.mrb[5].mxu0  ;;  %v706_v40 = vrot.slane %v3333_v8, 1 }
 0x3a9   :  { %v548_v44 = vadd.f32 %v545_v41, %v3312_v24  ;;  %2965 = vtanh.f32 %v549_v42  ;;  %v2619_v55 = vmul.f32 -1.442695, %v549_v42  ;;  %v707_v41 = vrot.slane %v3339_v16, 1 }
 0x3ab   :  { %2967 = vtanh.f32 %v548_v44  ;;  %v2618_v56 = vmul.f32 -1.442695, %v548_v44 }
 0x3ac   :  { %v679_v45 = vpop.f32.mrb[4].mxu1 }
 0x3ad   :  { %v684_v46 = vrot.slane %v679_v45, 2  ;;  %v685_v47 = vrot.slane %v679_v45, 3  ;;  %v2765_v48 = vpop.f32.mrb[5].mxu1 }
 0x3af   :  { %v688_v49 = vadd.f32 %v684_v46, %v3314_v28  ;;  %v689_v50 = vadd.f32 %v685_v47, %v3318_v33 }
 0x3b1   :  { %2969 = vtanh.f32 %v688_v49  ;;  %v2621_v57 = vmul.f32 -1.442695, %v688_v49  ;;  %v2622_v58 = vmul.f32 -1.442695, %v689_v50 }
 0x3b2   :  { %2971 = vtanh.f32 %v689_v50 }
 0x3b3   :  { %v2966_v51 = vpop.eup %2965  ;;  %2973 = vpow2.f32 %v2619_v55 }
 0x3b4   :  { %576 = vrot.lane.b32.xlu1 %v2966_v51, %s3192_s3  ;;  %2975 = vpow2.f32 %v2618_v56 }
 0x3b5   :  { %v2968_v52 = vpop.eup %2967  ;;  %2977 = vpow2.f32 %v2621_v57 }
 0x3b6   :  { %574 = vrot.lane.b32.xlu0 %v2968_v52, %s3192_s3  ;;  %2979 = vpow2.f32 %v2622_v58 }
 0x3bb   :  { %v2970_v53 = vpop.eup %2969 }
 0x3bc   :  { %v2972_v54 = vpop.eup %2971  ;;  %714 = vrot.lane.b32.xlu0 %v2970_v53, %s3192_s3 }
 0x3bd   :  { %716 = vrot.lane.b32.xlu1 %v2972_v54, %s3192_s3  ;;  %v2974_v59 = vpop.eup %2973 }
 0x3be   :  { %v2976_v60 = vpop.eup %2975  ;;  %v557_v61 = vadd.f32 1.0, %v2974_v59 }
 0x3bf   :  { %v556_v62 = vadd.f32 1.0, %v2976_v60  ;;  %v2978_v63 = vpop.eup %2977 }
 0x3c0   :  { %2981 = vrcp.f32 %v557_v61  ;;  %v2980_v0 = vpop.eup %2979  ;;  %v696_v1 = vadd.f32 1.0, %v2978_v63 }
 0x3c1   :  { %2983 = vrcp.f32 %v556_v62  ;;  %v697_v2 = vadd.f32 1.0, %v2980_v0 }
 0x3c2   :  { %2985 = vrcp.f32 %v696_v1 }
 0x3c3   :  { %2987 = vrcp.f32 %v697_v2 }
 0x3ca   :  { %v2982_v4 = vpop.eup %2981 }
 0x3cb   :  { %v2984_v7 = vpop.eup %2983  ;;  %v571_v27 = vmul.f32 %v2982_v4, %v567_v26 }
 0x3cc   :  { %v2986_v17 = vpop.eup %2985  ;;  %v570_v37 = vmul.f32 %v2984_v7, %v566_v31 }
 0x3cd   :  { %v2988_v19 = vpop.eup %2987  ;;  %v710_v42 = vmul.f32 %v2986_v17, %v706_v40 }
 0x3ce   :  { %v711_v43 = vmul.f32 %v2988_v19, %v707_v41 }
 0x426   :  { %v577_v5 = vpop.permute.xlu1 %576 }
 0x427   :  { %v581_v6 = vmul.f32 %v2982_v4, %v577_v5 }
 0x428   :  { %v575_v10 = vpop.permute.xlu0 %574 }
 0x429   :  { %586 = vrot.lane.b32.xlu1 %v581_v6, %s3193_s6  ;;  %v580_v11 = vmul.f32 %v2984_v7, %v575_v10 }
 0x42b   :  { %584 = vrot.lane.b32.xlu0 %v580_v11, %s3193_s6 }
 0x42e   :  { %v715_v18 = vpop.permute.xlu0 %714 }
 0x42f   :  { %v720_v20 = vmul.f32 %v2986_v17, %v715_v18  ;;  %v717_v21 = vpop.permute.xlu1 %716 }
 0x430   :  { %v721_v25 = vmul.f32 %v2988_v19, %v717_v21 }
 0x431   :  { %724 = vrot.lane.b32.xlu0 %v720_v20, %s3193_s6 }
 0x432   :  { %726 = vrot.lane.b32.xlu1 %v721_v25, %s3193_s6 }
 0x49b   :  { %v587_v32 = vpop.permute.xlu1 %586 }
 0x49c   :  { %v3388_v36 = vadd.f32 %v587_v32, %v571_v27 }
 0x49d   :  { %v585_v38 = vpop.permute.xlu0 %584 }
 0x49e   :  { %2989 = vtanh.f32 %v3388_v36  ;;  %v3391_v39 = vadd.f32 %v585_v38, %v570_v37 }
 0x4a0   :  { %2991 = vtanh.f32 %v3391_v39 }
 0x4a3   :  { %v725_v3 = vpop.permute.xlu0 %724 }
 0x4a4   :  { %v3396_v44 = vadd.f32 %v725_v3, %v710_v42  ;;  %v727_v9 = vpop.permute.xlu1 %726 }
 0x4a5   :  { %v3398_v45 = vadd.f32 %v727_v9, %v711_v43 }
 0x4a6   :  { %2993 = vtanh.f32 %v3396_v44 }
 0x4a7   :  { %2995 = vtanh.f32 %v3398_v45 }
 0x4a8   :  { %v2990_v46 = vpop.eup %2989 }
 0x4a9   :  { %598 = vrot.lane.b32.xlu1 %v2990_v46, %s3194_s28 }
 0x4aa   :  { %v2992_v8 = vpop.eup %2991 }
 0x4ab   :  { %596 = vrot.lane.b32.xlu0 %v2992_v8, %s3194_s28 }
 0x4b0   :  { %v2994_v16 = vpop.eup %2993 }
 0x4b1   :  { %v2996_v47 = vpop.eup %2995  ;;  %736 = vrot.lane.b32.xlu0 %v2994_v16, %s3194_s28 }
 0x4b2   :  { %738 = vrot.lane.b32.xlu1 %v2996_v47, %s3194_s28 }
 0x51b   :  { %v599_v48 = vpop.permute.xlu1 %598 }
 0x51c   :  { %v603_v51 = vmul.f32 %v2982_v4, %v599_v48 }
 0x51d   :  { %v597_v49 = vpop.permute.xlu0 %596 }
 0x51e   :  { %v602_v50 = vmul.f32 %v2984_v7, %v597_v49 }
 0x520   :  { %v746_v52 = vrot.slane %v602_v50, 1 }
 0x522   :  { %v747_v54 = vsel %vm468_vm2, %v603_v51, %v746_v52 }
 0x523   :  { %v737_v53 = vpop.permute.xlu0 %736  ;;  %748 = vrot.lane.b32.xlu0 %v747_v54, %s3195_s29 }
 0x524   :  { %v742_v55 = vmul.f32 %v2986_v17, %v737_v53  ;;  %v739_v56 = vpop.permute.xlu1 %738 }
 0x525   :  { %v743_v57 = vmul.f32 %v2988_v19, %v739_v56  ;;  %v845_v56 = vrot.slane %v3391_v39, 7 }
 0x526   :  { %v885_v58 = vrot.slane %v742_v55, 6 }
 0x527   :  { %v886_v59 = vrot.slane %v743_v57, 5  ;;  %v846_v57 = vrot.slane %v3388_v36, 7 }
 0x529   :  { %v887_v60 = vsel %vm468_vm2, %v886_v59, %v885_v58 }
 0x52a   :  { %888 = vrot.lane.b32.xlu1 %v887_v60, %s3195_s29 }
 0x595   :  { %v749_v61 = vpop.permute.xlu0 %748 }
 0x596   :  { %2771 = vmatmul.mubr.msk.f32.vlgmr.msra.gmra.mrb[6].mxu0 %vm43_vm0, %v749_v61 }
 0x597   :  { %2892 = vmatpush3.bf16.msra.mxu0 %v3278_v12  ;;  %2784 = vmatprep.mubr.msk.f32.mxu0 %vm3190_vm1, %v3191_v15 }
 0x598   :  { %2896 = vmatprep.subr.bf16.mxu0 %v3189_v13 }
 0x59c   :  { %v889_v62 = vpop.permute.xlu1 %888 }
 0x59d   :  { %2778 = vmatmul.mubr.msk.f32.vlgmr.msra.gmra.mrb[6].mxu1 %vm43_vm0, %v889_v62 }
 0x59e   :  { %2895 = vmatpush3.bf16.msra.mxu1 %v3281_v14  ;;  %2791 = vmatprep.mubr.msk.f32.mxu1 %vm3190_vm1, %v3191_v15 }
 0x59f   :  { %2899 = vmatprep.subr.bf16.mxu1 %v3189_v13 }
 0x669   :  { %v818_v63 = vpop.f32.mrb[6].mxu0 }
 0x66a   :  { %v823_v0 = vrot.slane %v818_v63, 6  ;;  %v824_v1 = vrot.slane %v818_v63, 7  ;;  %v2772_v2 = vpop.f32.mrb[7].mxu0 }
 0x66c   :  { %v827_v4 = vadd.f32 %v823_v0, %v3312_v24  ;;  %v828_v5 = vadd.f32 %v824_v1, %v3310_v23  ;;  %v985_v0 = vrot.slane %v3396_v44, 1  ;;  %v986_v1 = vrot.slane %v3398_v45, 1 }
 0x66e   :  { %2997 = vtanh.f32 %v827_v4  ;;  %v2624_v26 = vmul.f32 -1.442695, %v827_v4  ;;  %v2625_v27 = vmul.f32 -1.442695, %v828_v5 }
 0x66f   :  { %2999 = vtanh.f32 %v828_v5 }
 0x670   :  { %v958_v6 = vpop.f32.mrb[6].mxu1 }
 0x671   :  { %v963_v7 = vrot.slane %v958_v6, 3  ;;  %v964_v10 = vrot.slane %v958_v6, 4  ;;  %v2779_v11 = vpop.f32.mrb[7].mxu1 }
 0x673   :  { %v967_v17 = vadd.f32 %v963_v7, %v3314_v28  ;;  %v968_v18 = vadd.f32 %v964_v10, %v3318_v33 }
 0x675   :  { %3001 = vtanh.f32 %v967_v17  ;;  %v2627_v31 = vmul.f32 -1.442695, %v967_v17  ;;  %v2628_v32 = vmul.f32 -1.442695, %v968_v18 }
 0x676   :  { %3003 = vtanh.f32 %v968_v18 }
 0x677   :  { %3005 = vpow2.f32 %v2624_v26 }
 0x678   :  { %v2998_v19 = vpop.eup %2997  ;;  %3007 = vpow2.f32 %v2625_v27 }
 0x679   :  { %v3000_v20 = vpop.eup %2999  ;;  %853 = vrot.lane.b32.xlu0 %v2998_v19, %s3192_s3  ;;  %3009 = vpow2.f32 %v2627_v31 }
 0x67a   :  { %855 = vrot.lane.b32.xlu1 %v3000_v20, %s3192_s3  ;;  %3011 = vpow2.f32 %v2628_v32 }
 0x67f   :  { %v3002_v21 = vpop.eup %3001 }
 0x680   :  { %v3004_v25 = vpop.eup %3003  ;;  %993 = vrot.lane.b32.xlu0 %v3002_v21, %s3192_s3 }
 0x681   :  { %995 = vrot.lane.b32.xlu1 %v3004_v25, %s3192_s3  ;;  %v3006_v37 = vpop.eup %3005 }
 0x682   :  { %v3008_v38 = vpop.eup %3007  ;;  %v835_v40 = vadd.f32 1.0, %v3006_v37 }
 0x683   :  { %v836_v41 = vadd.f32 1.0, %v3008_v38  ;;  %v3010_v42 = vpop.eup %3009 }
 0x684   :  { %v3012_v3 = vpop.eup %3011  ;;  %3013 = vrcp.f32 %v835_v40  ;;  %v975_v43 = vadd.f32 1.0, %v3010_v42 }
 0x685   :  { %3015 = vrcp.f32 %v836_v41  ;;  %v976_v9 = vadd.f32 1.0, %v3012_v3 }
 0x686   :  { %3017 = vrcp.f32 %v975_v43 }
 0x687   :  { %3019 = vrcp.f32 %v976_v9 }
 0x68e   :  { %v3014_v46 = vpop.eup %3013 }
 0x68f   :  { %v3016_v16 = vpop.eup %3015  ;;  %v849_v58 = vmul.f32 %v3014_v46, %v845_v56 }
 0x690   :  { %v3018_v50 = vpop.eup %3017  ;;  %v850_v60 = vmul.f32 %v3016_v16, %v846_v57 }
 0x691   :  { %v3020_v52 = vpop.eup %3019  ;;  %v989_v2 = vmul.f32 %v3018_v50, %v985_v0 }
 0x692   :  { %v990_v4 = vmul.f32 %v3020_v52, %v986_v1 }
 0x6eb   :  { %v854_v8 = vpop.permute.xlu0 %853 }
 0x6ec   :  { %v859_v47 = vmul.f32 %v3014_v46, %v854_v8  ;;  %v856_v48 = vpop.permute.xlu1 %855 }
 0x6ed   :  { %v860_v49 = vmul.f32 %v3016_v16, %v856_v48 }
 0x6ee   :  { %863 = vrot.lane.b32.xlu0 %v859_v47, %s3193_s6 }
 0x6ef   :  { %865 = vrot.lane.b32.xlu1 %v860_v49, %s3193_s6 }
 0x6f2   :  { %v994_v51 = vpop.permute.xlu0 %993 }
 0x6f3   :  { %v999_v53 = vmul.f32 %v3018_v50, %v994_v51  ;;  %v996_v54 = vpop.permute.xlu1 %995 }
 0x6f4   :  { %v1000_v55 = vmul.f32 %v3020_v52, %v996_v54 }
 0x6f5   :  { %1003 = vrot.lane.b32.xlu0 %v999_v53, %s3193_s6 }
 0x6f6   :  { %1005 = vrot.lane.b32.xlu1 %v1000_v55, %s3193_s6 }
 0x760   :  { %v864_v59 = vpop.permute.xlu0 %863 }
 0x761   :  { %v3434_v61 = vadd.f32 %v864_v59, %v849_v58  ;;  %v866_v62 = vpop.permute.xlu1 %865 }
 0x762   :  { %v3436_v63 = vadd.f32 %v866_v62, %v850_v60 }
 0x763   :  { %3021 = vtanh.f32 %v3434_v61 }
 0x764   :  { %3023 = vtanh.f32 %v3436_v63 }
 0x767   :  { %v1004_v39 = vpop.permute.xlu0 %1003 }
 0x768   :  { %v3442_v36 = vadd.f32 %v1004_v39, %v989_v2  ;;  %v1006_v5 = vpop.permute.xlu1 %1005 }
 0x769   :  { %v3444_v6 = vadd.f32 %v1006_v5, %v990_v4 }
 0x76a   :  { %3025 = vtanh.f32 %v3442_v36 }
 0x76b   :  { %3027 = vtanh.f32 %v3444_v6 }
 0x76d   :  { %v3022_v7 = vpop.eup %3021 }
 0x76e   :  { %v3024_v44 = vpop.eup %3023  ;;  %875 = vrot.lane.b32.xlu0 %v3022_v7, %s3194_s28 }
 0x76f   :  { %877 = vrot.lane.b32.xlu1 %v3024_v44, %s3194_s28 }
 0x774   :  { %v3026_v45 = vpop.eup %3025 }
 0x775   :  { %v3028_v10 = vpop.eup %3027  ;;  %1015 = vrot.lane.b32.xlu0 %v3026_v45, %s3194_s28 }
 0x776   :  { %1017 = vrot.lane.b32.xlu1 %v3028_v10, %s3194_s28 }
 0x7e0   :  { %v876_v11 = vpop.permute.xlu0 %875 }
 0x7e1   :  { %v881_v17 = vmul.f32 %v3014_v46, %v876_v11  ;;  %v878_v18 = vpop.permute.xlu1 %877 }
 0x7e2   :  { %v882_v19 = vmul.f32 %v3016_v16, %v878_v18 }
 0x7e3   :  { %v1025_v20 = vrot.slane %v881_v17, 2 }
 0x7e4   :  { %v1026_v21 = vrot.slane %v882_v19, 1 }
 0x7e6   :  { %v1027_v26 = vsel %vm468_vm2, %v1026_v21, %v1025_v20 }
 0x7e7   :  { %v1016_v25 = vpop.permute.xlu0 %1015  ;;  %1028 = vrot.lane.b32.xlu0 %v1027_v26, %s3195_s29 }
 0x7e8   :  { %v1021_v27 = vmul.f32 %v3018_v50, %v1016_v25  ;;  %v1018_v31 = vpop.permute.xlu1 %1017 }
 0x7e9   :  { %v1022_v32 = vmul.f32 %v3020_v52, %v1018_v31  ;;  %v1125_v31 = vrot.slane %v3434_v61, 7 }
 0x7ea   :  { %v1165_v37 = vrot.slane %v1021_v27, 5 }
 0x7eb   :  { %v1166_v38 = vrot.slane %v1022_v32, 4  ;;  %v1126_v32 = vrot.slane %v3436_v63, 7 }
 0x7ed   :  { %v1167_v40 = vsel %vm468_vm2, %v1166_v38, %v1165_v37 }
 0x7ee   :  { %1168 = vrot.lane.b32.xlu1 %v1167_v40, %s3195_s29 }
 0x859   :  { %v1029_v41 = vpop.permute.xlu0 %1028 }
 0x85a   :  { %2785 = vmatmul.mubr.msk.f32.vlgmr.msra.gmra.mrb[8].mxu0 %vm43_vm0, %v1029_v41 }
 0x85b   :  { %2898 = vmatpush3.bf16.msra.mxu0 %v3278_v12  ;;  %2798 = vmatprep.mubr.msk.f32.mxu0 %vm3190_vm1, %v3191_v15 }
 0x85c   :  { %2902 = vmatprep.subr.bf16.mxu0 %v3189_v13 }
 0x860   :  { %v1169_v42 = vpop.permute.xlu1 %1168 }
 0x861   :  { %2792 = vmatmul.mubr.msk.f32.vlgmr.msra.gmra.mrb[8].mxu1 %vm43_vm0, %v1169_v42 }
 0x862   :  { %2901 = vmatpush3.bf16.msra.mxu1 %v3281_v14  ;;  %2805 = vmatprep.mubr.msk.f32.mxu1 %vm3190_vm1, %v3191_v15 }
 0x863   :  { %2905 = vmatprep.subr.bf16.mxu1 %v3189_v13 }
 0x92d   :  { %v1098_v3 = vpop.f32.mrb[8].mxu0 }
 0x92e   :  { %v1103_v43 = vrot.slane %v1098_v3, 5  ;;  %v1104_v9 = vrot.slane %v1098_v3, 6  ;;  %v2786_v46 = vpop.f32.mrb[9].mxu0 }
 0x930   :  { %v1107_v8 = vadd.f32 %v1103_v43, %v3312_v24  ;;  %v1108_v16 = vadd.f32 %v1104_v9, %v3310_v23  ;;  %v1265_v43 = vrot.slane %v3442_v36, 1  ;;  %v1266_v9 = vrot.slane %v3444_v6, 1 }
 0x932   :  { %3029 = vtanh.f32 %v1107_v8  ;;  %v2630_v57 = vmul.f32 -1.442695, %v1107_v8  ;;  %v2631_v58 = vmul.f32 -1.442695, %v1108_v16 }
 0x933   :  { %3031 = vtanh.f32 %v1108_v16 }
 0x934   :  { %v1238_v47 = vpop.f32.mrb[8].mxu1 }
 0x935   :  { %v1243_v48 = vrot.slane %v1238_v47, 4  ;;  %v1244_v49 = vrot.slane %v1238_v47, 5  ;;  %v2793_v50 = vpop.f32.mrb[9].mxu1 }
 0x937   :  { %v1247_v51 = vadd.f32 %v1243_v48, %v3314_v28  ;;  %v1248_v52 = vadd.f32 %v1244_v49, %v3318_v33 }
 0x939   :  { %3033 = vtanh.f32 %v1247_v51  ;;  %v2633_v59 = vmul.f32 -1.442695, %v1247_v51  ;;  %v2634_v60 = vmul.f32 -1.442695, %v1248_v52 }
 0x93a   :  { %3035 = vtanh.f32 %v1248_v52 }
 0x93b   :  { %3037 = vpow2.f32 %v2630_v57 }
 0x93c   :  { %v3030_v53 = vpop.eup %3029  ;;  %3039 = vpow2.f32 %v2631_v58 }
 0x93d   :  { %v3032_v54 = vpop.eup %3031  ;;  %1133 = vrot.lane.b32.xlu0 %v3030_v53, %s3192_s3  ;;  %3041 = vpow2.f32 %v2633_v59 }
 0x93e   :  { %1135 = vrot.lane.b32.xlu1 %v3032_v54, %s3192_s3  ;;  %3043 = vpow2.f32 %v2634_v60 }
 0x943   :  { %v3034_v55 = vpop.eup %3033 }
 0x944   :  { %v3036_v56 = vpop.eup %3035  ;;  %1273 = vrot.lane.b32.xlu0 %v3034_v55, %s3192_s3 }
 0x945   :  { %1275 = vrot.lane.b32.xlu1 %v3036_v56, %s3192_s3  ;;  %v3038_v62 = vpop.eup %3037 }
 0x946   :  { %v3040_v0 = vpop.eup %3039  ;;  %v1115_v1 = vadd.f32 1.0, %v3038_v62 }
 0x947   :  { %v1116_v2 = vadd.f32 1.0, %v3040_v0  ;;  %v3042_v39 = vpop.eup %3041 }
 0x948   :  { %v3044_v4 = vpop.eup %3043  ;;  %3045 = vrcp.f32 %v1115_v1  ;;  %v1255_v5 = vadd.f32 1.0, %v3042_v39 }
 0x949   :  { %3047 = vrcp.f32 %v1116_v2  ;;  %v1256_v7 = vadd.f32 1.0, %v3044_v4 }
 0x94a   :  { %3049 = vrcp.f32 %v1255_v5 }
 0x94b   :  { %3051 = vrcp.f32 %v1256_v7 }
 0x952   :  { %v3046_v44 = vpop.eup %3045 }
 0x953   :  { %v3048_v10 = vpop.eup %3047  ;;  %v1129_v37 = vmul.f32 %v3046_v44, %v1125_v31 }
 0x954   :  { %v3050_v19 = vpop.eup %3049  ;;  %v1130_v40 = vmul.f32 %v3048_v10, %v1126_v32 }
 0x955   :  { %v3052_v21 = vpop.eup %3051  ;;  %v1269_v46 = vmul.f32 %v3050_v19, %v1265_v43 }
 0x956   :  { %v1270_v8 = vmul.f32 %v3052_v21, %v1266_v9 }
 0x9af   :  { %v1134_v45 = vpop.permute.xlu0 %1133 }
 0x9b0   :  { %v1139_v11 = vmul.f32 %v3046_v44, %v1134_v45  ;;  %v1136_v17 = vpop.permute.xlu1 %1135 }
 0x9b1   :  { %v1140_v18 = vmul.f32 %v3048_v10, %v1136_v17 }
 0x9b2   :  { %1143 = vrot.lane.b32.xlu0 %v1139_v11, %s3193_s6 }
 0x9b3   :  { %1145 = vrot.lane.b32.xlu1 %v1140_v18, %s3193_s6 }
 0x9b6   :  { %v1274_v20 = vpop.permute.xlu0 %1273 }
 0x9b7   :  { %v1279_v25 = vmul.f32 %v3050_v19, %v1274_v20  ;;  %v1276_v26 = vpop.permute.xlu1 %1275 }
 0x9b8   :  { %v1280_v27 = vmul.f32 %v3052_v21, %v1276_v26 }
 0x9b9   :  { %1283 = vrot.lane.b32.xlu0 %v1279_v25, %s3193_s6 }
 0x9ba   :  { %1285 = vrot.lane.b32.xlu1 %v1280_v27, %s3193_s6 }
 0xa24   :  { %v1144_v38 = vpop.permute.xlu0 %1143 }
 0xa25   :  { %v3480_v41 = vadd.f32 %v1144_v38, %v1129_v37  ;;  %v1146_v42 = vpop.permute.xlu1 %1145 }
 0xa26   :  { %v3482_v3 = vadd.f32 %v1146_v42, %v1130_v40 }
 0xa27   :  { %3053 = vtanh.f32 %v3480_v41 }
 0xa28   :  { %3055 = vtanh.f32 %v3482_v3 }
 0xa2b   :  { %v1284_v61 = vpop.permute.xlu0 %1283 }
 0xa2c   :  { %v3488_v63 = vadd.f32 %v1284_v61, %v1269_v46  ;;  %v1286_v16 = vpop.permute.xlu1 %1285 }
 0xa2d   :  { %v3490_v47 = vadd.f32 %v1286_v16, %v1270_v8 }
 0xa2e   :  { %3057 = vtanh.f32 %v3488_v63 }
 0xa2f   :  { %3059 = vtanh.f32 %v3490_v47 }
 0xa31   :  { %v3054_v48 = vpop.eup %3053 }
 0xa32   :  { %v3056_v36 = vpop.eup %3055  ;;  %1155 = vrot.lane.b32.xlu0 %v3054_v48, %s3194_s28 }
 0xa33   :  { %1157 = vrot.lane.b32.xlu1 %v3056_v36, %s3194_s28 }
 0xa38   :  { %v3058_v6 = vpop.eup %3057 }
 0xa39   :  { %v3060_v49 = vpop.eup %3059  ;;  %1295 = vrot.lane.b32.xlu0 %v3058_v6, %s3194_s28 }
 0xa3a   :  { %1297 = vrot.lane.b32.xlu1 %v3060_v49, %s3194_s28 }
 0xaa4   :  { %v1156_v50 = vpop.permute.xlu0 %1155 }
 0xaa5   :  { %v1161_v51 = vmul.f32 %v3046_v44, %v1156_v50  ;;  %v1158_v52 = vpop.permute.xlu1 %1157 }
 0xaa6   :  { %v1162_v53 = vmul.f32 %v3048_v10, %v1158_v52 }
 0xaa7   :  { %v1305_v54 = vrot.slane %v1161_v51, 3 }
 0xaa8   :  { %v1306_v55 = vrot.slane %v1162_v53, 2 }
 0xaaa   :  { %v1307_v57 = vsel %vm468_vm2, %v1306_v55, %v1305_v54 }
 0xaab   :  { %v1296_v56 = vpop.permute.xlu0 %1295  ;;  %1308 = vrot.lane.b32.xlu0 %v1307_v57, %s3195_s29 }
 0xaac   :  { %v1301_v58 = vmul.f32 %v3050_v19, %v1296_v56  ;;  %v1298_v59 = vpop.permute.xlu1 %1297 }
 0xaad   :  { %v1302_v60 = vmul.f32 %v3052_v21, %v1298_v59  ;;  %v1405_v59 = vrot.slane %v3480_v41, 7 }
 0xaae   :  { %v1445_v62 = vrot.slane %v1301_v58, 4 }
 0xaaf   :  { %v1446_v0 = vrot.slane %v1302_v60, 3  ;;  %v1406_v60 = vrot.slane %v3482_v3, 7 }
 0xab1   :  { %v1447_v1 = vsel %vm468_vm2, %v1446_v0, %v1445_v62 }
 0xab2   :  { %1448 = vrot.lane.b32.xlu1 %v1447_v1, %s3195_s29 }
 0xb1d   :  { %v1309_v2 = vpop.permute.xlu0 %1308 }
 0xb1e   :  { %2799 = vmatmul.mubr.msk.f32.vlgmr.msra.gmra.mrb[10].mxu0 %vm43_vm0, %v1309_v2 }
 0xb1f   :  { %2904 = vmatpush3.bf16.msra.mxu0 %v3278_v12  ;;  %2812 = vmatprep.mubr.msk.f32.mxu0 %vm3190_vm1, %v3191_v15 }
 0xb20   :  { %2908 = vmatprep.subr.bf16.mxu0 %v3189_v13 }
 0xb24   :  { %v1449_v39 = vpop.permute.xlu1 %1448 }
 0xb25   :  { %2806 = vmatmul.mubr.msk.f32.vlgmr.msra.gmra.mrb[10].mxu1 %vm43_vm0, %v1449_v39 }
 0xb26   :  { %2907 = vmatpush3.bf16.msra.mxu1 %v3281_v14  ;;  %2819 = vmatprep.mubr.msk.f32.mxu1 %vm3190_vm1, %v3191_v15 }
 0xb27   :  { %2911 = vmatprep.subr.bf16.mxu1 %v3189_v13 }
 0xbf1   :  { %v1378_v4 = vpop.f32.mrb[10].mxu0 }
 0xbf2   :  { %v1383_v5 = vrot.slane %v1378_v4, 4  ;;  %v1384_v7 = vrot.slane %v1378_v4, 5  ;;  %v2800_v44 = vpop.f32.mrb[11].mxu0 }
 0xbf4   :  { %v1387_v45 = vadd.f32 %v1383_v5, %v3312_v24  ;;  %v1388_v10 = vadd.f32 %v1384_v7, %v3310_v23  ;;  %v1545_v5 = vrot.slane %v3488_v63, 1  ;;  %v1546_v7 = vrot.slane %v3490_v47, 1 }
 0xbf6   :  { %3061 = vtanh.f32 %v1387_v45  ;;  %v2636_v32 = vmul.f32 -1.442695, %v1387_v45  ;;  %v2637_v37 = vmul.f32 -1.442695, %v1388_v10 }
 0xbf7   :  { %3063 = vtanh.f32 %v1388_v10 }
 0xbf8   :  { %v1518_v11 = vpop.f32.mrb[10].mxu1 }
 0xbf9   :  { %v1523_v17 = vrot.slane %v1518_v11, 5  ;;  %v1524_v18 = vrot.slane %v1518_v11, 6  ;;  %v2807_v19 = vpop.f32.mrb[11].mxu1 }
 0xbfb   :  { %v1527_v20 = vadd.f32 %v1523_v17, %v3314_v28  ;;  %v1528_v21 = vadd.f32 %v1524_v18, %v3318_v33 }
 0xbfd   :  { %3065 = vtanh.f32 %v1527_v20  ;;  %v2639_v38 = vmul.f32 -1.442695, %v1527_v20  ;;  %v2640_v40 = vmul.f32 -1.442695, %v1528_v21 }
 0xbfe   :  { %3067 = vtanh.f32 %v1528_v21 }
 0xbff   :  { %3069 = vpow2.f32 %v2636_v32 }
 0xc00   :  { %v3062_v25 = vpop.eup %3061  ;;  %3071 = vpow2.f32 %v2637_v37 }
 0xc01   :  { %v3064_v26 = vpop.eup %3063  ;;  %1413 = vrot.lane.b32.xlu0 %v3062_v25, %s3192_s3  ;;  %3073 = vpow2.f32 %v2639_v38 }
 0xc02   :  { %1415 = vrot.lane.b32.xlu1 %v3064_v26, %s3192_s3  ;;  %3075 = vpow2.f32 %v2640_v40 }
 0xc07   :  { %v3066_v27 = vpop.eup %3065 }
 0xc08   :  { %v3068_v31 = vpop.eup %3067  ;;  %1553 = vrot.lane.b32.xlu0 %v3066_v27, %s3192_s3 }
 0xc09   :  { %1555 = vrot.lane.b32.xlu1 %v3068_v31, %s3192_s3  ;;  %v3070_v42 = vpop.eup %3069 }
 0xc0a   :  { %v3072_v43 = vpop.eup %3071  ;;  %v1395_v9 = vadd.f32 1.0, %v3070_v42 }
 0xc0b   :  { %v1396_v46 = vadd.f32 1.0, %v3072_v43  ;;  %v3074_v61 = vpop.eup %3073 }
 0xc0c   :  { %v3076_v8 = vpop.eup %3075  ;;  %3077 = vrcp.f32 %v1395_v9  ;;  %v1535_v16 = vadd.f32 1.0, %v3074_v61 }
 0xc0d   :  { %3079 = vrcp.f32 %v1396_v46  ;;  %v1536_v48 = vadd.f32 1.0, %v3076_v8 }
 0xc0e   :  { %3081 = vrcp.f32 %v1535_v16 }
 0xc0f   :  { %3083 = vrcp.f32 %v1536_v48 }
 0xc16   :  { %v3078_v36 = vpop.eup %3077 }
 0xc17   :  { %v3080_v49 = vpop.eup %3079  ;;  %v1409_v62 = vmul.f32 %v3078_v36, %v1405_v59 }
 0xc18   :  { %v3082_v53 = vpop.eup %3081  ;;  %v1410_v1 = vmul.f32 %v3080_v49, %v1406_v60 }
 0xc19   :  { %v3084_v55 = vpop.eup %3083  ;;  %v1549_v44 = vmul.f32 %v3082_v53, %v1545_v5 }
 0xc1a   :  { %v1550_v45 = vmul.f32 %v3084_v55, %v1546_v7 }
 0xc73   :  { %v1414_v6 = vpop.permute.xlu0 %1413 }
 0xc74   :  { %v1419_v50 = vmul.f32 %v3078_v36, %v1414_v6  ;;  %v1416_v51 = vpop.permute.xlu1 %1415 }
 0xc75   :  { %v1420_v52 = vmul.f32 %v3080_v49, %v1416_v51 }
 0xc76   :  { %1423 = vrot.lane.b32.xlu0 %v1419_v50, %s3193_s6 }
 0xc77   :  { %1425 = vrot.lane.b32.xlu1 %v1420_v52, %s3193_s6 }
 0xc7a   :  { %v1554_v54 = vpop.permute.xlu0 %1553 }
 0xc7b   :  { %v1559_v56 = vmul.f32 %v3082_v53, %v1554_v54  ;;  %v1556_v57 = vpop.permute.xlu1 %1555 }
 0xc7c   :  { %v1560_v58 = vmul.f32 %v3084_v55, %v1556_v57 }
 0xc7d   :  { %1563 = vrot.lane.b32.xlu0 %v1559_v56, %s3193_s6 }
 0xc7e   :  { %1565 = vrot.lane.b32.xlu1 %v1560_v58, %s3193_s6 }
 0xce8   :  { %v1424_v0 = vpop.permute.xlu0 %1423 }
 0xce9   :  { %v3526_v2 = vadd.f32 %v1424_v0, %v1409_v62  ;;  %v1426_v39 = vpop.permute.xlu1 %1425 }
 0xcea   :  { %v3528_v4 = vadd.f32 %v1426_v39, %v1410_v1 }
 0xceb   :  { %3085 = vtanh.f32 %v3526_v2 }
 0xcec   :  { %3087 = vtanh.f32 %v3528_v4 }
 0xcef   :  { %v1564_v41 = vpop.permute.xlu0 %1563 }
 0xcf0   :  { %v3534_v3 = vadd.f32 %v1564_v41, %v1549_v44  ;;  %v1566_v10 = vpop.permute.xlu1 %1565 }
 0xcf1   :  { %v3536_v11 = vadd.f32 %v1566_v10, %v1550_v45 }
 0xcf2   :  { %3089 = vtanh.f32 %v3534_v3 }
 0xcf3   :  { %3091 = vtanh.f32 %v3536_v11 }
 0xcf5   :  { %v3086_v17 = vpop.eup %3085 }
 0xcf6   :  { %v3088_v63 = vpop.eup %3087  ;;  %1435 = vrot.lane.b32.xlu0 %v3086_v17, %s3194_s28 }
 0xcf7   :  { %1437 = vrot.lane.b32.xlu1 %v3088_v63, %s3194_s28 }
 0xcfc   :  { %v3090_v47 = vpop.eup %3089 }
 0xcfd   :  { %v3092_v18 = vpop.eup %3091  ;;  %1575 = vrot.lane.b32.xlu0 %v3090_v47, %s3194_s28 }
 0xcfe   :  { %1577 = vrot.lane.b32.xlu1 %v3092_v18, %s3194_s28 }
 0xd68   :  { %v1436_v19 = vpop.permute.xlu0 %1435 }
 0xd69   :  { %v1441_v20 = vmul.f32 %v3078_v36, %v1436_v19  ;;  %v1438_v21 = vpop.permute.xlu1 %1437 }
 0xd6a   :  { %v1442_v25 = vmul.f32 %v3080_v49, %v1438_v21 }
 0xd6b   :  { %v1585_v26 = vrot.slane %v1441_v20, 4 }
 0xd6c   :  { %v1586_v27 = vrot.slane %v1442_v25, 3 }
 0xd6e   :  { %v1587_v32 = vsel %vm468_vm2, %v1586_v27, %v1585_v26 }
 0xd6f   :  { %v1576_v31 = vpop.permute.xlu0 %1575  ;;  %1588 = vrot.lane.b32.xlu0 %v1587_v32, %s3195_s29 }
 0xd70   :  { %v1581_v37 = vmul.f32 %v3082_v53, %v1576_v31  ;;  %v1578_v38 = vpop.permute.xlu1 %1577 }
 0xd71   :  { %v1582_v40 = vmul.f32 %v3084_v55, %v1578_v38  ;;  %v1685_v38 = vrot.slane %v3526_v2, 7 }
 0xd72   :  { %v1725_v42 = vrot.slane %v1581_v37, 3 }
 0xd73   :  { %v1726_v43 = vrot.slane %v1582_v40, 2  ;;  %v1686_v40 = vrot.slane %v3528_v4, 7 }
 0xd75   :  { %v1727_v9 = vsel %vm468_vm2, %v1726_v43, %v1725_v42 }
 0xd76   :  { %1728 = vrot.lane.b32.xlu1 %v1727_v9, %s3195_s29 }
 0xde1   :  { %v1589_v46 = vpop.permute.xlu0 %1588 }
 0xde2   :  { %2813 = vmatmul.mubr.msk.f32.vlgmr.msra.gmra.mrb[12].mxu0 %vm43_vm0, %v1589_v46 }
 0xde3   :  { %2910 = vmatpush3.bf16.msra.mxu0 %v3278_v12  ;;  %2826 = vmatprep.mubr.msk.f32.mxu0 %vm3190_vm1, %v3191_v15 }
 0xde4   :  { %2914 = vmatprep.subr.bf16.mxu0 %v3189_v13 }
 0xde8   :  { %v1729_v61 = vpop.permute.xlu1 %1728 }
 0xde9   :  { %2820 = vmatmul.mubr.msk.f32.vlgmr.msra.gmra.mrb[12].mxu1 %vm43_vm0, %v1729_v61 }
 0xdea   :  { %2913 = vmatpush3.bf16.msra.mxu1 %v3281_v14  ;;  %2833 = vmatprep.mubr.msk.f32.mxu1 %vm3190_vm1, %v3191_v15 }
 0xdeb   :  { %2917 = vmatprep.subr.bf16.mxu1 %v3189_v13 }
 0xeb5   :  { %v1658_v8 = vpop.f32.mrb[12].mxu0 }
 0xeb6   :  { %v1663_v16 = vrot.slane %v1658_v8, 3  ;;  %v1664_v48 = vrot.slane %v1658_v8, 4  ;;  %v2814_v36 = vpop.f32.mrb[13].mxu0 }
 0xeb8   :  { %v1667_v6 = vadd.f32 %v1663_v16, %v3312_v24  ;;  %v1668_v49 = vadd.f32 %v1664_v48, %v3310_v23  ;;  %v1825_v16 = vrot.slane %v3534_v3, 1  ;;  %v1826_v48 = vrot.slane %v3536_v11, 1 }
 0xeba   :  { %3093 = vtanh.f32 %v1667_v6  ;;  %v2642_v60 = vmul.f32 -1.442695, %v1667_v6  ;;  %v2643_v62 = vmul.f32 -1.442695, %v1668_v49 }
 0xebb   :  { %3095 = vtanh.f32 %v1668_v49 }
 0xebc   :  { %v1798_v50 = vpop.f32.mrb[12].mxu1 }
 0xebd   :  { %v1803_v51 = vrot.slane %v1798_v50, 6  ;;  %v1804_v52 = vrot.slane %v1798_v50, 7  ;;  %v2821_v53 = vpop.f32.mrb[13].mxu1 }
 0xebf   :  { %v1807_v54 = vadd.f32 %v1803_v51, %v3314_v28  ;;  %v1808_v55 = vadd.f32 %v1804_v52, %v3318_v33 }
 0xec1   :  { %3097 = vtanh.f32 %v1807_v54  ;;  %v2645_v0 = vmul.f32 -1.442695, %v1807_v54  ;;  %v2646_v1 = vmul.f32 -1.442695, %v1808_v55 }
 0xec2   :  { %3099 = vtanh.f32 %v1808_v55 }
 0xec3   :  { %3101 = vpow2.f32 %v2642_v60 }
 0xec4   :  { %v3094_v56 = vpop.eup %3093  ;;  %3103 = vpow2.f32 %v2643_v62 }
 0xec5   :  { %v3096_v57 = vpop.eup %3095  ;;  %1693 = vrot.lane.b32.xlu0 %v3094_v56, %s3192_s3  ;;  %3105 = vpow2.f32 %v2645_v0 }
 0xec6   :  { %1695 = vrot.lane.b32.xlu1 %v3096_v57, %s3192_s3  ;;  %3107 = vpow2.f32 %v2646_v1 }
 0xecb   :  { %v3098_v58 = vpop.eup %3097 }
 0xecc   :  { %v3100_v59 = vpop.eup %3099  ;;  %1833 = vrot.lane.b32.xlu0 %v3098_v58, %s3192_s3 }
 0xecd   :  { %1835 = vrot.lane.b32.xlu1 %v3100_v59, %s3192_s3  ;;  %v3102_v39 = vpop.eup %3101 }
 0xece   :  { %v3104_v5 = vpop.eup %3103  ;;  %v1675_v7 = vadd.f32 1.0, %v3102_v39 }
 0xecf   :  { %v1676_v44 = vadd.f32 1.0, %v3104_v5  ;;  %v3106_v41 = vpop.eup %3105 }
 0xed0   :  { %v3108_v45 = vpop.eup %3107  ;;  %3109 = vrcp.f32 %v1675_v7  ;;  %v1815_v10 = vadd.f32 1.0, %v3106_v41 }
 0xed1   :  { %3111 = vrcp.f32 %v1676_v44  ;;  %v1816_v17 = vadd.f32 1.0, %v3108_v45 }
 0xed2   :  { %3113 = vrcp.f32 %v1815_v10 }
 0xed3   :  { %3115 = vrcp.f32 %v1816_v17 }
 0xeda   :  { %v3110_v63 = vpop.eup %3109 }
 0xedb   :  { %v3112_v18 = vpop.eup %3111  ;;  %v1689_v42 = vmul.f32 %v3110_v63, %v1685_v38 }
 0xedc   :  { %v3114_v25 = vpop.eup %3113  ;;  %v1690_v9 = vmul.f32 %v3112_v18, %v1686_v40 }
 0xedd   :  { %v3116_v27 = vpop.eup %3115  ;;  %v1829_v36 = vmul.f32 %v3114_v25, %v1825_v16 }
 0xede   :  { %v1830_v6 = vmul.f32 %v3116_v27, %v1826_v48 }
 0xf37   :  { %v1694_v47 = vpop.permute.xlu0 %1693 }
 0xf38   :  { %v1699_v19 = vmul.f32 %v3110_v63, %v1694_v47  ;;  %v1696_v20 = vpop.permute.xlu1 %1695 }
 0xf39   :  { %v1700_v21 = vmul.f32 %v3112_v18, %v1696_v20 }
 0xf3a   :  { %1703 = vrot.lane.b32.xlu0 %v1699_v19, %s3193_s6 }
 0xf3b   :  { %1705 = vrot.lane.b32.xlu1 %v1700_v21, %s3193_s6 }
 0xf3e   :  { %v1834_v26 = vpop.permute.xlu0 %1833 }
 0xf3f   :  { %v1839_v31 = vmul.f32 %v3114_v25, %v1834_v26  ;;  %v1836_v32 = vpop.permute.xlu1 %1835 }
 0xf40   :  { %v1840_v37 = vmul.f32 %v3116_v27, %v1836_v32 }
 0xf41   :  { %1843 = vrot.lane.b32.xlu0 %v1839_v31, %s3193_s6 }
 0xf42   :  { %1845 = vrot.lane.b32.xlu1 %v1840_v37, %s3193_s6 }
 0xfac   :  { %v1704_v43 = vpop.permute.xlu0 %1703 }
 0xfad   :  { %v3572_v46 = vadd.f32 %v1704_v43, %v1689_v42  ;;  %v1706_v61 = vpop.permute.xlu1 %1705 }
 0xfae   :  { %v3574_v8 = vadd.f32 %v1706_v61, %v1690_v9 }
 0xfaf   :  { %3117 = vtanh.f32 %v3572_v46 }
 0xfb0   :  { %3119 = vtanh.f32 %v3574_v8 }
 0xfb3   :  { %v1844_v2 = vpop.permute.xlu0 %1843 }
 0xfb4   :  { %v3580_v4 = vadd.f32 %v1844_v2, %v1829_v36  ;;  %v1846_v49 = vpop.permute.xlu1 %1845 }
 0xfb5   :  { %v3582_v50 = vadd.f32 %v1846_v49, %v1830_v6 }
 0xfb6   :  { %3121 = vtanh.f32 %v3580_v4 }
 0xfb7   :  { %3123 = vtanh.f32 %v3582_v50 }
 0xfb9   :  { %v3118_v51 = vpop.eup %3117 }
 0xfba   :  { %v3120_v3 = vpop.eup %3119  ;;  %1715 = vrot.lane.b32.xlu0 %v3118_v51, %s3194_s28 }
 0xfbb   :  { %1717 = vrot.lane.b32.xlu1 %v3120_v3, %s3194_s28 }
 0xfc0   :  { %v3122_v11 = vpop.eup %3121 }
 0xfc1   :  { %v3124_v52 = vpop.eup %3123  ;;  %1855 = vrot.lane.b32.xlu0 %v3122_v11, %s3194_s28 }
 0xfc2   :  { %1857 = vrot.lane.b32.xlu1 %v3124_v52, %s3194_s28 }
0x102c   :  { %v1716_v53 = vpop.permute.xlu0 %1715 }
0x102d   :  { %v1721_v54 = vmul.f32 %v3110_v63, %v1716_v53  ;;  %v1718_v55 = vpop.permute.xlu1 %1717 }
0x102e   :  { %v1722_v56 = vmul.f32 %v3112_v18, %v1718_v55 }
0x102f   :  { %v1865_v57 = vrot.slane %v1721_v54, 5 }
0x1030   :  { %v1866_v58 = vrot.slane %v1722_v56, 4 }
0x1032   :  { %v1867_v60 = vsel %vm468_vm2, %v1866_v58, %v1865_v57  ;;  %v1965_v58 = vrot.slane %v3572_v46, 7 }
0x1033   :  { %v1856_v59 = vpop.permute.xlu0 %1855  ;;  %1868 = vrot.lane.b32.xlu0 %v1867_v60, %s3195_s29 }
0x1034   :  { %v1861_v62 = vmul.f32 %v3114_v25, %v1856_v59  ;;  %v1858_v0 = vpop.permute.xlu1 %1857  ;;  %v1966_v59 = vrot.slane %v3574_v8, 7 }
0x1035   :  { %v1862_v1 = vmul.f32 %v3116_v27, %v1858_v0 }
0x1036   :  { %v2005_v39 = vrot.slane %v1861_v62, 2 }
0x1037   :  { %v2006_v5 = vrot.slane %v1862_v1, 1 }
0x1039   :  { %v2007_v7 = vsel %vm468_vm2, %v2006_v5, %v2005_v39  ;;  %v2105_v5 = vrot.slane %v3582_v50, 1 }
0x103a   :  { %2008 = vrot.lane.b32.xlu1 %v2007_v7, %s3195_s29 }
0x10a5   :  { %v1869_v44 = vpop.permute.xlu0 %1868 }
0x10a6   :  { %2827 = vmatmul.mubr.msk.f32.vlgmr.msra.gmra.mrb[14].mxu0 %vm43_vm0, %v1869_v44  ;;  %v2104_v44 = vrot.slane %v3580_v4, 1 }
0x10a7   :  { %2916 = vmatpush3.bf16.msra.mxu0 %v3278_v12  ;;  %2840 = vmatprep.mubr.msk.f32.mxu0 %vm3190_vm1, %v3191_v15 }
0x10a8   :  { %2920 = vmatprep.subr.bf16.mxu0 %v3189_v13 }
0x10ac   :  { %v2009_v41 = vpop.permute.xlu1 %2008 }
0x10ad   :  { %2834 = vmatmul.mubr.msk.f32.vlgmr.msra.gmra.mrb[14].mxu1 %vm43_vm0, %v2009_v41 }
0x10ae   :  { %2919 = vmatpush3.bf16.msra.mxu1 %v3281_v14  ;;  %2847 = vmatprep.mubr.msk.f32.mxu1 %vm3190_vm1, %v3191_v15 }
0x10af   :  { %2923 = vmatprep.subr.bf16.mxu1 %v3189_v13 }
0x1179   :  { %v1938_v45 = vpop.f32.mrb[14].mxu0 }
0x117a   :  { %v1943_v10 = vrot.slane %v1938_v45, 2  ;;  %v1944_v17 = vrot.slane %v1938_v45, 3  ;;  %v2828_v63 = vpop.f32.mrb[15].mxu0 }
0x117c   :  { %v1947_v12 = vadd.f32 %v1943_v10, %v3312_v24  ;;  %v1948_v47 = vadd.f32 %v1944_v17, %v3310_v23 }
0x117e   :  { %3125 = vtanh.f32 %v1947_v12  ;;  %v2648_v31 = vmul.f32 -1.442695, %v1947_v12  ;;  %v2649_v32 = vmul.f32 -1.442695, %v1948_v47 }
0x117f   :  { %3127 = vtanh.f32 %v1948_v47 }
0x1180   :  { %v2078_v18 = vpop.f32.mrb[14].mxu1 }
0x1181   :  { %v2083_v19 = vrot.slane %v2078_v18, 7  ;;  %v2087_v20 = vadd.f32 %v2078_v18, %v3318_v33  ;;  %v2835_v14 = vpop.f32.mrb[15].mxu1 }
0x1183   :  { %v2086_v21 = vadd.f32 %v2083_v19, %v3314_v28  ;;  %3129 = vtanh.f32 %v2087_v20  ;;  %v2652_v37 = vmul.f32 -1.442695, %v2087_v20 }
0x1185   :  { %3131 = vtanh.f32 %v2086_v21  ;;  %v2651_v38 = vmul.f32 -1.442695, %v2086_v21 }
0x1186   :  { %3133 = vpow2.f32 %v2648_v31 }
0x1187   :  { %3135 = vpow2.f32 %v2649_v32 }
0x1188   :  { %v3126_v13 = vpop.eup %3125  ;;  %3137 = vpow2.f32 %v2652_v37 }
0x1189   :  { %v3128_v25 = vpop.eup %3127  ;;  %1973 = vrot.lane.b32.xlu0 %v3126_v13, %s3192_s3  ;;  %3139 = vpow2.f32 %v2651_v38 }
0x118a   :  { %1975 = vrot.lane.b32.xlu1 %v3128_v25, %s3192_s3 }
0x118d   :  { %v3130_v26 = vpop.eup %3129 }
0x118e   :  { %2114 = vrot.lane.b32.xlu1 %v3130_v26, %s3192_s3 }
0x118f   :  { %v3132_v27 = vpop.eup %3131 }
0x1190   :  { %2112 = vrot.lane.b32.xlu0 %v3132_v27, %s3192_s3  ;;  %v3134_v40 = vpop.eup %3133 }
0x1191   :  { %v3136_v42 = vpop.eup %3135  ;;  %v1955_v43 = vadd.f32 1.0, %v3134_v40 }
0x1192   :  { %v1956_v9 = vadd.f32 1.0, %v3136_v42  ;;  %v3138_v61 = vpop.eup %3137 }
0x1193   :  { %v3140_v16 = vpop.eup %3139  ;;  %3141 = vrcp.f32 %v1955_v43  ;;  %v2095_v48 = vadd.f32 1.0, %v3138_v61 }
0x1194   :  { %3143 = vrcp.f32 %v1956_v9  ;;  %v2094_v36 = vadd.f32 1.0, %v3140_v16 }
0x1195   :  { %3145 = vrcp.f32 %v2095_v48 }
0x1196   :  { %3147 = vrcp.f32 %v2094_v36 }
0x119d   :  { %v3142_v2 = vpop.eup %3141 }
0x119e   :  { %v3144_v49 = vpop.eup %3143  ;;  %v1969_v60 = vmul.f32 %v3142_v2, %v1965_v58 }
0x119f   :  { %v3146_v52 = vpop.eup %3145  ;;  %v1970_v0 = vmul.f32 %v3144_v49, %v1966_v59 }
0x11a0   :  { %v3148_v55 = vpop.eup %3147  ;;  %v2109_v41 = vmul.f32 %v3146_v52, %v2105_v5 }
0x11a1   :  { %v2108_v8 = vmul.f32 %v3148_v55, %v2104_v44 }
0x11fb   :  { %v1974_v6 = vpop.permute.xlu0 %1973 }
0x11fc   :  { %v1979_v51 = vmul.f32 %v3142_v2, %v1974_v6  ;;  %v1976_v3 = vpop.permute.xlu1 %1975 }
0x11fd   :  { %v1980_v11 = vmul.f32 %v3144_v49, %v1976_v3 }
0x11fe   :  { %1983 = vrot.lane.b32.xlu0 %v1979_v51, %s3193_s6 }
0x11ff   :  { %1985 = vrot.lane.b32.xlu1 %v1980_v11, %s3193_s6 }
0x1200   :  { %v2115_v53 = vpop.permute.xlu1 %2114 }
0x1201   :  { %v2119_v54 = vmul.f32 %v3146_v52, %v2115_v53 }
0x1202   :  { %v2113_v56 = vpop.permute.xlu0 %2112 }
0x1203   :  { %v2118_v57 = vmul.f32 %v3148_v55, %v2113_v56  ;;  %2124 = vrot.lane.b32.xlu1 %v2119_v54, %s3193_s6 }
0x1205   :  { %2122 = vrot.lane.b32.xlu0 %v2118_v57, %s3193_s6 }
0x1270   :  { %v1984_v62 = vpop.permute.xlu0 %1983 }
0x1271   :  { %v3618_v1 = vadd.f32 %v1984_v62, %v1969_v60  ;;  %v1986_v39 = vpop.permute.xlu1 %1985 }
0x1272   :  { %v3621_v7 = vadd.f32 %v1986_v39, %v1970_v0 }
0x1273   :  { %3149 = vtanh.f32 %v3618_v1 }
0x1274   :  { %3151 = vtanh.f32 %v3621_v7 }
0x1275   :  { %v2125_v46 = vpop.permute.xlu1 %2124 }
0x1276   :  { %v3626_v45 = vadd.f32 %v2125_v46, %v2109_v41 }
0x1277   :  { %v2123_v10 = vpop.permute.xlu0 %2122 }
0x1278   :  { %3153 = vtanh.f32 %v3626_v45  ;;  %v3629_v17 = vadd.f32 %v2123_v10, %v2108_v8 }
0x127a   :  { %3155 = vtanh.f32 %v3629_v17 }
0x127d   :  { %v3150_v50 = vpop.eup %3149 }
0x127e   :  { %v3152_v63 = vpop.eup %3151  ;;  %1995 = vrot.lane.b32.xlu0 %v3150_v50, %s3194_s28 }
0x127f   :  { %1997 = vrot.lane.b32.xlu1 %v3152_v63, %s3194_s28 }
0x1282   :  { %v3154_v4 = vpop.eup %3153 }
0x1283   :  { %2136 = vrot.lane.b32.xlu1 %v3154_v4, %s3194_s28 }
0x1284   :  { %v3156_v12 = vpop.eup %3155 }
0x1285   :  { %2134 = vrot.lane.b32.xlu0 %v3156_v12, %s3194_s28  ;;  %v2244_v12 = vrot.slane %v3618_v1, 7 }
0x12f0   :  { %v1996_v47 = vpop.permute.xlu0 %1995 }
0x12f1   :  { %v2001_v18 = vmul.f32 %v3142_v2, %v1996_v47  ;;  %v1998_v19 = vpop.permute.xlu1 %1997  ;;  %v2245_v47 = vrot.slane %v3621_v7, 7 }
0x12f2   :  { %v2002_v20 = vmul.f32 %v3144_v49, %v1998_v19 }
0x12f3   :  { %v2144_v14 = vrot.slane %v2001_v18, 6 }
0x12f4   :  { %v2145_v21 = vrot.slane %v2002_v20, 5 }
0x12f5   :  { %v2137_v25 = vpop.permute.xlu1 %2136 }
0x12f6   :  { %v2146_v13 = vsel %vm468_vm2, %v2145_v21, %v2144_v14  ;;  %v2141_v31 = vmul.f32 %v3146_v52, %v2137_v25  ;;  %v2382_v14 = vrot.slane %v3629_v17, 1  ;;  %v2433_v17 = vld [vmem:[%s3702_s7] sm:$0xff] }
0x12f7   :  { %v2135_v26 = vpop.permute.xlu0 %2134  ;;  %2147 = vrot.lane.b32.xlu0 %v2146_v13, %s3195_s29 }
0x12f8   :  { %v2140_v27 = vmul.f32 %v3148_v55, %v2135_v26 }
0x12fa   :  { %v2284_v32 = vrot.slane %v2140_v27, 1  ;;  %v2383_v27 = vrot.slane %v3626_v45, 1  ;;  %v2434_v45 = vld [vmem:[%s3702_s7 + $0x8] sm:$0xff] }
0x12fc   :  { %v2285_v37 = vsel %vm468_vm2, %v2141_v31, %v2284_v32 }
0x12fd   :  { %2286 = vrot.lane.b32.xlu1 %v2285_v37, %s3195_s29 }
0x1369   :  { %v2148_v38 = vpop.permute.xlu0 %2147 }
0x136a   :  { %2841 = vmatmul.mubr.msk.f32.vlgmr.msra.gmra.mrb[16].mxu0 %vm43_vm0, %v2148_v38 }
0x136b   :  { %2854 = vmatprep.mubr.msk.f32.mxu0 %vm3190_vm1, %v3191_v15 }
0x136f   :  { %v2287_v40 = vpop.permute.xlu1 %2286 }
0x1370   :  { %2848 = vmatmul.mubr.msk.f32.vlgmr.msra.gmra.mrb[16].mxu1 %vm43_vm0, %v2287_v40 }
0x1371   :  { %2861 = vmatprep.mubr.msk.f32.mxu1 %vm3190_vm1, %v3191_v15 }
0x143d   :  { %v2217_v42 = vpop.f32.mrb[16].mxu0 }
0x143e   :  { %v2222_v43 = vrot.slane %v2217_v42, 1  ;;  %v2223_v9 = vrot.slane %v2217_v42, 2  ;;  %v2842_v61 = vpop.f32.mrb[17].mxu0 }
0x143f   :  { %v2435_v61 = vld [vmem:[%s3702_s7 + $0x10] sm:$0xff] }
0x1440   :  { %v2226_v16 = vadd.f32 %v2222_v43, %v3312_v24  ;;  %v2227_v48 = vadd.f32 %v2223_v9, %v3310_v23  ;;  %v2924_v43 = vpack.c.bf16 %v2434_v45, %v2433_v17 }
0x1442   :  { %3157 = vtanh.f32 %v2226_v16  ;;  %v2654_v11 = vmul.f32 -1.442695, %v2226_v16  ;;  %v2655_v52 = vmul.f32 -1.442695, %v2227_v48  ;;  %2925 = vmatpush3.bf16.msra.mxu1 %v2924_v43  ;;  %v2436_v16 = vld [vmem:[%s3702_s7 + $0x18] sm:$0xff] }
0x1443   :  { %3159 = vtanh.f32 %v2227_v48  ;;  %v2356_v36 = vpop.f32.mrb[16].mxu1  ;;  %v2921_v48 = vpack.c.bf16 %v2436_v16, %v2435_v61 }
0x1444   :  { %v2361_v2 = vrot.slane %v2356_v36, 1  ;;  %v2364_v6 = vadd.f32 %v2356_v36, %v3314_v28  ;;  %v2849_v49 = vpop.f32.mrb[17].mxu1 }
0x1445   :  { %2922 = vmatpush3.bf16.msra.mxu0 %v2921_v48 }
0x1446   :  { %v2365_v51 = vadd.f32 %v2361_v2, %v3318_v33  ;;  %3161 = vtanh.f32 %v2364_v6  ;;  %v2657_v28 = vmul.f32 -1.442695, %v2364_v6 }
0x1448   :  { %3163 = vtanh.f32 %v2365_v51  ;;  %v2658_v33 = vmul.f32 -1.442695, %v2365_v51 }
0x1449   :  { %3165 = vpow2.f32 %v2654_v11 }
0x144a   :  { %3167 = vpow2.f32 %v2655_v52 }
0x144b   :  { %3169 = vpow2.f32 %v2657_v28 }
0x144c   :  { %v3158_v15 = vpop.eup %3157  ;;  %3171 = vpow2.f32 %v2658_v33 }
0x144d   :  { %v3160_v3 = vpop.eup %3159  ;;  %2252 = vrot.lane.b32.xlu1 %v3158_v15, %s3192_s3 }
0x144e   :  { %2254 = vrot.lane.b32.xlu0 %v3160_v3, %s3192_s3 }
0x1450   :  { %v3162_v24 = vpop.eup %3161 }
0x1451   :  { %2390 = vrot.lane.b32.xlu1 %v3162_v24, %s3192_s3 }
0x1452   :  { %v3164_v23 = vpop.eup %3163 }
0x1453   :  { %2392 = vrot.lane.b32.xlu0 %v3164_v23, %s3192_s3  ;;  %v3166_v53 = vpop.eup %3165  ;;  %v2428_v23 = vrot.slane %v3356_v34, 7 }
0x1454   :  { %v3168_v54 = vpop.eup %3167  ;;  %v2234_v55 = vadd.f32 1.0, %v3166_v53 }
0x1455   :  { %v3170_v56 = vpop.eup %3169  ;;  %v2235_v57 = vadd.f32 1.0, %v3168_v54 }
0x1456   :  { %v3172_v58 = vpop.eup %3171  ;;  %3173 = vrcp.f32 %v2234_v55  ;;  %v2372_v59 = vadd.f32 1.0, %v3170_v56 }
0x1457   :  { %3175 = vrcp.f32 %v2235_v57  ;;  %v2373_v60 = vadd.f32 1.0, %v3172_v58 }
0x1458   :  { %3177 = vrcp.f32 %v2372_v59 }
0x1459   :  { %3179 = vrcp.f32 %v2373_v60 }
0x1460   :  { %v3174_v62 = vpop.eup %3173 }
0x1461   :  { %v3176_v39 = vpop.eup %3175  ;;  %v2248_v18 = vmul.f32 %v3174_v62, %v2244_v12 }
0x1462   :  { %v3178_v46 = vpop.eup %3177  ;;  %v2249_v19 = vmul.f32 %v3176_v39, %v2245_v47 }
0x1463   :  { %v3180_v50 = vpop.eup %3179  ;;  %v2386_v26 = vmul.f32 %v3178_v46, %v2382_v14 }
0x1464   :  { %v2387_v37 = vmul.f32 %v3180_v50, %v2383_v27 }
0x14bf   :  { %v2253_v0 = vpop.permute.xlu1 %2252 }
0x14c0   :  { %v2255_v5 = vpop.permute.xlu0 %2254  ;;  %v2258_v44 = vmul.f32 %v3174_v62, %v2253_v0 }
0x14c1   :  { %v2259_v41 = vmul.f32 %v3176_v39, %v2255_v5 }
0x14c2   :  { %2262 = vrot.lane.b32.xlu1 %v2258_v44, %s3193_s6 }
0x14c3   :  { %2264 = vrot.lane.b32.xlu0 %v2259_v41, %s3193_s6  ;;  %v2391_v8 = vpop.permute.xlu1 %2390 }
0x14c4   :  { %v2396_v10 = vmul.f32 %v3178_v46, %v2391_v8 }
0x14c5   :  { %v2393_v63 = vpop.permute.xlu0 %2392 }
0x14c6   :  { %2400 = vrot.lane.b32.xlu1 %v2396_v10, %s3193_s6  ;;  %v2397_v4 = vmul.f32 %v3180_v50, %v2393_v63 }
0x14c8   :  { %2402 = vrot.lane.b32.xlu0 %v2397_v4, %s3193_s6 }
0x1534   :  { %v2263_v20 = vpop.permute.xlu1 %2262 }
0x1535   :  { %v2265_v21 = vpop.permute.xlu0 %2264  ;;  %v2268_v13 = vadd.f32 %v2263_v20, %v2248_v18 }
0x1536   :  { %v2269_v25 = vadd.f32 %v2265_v21, %v2249_v19 }
0x1537   :  { %3181 = vtanh.f32 %v2268_v13 }
0x1538   :  { %3183 = vtanh.f32 %v2269_v25  ;;  %v2401_v31 = vpop.permute.xlu1 %2400 }
0x1539   :  { %v2406_v32 = vadd.f32 %v2401_v31, %v2386_v26 }
0x153a   :  { %v2403_v1 = vpop.permute.xlu0 %2402 }
0x153b   :  { %3185 = vtanh.f32 %v2406_v32  ;;  %v2407_v38 = vadd.f32 %v2403_v1, %v2387_v37 }
0x153d   :  { %3187 = vtanh.f32 %v2407_v38 }
0x1541   :  { %v3182_v7 = vpop.eup %3181 }
0x1542   :  { %v3184_v40 = vpop.eup %3183  ;;  %2274 = vrot.lane.b32.xlu1 %v3182_v7, %s3194_s28 }
0x1543   :  { %2276 = vrot.lane.b32.xlu0 %v3184_v40, %s3194_s28 }
0x1545   :  { %v3186_v42 = vpop.eup %3185 }
0x1546   :  { %2412 = vrot.lane.b32.xlu1 %v3186_v42, %s3194_s28 }
0x1547   :  { %v3188_v9 = vpop.eup %3187 }
0x1548   :  { %2414 = vrot.lane.b32.xlu0 %v3188_v9, %s3194_s28 }
0x15b4   :  { %v2275_v36 = vpop.permute.xlu1 %2274 }
0x15b5   :  { %v2277_v2 = vpop.permute.xlu0 %2276  ;;  %v2280_v6 = vmul.f32 %v3174_v62, %v2275_v36  ;;  %v2661_v62 = vld [vmem:[%s3703_s8] ss:$0 sm:$0xff] }
0x15b6   :  { %v2281_v49 = vmul.f32 %v3176_v39, %v2277_v2 }
0x15b7   :  { %v2422_v15 = vrot.slane %v2280_v6, 7 }
0x15b8   :  { %v2423_v51 = vrot.slane %v2281_v49, 7  ;;  %v2413_v3 = vpop.permute.xlu1 %2412 }
0x15b9   :  { %v2426_v28 = vadd.f32 %v2422_v15, %v3349_v29  ;;  %v2418_v33 = vmul.f32 %v3178_v46, %v2413_v3 }
0x15ba   :  { %v2427_v24 = vadd.f32 %v2423_v51, %v3346_v22  ;;  %v2415_v11 = vpop.permute.xlu0 %2414 }
0x15bb   :  { %v2419_v53 = vmul.f32 %v3180_v50, %v2415_v11  ;;  %v2431_v56 = vadd.f32 %v2418_v33, %v606_v35 }
0x15bc   :  { %v2517_v52 = vrot.slane %v2427_v24, 7 }
0x15bd   :  { %v2432_v54 = vadd.f32 %v2428_v23, %v2419_v53 }
0x15be   :  { %v2518_v55 = vsel %vm468_vm2, %v2517_v52, %v2426_v28 }
0x15bf   :  { %2519 = vrot.lane.b32.xlu1 %v2518_v55, %s3195_s29  ;;  %v2439_v57 = vrot.slane %v2432_v54, 7 }
0x15c1   :  { %v2440_v58 = vsel %vm468_vm2, %v2439_v57, %v2431_v56 }
0x15c2   :  { %2441 = vrot.lane.b32.xlu0 %v2440_v58, %s3195_s29 }
0x1631   :  { %v2520_v22 = vpop.permute.xlu1 %2519 }
0x1632   :  { %2862 = vmatmul.mubr.msk.f32.vlgmr.msra.gmra.mrb[18].mxu1 %vm43_vm0, %v2520_v22 }
0x1634   :  { %v2442_v34 = vpop.permute.xlu0 %2441 }
0x1635   :  { %2855 = vmatmul.mubr.msk.f32.vlgmr.msra.gmra.mrb[18].mxu0 %vm43_vm0, %v2442_v34 }
0x1705   :  { %v2589_v29 = vpop.f32.mrb[18].mxu1 }
0x1706   :  { %v2863_v59 = vpop.f32.mrb[19].mxu1 }
0x1708   :  { %v2511_v60 = vpop.f32.mrb[18].mxu0 }
0x1709   :  { %v2590_v30 = vadd.f32 %v2589_v29, %v2511_v60  ;;  %v2856_v35 = vpop.f32.mrb[19].mxu0 }
0x170b   :  { %v2600_v0 = vadd.f32 %v2661_v62, %v2590_v30 }
0x170d   :  { %2602 = vst.msk [vmem:[%s3704_s9] sm:$0x3] %vm2601_vm3, %v2600_v0 }

// kernel: sequence_embed_forward.2
= control target key start
LH: loop header
LB: loop body
LE: loop exit
PB: predicated region body
PF: predicated region fallthrough
CT: control target
= control target key end

     0   :  { %s3180_s17 = smov 0   ;;  %s4452_s0 = inlined_call_operand.vmem [shape: f32[2,8,8,8], index: 0, kind: input, shape index: {}]   ;;  %s4453_s1 = inlined_call_operand.vmem [shape: f32[5,5,8], index: 1, kind: input, shape index: {}]   ;;  %s4454_s2 = inlined_call_operand.vmem [shape: f32[1,8], index: 2, kind: input, shape index: {}]   ;;  %s4455_s3 = inlined_call_operand.vmem [shape: f32[8,8], index: 3, kind: input, shape index: {}]   ;;  %s4456_s4 = inlined_call_operand.vmem [shape: f32[1,8], index: 4, kind: input, shape index: {}]   ;;  %s4457_s5 = inlined_call_operand.vmem [shape: f32[5,5,8], index: 5, kind: input, shape index: {}]   ;;  %s4458_s6 = inlined_call_operand.vmem [shape: f32[1,8], index: 6, kind: input, shape index: {}]   ;;  %s4459_s7 = inlined_call_operand.vmem [shape: f32[8,4], index: 7, kind: input, shape index: {}]   ;;  %s4460_s8 = inlined_call_operand.vmem [shape: f32[1,4], index: 8, kind: input, shape index: {}]   ;;  %s4461_s9 = inlined_call_operand.vmem [shape: f32[8,4,16], index: 9, kind: input, shape index: {}]   ;;  %s4462_s10 = inlined_call_operand.vmem [shape: f32[1,16], index: 10, kind: input, shape index: {}]   ;;  %s4463_s11 = inlined_call_operand.vmem [shape: f32[2,8,16], index: 11, kind: output, shape index: {}]  }
   0x1 LB: > { %s2943_s18 = sadd.s32 4294967295, %s3116_s17   ;;  %p2947_p0 = scmp.ge.s32.totalorder %s3116_s17, 1  ;;  %s3116_s17 = sphi %s3180_s17, %s21_s17  }
   0x2   : > { %p337_p1 = scmp.lt.s32.totalorder %s3116_s17, 3 }
   0x4   : > { %p338_p2 = pnand %p2947_p0, %p337_p1 }
   0x6   : > { %341 = sbr.rel (%p338_p2) target bundleno = 882 (0x372), region = 64 }
   0xd   : > { %v1175_v0 = vld [vmem:[%s4455_s3] sm:$0xff]  ;;  %p3193_p3 = scmp.lt.s32.totalorder %s2943_s18, 1  ;;  %vm385_vm0 = vcmask 64512   ;;  %vm387_vm1 = vcmask 60416   ;;  %v442_v1 = vlaneseq  ;;  %v4464_v2 = vmov 0.0  }
   0xe   : > { %3032 = vmatprep.subr.mxu0 %v1175_v0  ;;  %386 = vst.msk [vmem:[#allocation2] sm:$0xff] %vm385_vm0, %v4464_v2  ;;  %389 = vst.msk [vmem:[#allocation2 + $0x10] sm:$0xff] %vm385_vm0, %v4464_v2  ;;  %v419_v4 = vld [vmem:[%s4453_s1] sm:$0x1f]  ;;  %v420_v13 = vld [vmem:[%s4453_s1 + $0x8] sm:$0x1f] }
   0xf   : > { %388 = vst.msk [vmem:[#allocation2 + $0x8] sm:$0xf] %vm387_vm1, %v4464_v2  ;;  %390 = vst.msk [vmem:[#allocation2 + $0x18] sm:$0xf] %vm387_vm1, %v4464_v2  ;;  %3033 = vmatpush3.msra.mxu0 %v1175_v0  ;;  %s4569_s18 = smov (!%p3193_p3, %s2943_s18), 1  ;;  %v443_v3 = vshrl.u32 %v442_v1, 7 }
  0x10   : > { %391 = vst.msk [vmem:[#allocation2 + $0x20] sm:$0xff] %vm385_vm0, %v4464_v2  ;;  %393 = vst.msk [vmem:[#allocation2 + $0x30] sm:$0xff] %vm385_vm0, %v4464_v2  ;;  %3060 = vmatprep.subr.mxu0 %v4464_v2  ;;  %s2997_s24 = sshll.u32 %s4569_s18, 6  ;;  %v421_v36 = vld [vmem:[%s4453_s1 + $0x10] sm:$0x1f]  ;;  %vm2256_vm14 = vcmask 1043456  }
  0x11   : > { %392 = vst.msk [vmem:[#allocation2 + $0x28] sm:$0xf] %vm387_vm1, %v4464_v2  ;;  %394 = vst.msk [vmem:[#allocation2 + $0x38] sm:$0xf] %vm387_vm1, %v4464_v2  ;;  %v3256_v5 = vsub.s32 0, %v443_v3  ;;  %v3258_v6 = vsub.s32 1, %v443_v3  ;;  %s3267_s27 = scalar_lea.vmem %s4452_s0, %s2997_s24 }
  0x12   : > { %395 = vst.msk [vmem:[#allocation2 + $0x40] sm:$0xff] %vm385_vm0, %v4464_v2  ;;  %397 = vst.msk [vmem:[#allocation2 + $0x50] sm:$0xff] %vm385_vm0, %v4464_v2  ;;  %v3260_v7 = vsub.s32 2, %v443_v3  ;;  %v3262_v8 = vsub.s32 3, %v443_v3  ;;  %v3269_v9 = vsub.s32 4, %v443_v3  ;;  %v411_v10 = vld [vmem:[%s3267_s27] sm:$0xff] }
  0x13   : > { %396 = vst.msk [vmem:[#allocation2 + $0x48] sm:$0xf] %vm387_vm1, %v4464_v2  ;;  %398 = vst.msk [vmem:[#allocation2 + $0x58] sm:$0xf] %vm387_vm1, %v4464_v2  ;;  %v412_v11 = vld [vmem:[%s3267_s27 + $0x8] sm:$0xff]  ;;  %v413_v12 = vld [vmem:[%s3267_s27 + $0x10] sm:$0xff]  ;;  %v3278_v14 = vrot.slane %v419_v4, %v3256_v5  ;;  %v3281_v15 = vrot.slane %v419_v4, %v3258_v6  ;;  %v3306_v32 = vrot.slane %v420_v13, %v3256_v5 }
  0x14   : > { %399 = vst.msk [vmem:[#allocation2 + $0x60] sm:$0xff] %vm385_vm0, %v4464_v2  ;;  %401 = vst.msk [vmem:[#allocation2 + $0x70] sm:$0xff] %vm385_vm0, %v4464_v2  ;;  %v3284_v16 = vrot.slane %v419_v4, %v3260_v7  ;;  %v3290_v17 = vrot.slane %v419_v4, %v3262_v8  ;;  %v414_v18 = vld [vmem:[%s3267_s27 + $0x18] sm:$0xff]  ;;  %v415_v19 = vld [vmem:[%s3267_s27 + $0x20] sm:$0xff]  ;;  %v3302_v28 = vrot.slane %v419_v4, %v3269_v9  ;;  %s2950_s21 = sshll.u32 %s4569_s18, 3 }
  0x15   : > { %400 = vst.msk [vmem:[#allocation2 + $0x68] sm:$0xf] %vm387_vm1, %v4464_v2  ;;  %402 = vst.msk [vmem:[#allocation2 + $0x78] sm:$0xf] %vm387_vm1, %v4464_v2  ;;  %v416_v20 = vld [vmem:[%s3267_s27 + $0x28] sm:$0xff]  ;;  %v434_v21 = vld [vmem:[#allocation2] sm:$0xff]  ;;  %v3311_v35 = vrot.slane %v420_v13, %v3258_v6  ;;  %v3320_v39 = vrot.slane %v420_v13, %v3260_v7  ;;  %v3323_v40 = vrot.slane %v420_v13, %v3262_v8  ;;  %s384_s26 = scalar_lea.vmem %s4463_s11, %s2950_s21 }
  0x16   : > { %403 = vst.msk [vmem:[#allocation2 + $0x80] sm:$0xff] %vm385_vm0, %v4464_v2  ;;  %405 = vst.msk [vmem:[#allocation2 + $0x90] sm:$0xff] %vm385_vm0, %v4464_v2  ;;  %v462_v22 = vld [vmem:[#allocation2 + $0x1] sm:$0xff]  ;;  %v446_v24 = vmul.f32 %v3278_v14, %v434_v21  ;;  %v417_v33 = vld [vmem:[%s3267_s27 + $0x30] sm:$0xff]  ;;  %v3326_v42 = vrot.slane %v420_v13, %v3269_v9  ;;  %v3333_v49 = vrot.slane %v421_v36, %v3256_v5 }
  0x17   : > { %404 = vst.msk [vmem:[#allocation2 + $0x88] sm:$0xf] %vm387_vm1, %v4464_v2  ;;  %406 = vst.msk [vmem:[#allocation2 + $0x98] sm:$0xf] %vm387_vm1, %v4464_v2  ;;  %v490_v23 = vld [vmem:[#allocation2 + $0x2] sm:$0xff]  ;;  %v474_v25 = vmul.f32 %v3281_v15, %v462_v22  ;;  %v418_v34 = vld [vmem:[%s3267_s27 + $0x38] sm:$0xff]  ;;  %v3336_v50 = vrot.slane %v421_v36, %v3258_v6  ;;  %v3339_v51 = vrot.slane %v421_v36, %v3260_v7 }
  0x18   : > { %407 = vst.msk [vmem:[#allocation2 + $0xa0] sm:$0xff] %vm385_vm0, %v4464_v2  ;;  %409 = vst.msk [vmem:[#allocation2 + $0xb0] sm:$0xff] %vm385_vm0, %v4464_v2  ;;  %v502_v26 = vmul.f32 %v3284_v16, %v490_v23  ;;  %v518_v27 = vld [vmem:[#allocation2 + $0x3] sm:$0xff]  ;;  %v575_v41 = vld [vmem:[#allocation2 + $0x10] sm:$0xff]  ;;  %v3342_v52 = vrot.slane %v421_v36, %v3262_v8  ;;  %v3352_v60 = vrot.slane %v421_v36, %v3269_v9 }
  0x19   : > { %408 = vst.msk [vmem:[#allocation2 + $0xa8] sm:$0xf] %vm387_vm1, %v4464_v2  ;;  %410 = vst.msk [vmem:[#allocation2 + $0xb8] sm:$0xf] %vm387_vm1, %v4464_v2  ;;  %v546_v29 = vld [vmem:[#allocation2 + $0x4] sm:$0xff]  ;;  %v482_v30 = vadd.f32 %v474_v25, %v446_v24  ;;  %v530_v31 = vmul.f32 %v3290_v17, %v518_v27  ;;  %v587_v45 = vmul.f32 %v3306_v32, %v575_v41  ;;  %v603_v46 = vld [vmem:[#allocation2 + $0x11] sm:$0xff] }
  0x1a   : > { %4505 = vst [vmem:[#allocation3_spill] sm:$0xff] %v3256_v5  ;;  %4506 = vst [vmem:[#allocation4_spill] sm:$0xff] %v3258_v6  ;;  %v558_v38 = vmul.f32 %v3302_v28, %v546_v29  ;;  %v422_v43 = vld [vmem:[%s4453_s1 + $0x18] sm:$0x1f]  ;;  %v423_v53 = vld [vmem:[%s4453_s1 + $0x20] sm:$0x1f]  ;;  %v615_v55 = vmul.f32 %v3311_v35, %v603_v46  ;;  %v447_v62 = vmul.f32 %v575_v41, %v3278_v14 }
  0x1b   : > { %4507 = vst [vmem:[#allocation5_spill] sm:$0xff] %v3260_v7  ;;  %4508 = vst [vmem:[#allocation6_spill] sm:$0xff] %v3262_v8  ;;  %v510_v37 = vadd.f32 %v502_v26, %v482_v30  ;;  %v631_v47 = vld [vmem:[#allocation2 + $0x12] sm:$0xff]  ;;  %v3355_v61 = vrot.slane %v422_v43, %v3256_v5  ;;  %v3359_v0 = vrot.slane %v422_v43, %v3258_v6 }
  0x1c   : > { %4509 = vst [vmem:[#allocation7_spill] sm:$0xff] %v3269_v9  ;;  %426 = vst.msk [vmem:[#allocation2 + $0x22] sm:$0xff] %vm385_vm0, %v411_v10  ;;  %v659_v48 = vld [vmem:[#allocation2 + $0x13] sm:$0xff]  ;;  %v643_v56 = vmul.f32 %v3320_v39, %v631_v47  ;;  %v3362_v1 = vrot.slane %v422_v43, %v3260_v7  ;;  %v3365_v3 = vrot.slane %v422_v43, %v3262_v8 }
  0x1d   : > { %427 = vst.msk [vmem:[#allocation2 + $0x32] sm:$0xff] %vm385_vm0, %v412_v11  ;;  %428 = vst.msk [vmem:[#allocation2 + $0x42] sm:$0xff] %vm385_vm0, %v413_v12  ;;  %v538_v44 = vadd.f32 %v530_v31, %v510_v37  ;;  %v671_v57 = vmul.f32 %v3323_v40, %v659_v48  ;;  %v687_v58 = vld [vmem:[#allocation2 + $0x14] sm:$0xff]  ;;  %v3368_v4 = vrot.slane %v422_v43, %v3269_v9 }
  0x1e   : > { %429 = vst.msk [vmem:[#allocation2 + $0x52] sm:$0xff] %vm385_vm0, %v414_v18  ;;  %430 = vst.msk [vmem:[#allocation2 + $0x62] sm:$0xff] %vm385_vm0, %v415_v19  ;;  %v699_v59 = vmul.f32 %v3326_v42, %v687_v58  ;;  %v3371_v10 = vrot.slane %v423_v53, %v3256_v5  ;;  %v475_v11 = vmul.f32 %v603_v46, %v3281_v15 }
  0x1f   : > { %431 = vst.msk [vmem:[#allocation2 + $0x72] sm:$0xff] %vm385_vm0, %v416_v20  ;;  %432 = vst.msk [vmem:[#allocation2 + $0x82] sm:$0xff] %vm385_vm0, %v417_v33  ;;  %v566_v54 = vadd.f32 %v558_v38, %v538_v44  ;;  %v503_v12 = vmul.f32 %v631_v47, %v3284_v16  ;;  %v3376_v20 = vrot.slane %v423_v53, %v3258_v6 }
  0x20   : > { %433 = vst.msk [vmem:[#allocation2 + $0x92] sm:$0xff] %vm385_vm0, %v418_v34  ;;  %4510 = vst [vmem:[#allocation8_spill] sm:$0xff] %v3368_v4  ;;  %v3379_v21 = vrot.slane %v423_v53, %v3260_v7  ;;  %v3382_v22 = vrot.slane %v423_v53, %v3262_v8  ;;  %v483_v29 = vadd.f32 %v475_v11, %v447_v62 }
  0x21   : > { %v595_v63 = vadd.f32 %v587_v45, %v566_v54  ;;  %4511 = vst [vmem:[#allocation9_spill] sm:$0xff] %v3371_v10  ;;  %v531_v30 = vmul.f32 %v659_v48, %v3290_v17  ;;  %v3405_v45 = vrot.slane %v423_v53, %v3269_v9  ;;  %v559_v47 = vmul.f32 %v687_v58, %v3302_v28 }
  0x22   : > { %4512 = vst [vmem:[#allocation10_spill] sm:$0xff] %v3379_v21  ;;  %4513 = vst [vmem:[#allocation11_spill] sm:$0xff] %v3382_v22  ;;  %v511_v46 = vadd.f32 %v503_v12, %v483_v29 }
  0x23   : > { %v623_v13 = vadd.f32 %v615_v55, %v595_v63  ;;  %v715_v18 = vld [vmem:[#allocation2 + $0x20] sm:$0xff]  ;;  %4514 = vst [vmem:[#allocation12_spill] sm:$0xff] %v3405_v45 }
  0x24   : > { %v743_v19 = vld [vmem:[#allocation2 + $0x21] sm:$0xff]  ;;  %v727_v23 = vmul.f32 %v3333_v49, %v715_v18  ;;  %v3392_v37 = vld [vmem:[#allocation2 + $0x30] sm:$0xff]  ;;  %v539_v12 = vadd.f32 %v531_v30, %v511_v46  ;;  %v448_v9 = vmul.f32 %v715_v18, %v3278_v14 }
  0x25   : > { %v755_v24 = vmul.f32 %v3336_v50, %v743_v19  ;;  %v771_v25 = vld [vmem:[#allocation2 + $0x22] sm:$0xff]  ;;  %v651_v31 = vadd.f32 %v643_v56, %v623_v13  ;;  %v3396_v38 = vmul.f32 %v3355_v61, %v3392_v37  ;;  %v3398_v41 = vld [vmem:[#allocation2 + $0x31] sm:$0xff]  ;;  %v588_v13 = vmul.f32 %v715_v18, %v3306_v32 }
  0x26   : > { %v799_v26 = vld [vmem:[#allocation2 + $0x23] sm:$0xff]  ;;  %v783_v33 = vmul.f32 %v3339_v51, %v771_v25  ;;  %v3400_v43 = vld [vmem:[#allocation2 + $0x32] sm:$0xff]  ;;  %v3410_v54 = vmul.f32 %v3359_v0, %v3398_v41  ;;  %v567_v6 = vadd.f32 %v559_v47, %v539_v12  ;;  %v616_v30 = vmul.f32 %v743_v19, %v3311_v35 }
  0x27   : > { %v827_v27 = vld [vmem:[#allocation2 + $0x24] sm:$0xff]  ;;  %v811_v34 = vmul.f32 %v3342_v52, %v799_v26  ;;  %v3402_v44 = vld [vmem:[#allocation2 + $0x33] sm:$0xff]  ;;  %v679_v48 = vadd.f32 %v671_v57, %v651_v31  ;;  %v3414_v55 = vmul.f32 %v3362_v1, %v3400_v43  ;;  %v476_v46 = vmul.f32 %v743_v19, %v3281_v15 }
  0x28   : > { %v3390_v36 = vmul.f32 %v3352_v60, %v827_v27  ;;  %v3418_v56 = vmul.f32 %v3365_v3, %v3402_v44  ;;  %v3420_v62 = vld [vmem:[#allocation2 + $0x34] sm:$0xff]  ;;  %v3422_v53 = vld [vmem:[#allocation2 + $0x40] sm:$0xff]  ;;  %v644_v18 = vmul.f32 %v771_v25, %v3320_v39  ;;  %v672_v47 = vmul.f32 %v799_v26, %v3323_v40 }
  0x29   : > { %v3426_v58 = vmul.f32 %v3368_v4, %v3420_v62  ;;  %v3430_v57 = vmul.f32 %v3371_v10, %v3422_v53  ;;  %v3432_v63 = vld [vmem:[#allocation2 + $0x41] sm:$0xff]  ;;  %v707_v29 = vadd.f32 %v699_v59, %v679_v48  ;;  %v504_v59 = vmul.f32 %v771_v25, %v3284_v16 }
  0x2a   : > { %v3434_v11 = vld [vmem:[#allocation2 + $0x42] sm:$0xff]  ;;  %v3439_v31 = vmul.f32 %v3376_v20, %v3432_v63  ;;  %v484_v12 = vadd.f32 %v476_v46, %v448_v9  ;;  %v812_v9 = vmul.f32 %v3402_v44, %v3342_v52 }
  0x2b   : > { %4515 = vst [vmem:[#allocation13_spill] sm:$0xff] %v3426_v58  ;;  %4516 = vst [vmem:[#allocation14_spill] sm:$0xff] %v3430_v57  ;;  %v3443_v2 = vmul.f32 %v3379_v21, %v3434_v11  ;;  %v3446_v8 = vld [vmem:[#allocation2 + $0x43] sm:$0xff]  ;;  %v735_v48 = vadd.f32 %v727_v23, %v707_v29  ;;  %v532_v57 = vmul.f32 %v799_v26, %v3290_v17 }
  0x2c   : > { %4517 = vst [vmem:[#allocation15_spill] sm:$0xff] %v3439_v31  ;;  %v3448_v7 = vld [vmem:[#allocation2 + $0x44] sm:$0xff]  ;;  %v3455_v5 = vmul.f32 %v3382_v22, %v3446_v8  ;;  %v596_v31 = vadd.f32 %v588_v13, %v567_v6  ;;  %v700_v58 = vmul.f32 %v827_v27, %v3326_v42  ;;  %v728_v23 = vmul.f32 %v3392_v37, %v3333_v49 }
  0x2d   : > { %4518 = vst [vmem:[#allocation16_spill] sm:$0xff] %v3443_v2  ;;  %v3459_v2 = vmul.f32 %v3405_v45, %v3448_v7  ;;  %v763_v19 = vadd.f32 %v755_v24, %v735_v48  ;;  %v756_v29 = vmul.f32 %v3398_v41, %v3336_v50  ;;  %v512_v25 = vadd.f32 %v504_v59, %v484_v12 }
  0x2e   : > { %4519 = vst [vmem:[#allocation17_spill] sm:$0xff] %v3455_v5  ;;  %v624_v5 = vadd.f32 %v616_v30, %v596_v31  ;;  %v560_v6 = vmul.f32 %v827_v27, %v3302_v28  ;;  %v3476_v24 = vmul.f32 %v3420_v62, %v3352_v60  ;;  %v3480_v26 = vmul.f32 %v3422_v53, %v3355_v61 }
  0x2f   : > { %4520 = vst [vmem:[#allocation18_spill] sm:$0xff] %v3459_v2  ;;  %v784_v2 = vmul.f32 %v3400_v43, %v3339_v51  ;;  %v791_v13 = vadd.f32 %v783_v33, %v763_v19  ;;  %v3484_v31 = vmul.f32 %v3432_v63, %v3359_v0  ;;  %v540_v30 = vadd.f32 %v532_v57, %v512_v25 }
  0x30   : > { %v652_v46 = vadd.f32 %v644_v18, %v624_v5  ;;  %v589_v27 = vmul.f32 %v3392_v37, %v3306_v32  ;;  %v3490_v59 = vmul.f32 %v3434_v11, %v3362_v1  ;;  %v3494_v48 = vmul.f32 %v3446_v8, %v3365_v3  ;;  %v3500_v18 = vld [vmem:[#allocation2 + $0x50] sm:$0xff] }
  0x31   : > { %v819_v33 = vadd.f32 %v811_v34, %v791_v13  ;;  %v3498_v5 = vmul.f32 %v3448_v7, %v3368_v4  ;;  %v3504_v57 = vmul.f32 %v3371_v10, %v3500_v18  ;;  %v3506_v34 = vld [vmem:[#allocation2 + $0x51] sm:$0xff]  ;;  %v568_v19 = vadd.f32 %v560_v6, %v540_v30 }
  0x32   : > { %4521 = vst [vmem:[#allocation19_spill] sm:$0xff] %v3490_v59  ;;  %4522 = vst [vmem:[#allocation20_spill] sm:$0xff] %v3494_v48  ;;  %v680_v12 = vadd.f32 %v672_v47, %v652_v46  ;;  %v617_v25 = vmul.f32 %v3398_v41, %v3311_v35  ;;  %v3513_v48 = vmul.f32 %v3376_v20, %v3506_v34 }
  0x33   : > { %4523 = vst [vmem:[#allocation21_spill] sm:$0xff] %v3498_v5  ;;  %4524 = vst [vmem:[#allocation22_spill] sm:$0xff] %v3504_v57  ;;  %v847_v13 = vadd.f32 %v3390_v36, %v819_v33  ;;  %v449_v5 = vmul.f32 %v3392_v37, %v3278_v14  ;;  %v477_v47 = vmul.f32 %v3398_v41, %v3281_v15  ;;  %v3519_v57 = vld [vmem:[#allocation2 + $0x52] sm:$0xff] }
  0x34   : > { %4525 = vst [vmem:[#allocation23_spill] sm:$0xff] %v3513_v48  ;;  %v708_v46 = vadd.f32 %v700_v58, %v680_v12  ;;  %v597_v59 = vadd.f32 %v589_v27, %v568_v19  ;;  %v645_v6 = vmul.f32 %v3400_v43, %v3320_v39  ;;  %v505_v36 = vmul.f32 %v3400_v43, %v3284_v16  ;;  %v3530_v37 = vld [vmem:[#allocation2 + $0x53] sm:$0xff] }
  0x35   : > { %v876_v30 = vadd.f32 %v3396_v38, %v847_v13  ;;  %v3528_v33 = vmul.f32 %v3379_v21, %v3519_v57  ;;  %v485_v48 = vadd.f32 %v477_v47, %v449_v5  ;;  %v533_v41 = vmul.f32 %v3402_v44, %v3290_v17  ;;  %v3538_v12 = vld [vmem:[#allocation2 + $0x54] sm:$0xff] }
  0x36   : > { %v736_v58 = vadd.f32 %v728_v23, %v708_v46  ;;  %v3536_v27 = vmul.f32 %v3382_v22, %v3530_v37  ;;  %v625_v43 = vadd.f32 %v617_v25, %v597_v59  ;;  %v673_v38 = vmul.f32 %v3402_v44, %v3323_v40 }
  0x37   : > { %v904_v19 = vadd.f32 %v3410_v54, %v876_v30  ;;  %v3545_v13 = vmul.f32 %v3405_v45, %v3538_v12  ;;  %v513_v5 = vadd.f32 %v505_v36, %v485_v48  ;;  %v561_v23 = vmul.f32 %v3420_v62, %v3302_v28 }
  0x38   : > { %4526 = vst [vmem:[#allocation24_spill] sm:$0xff] %v3536_v27  ;;  %v764_v47 = vadd.f32 %v756_v29, %v736_v58  ;;  %v653_v46 = vadd.f32 %v645_v6, %v625_v43  ;;  %v701_v27 = vmul.f32 %v3420_v62, %v3326_v42  ;;  %v729_v59 = vmul.f32 %v3422_v53, %v3333_v49 }
  0x39   : > { %v932_v44 = vadd.f32 %v3414_v55, %v904_v19  ;;  %v757_v54 = vmul.f32 %v3432_v63, %v3336_v50  ;;  %v541_v25 = vadd.f32 %v533_v41, %v513_v5  ;;  %v590_v48 = vmul.f32 %v3422_v53, %v3306_v32  ;;  %v4527_v5 = vld [vmem:[#allocation13_spill] sm:$0xff] }
  0x3a   : > { %v792_v36 = vadd.f32 %v784_v2, %v764_v47  ;;  %v681_v30 = vadd.f32 %v673_v38, %v653_v46  ;;  %v785_v29 = vmul.f32 %v3434_v11, %v3339_v51  ;;  %v813_v62 = vmul.f32 %v3446_v8, %v3342_v52 }
  0x3b   : > { %v960_v6 = vadd.f32 %v3418_v56, %v932_v44  ;;  %v841_v55 = vmul.f32 %v3448_v7, %v3352_v60  ;;  %v569_v58 = vadd.f32 %v561_v23, %v541_v25  ;;  %v618_v41 = vmul.f32 %v3432_v63, %v3311_v35 }
  0x3c   : > { %v820_v43 = vadd.f32 %v812_v9, %v792_v36  ;;  %v709_v19 = vadd.f32 %v701_v27, %v681_v30  ;;  %v870_v2 = vmul.f32 %v3500_v18, %v3355_v61  ;;  %v898_v38 = vmul.f32 %v3506_v34, %v3359_v0  ;;  %v4528_v36 = vld [vmem:[#allocation14_spill] sm:$0xff] }
  0x3d   : > { %v988_v47 = vadd.f32 %v4527_v5, %v960_v6  ;;  %v3574_v56 = vmul.f32 %v3519_v57, %v3362_v1  ;;  %v598_v46 = vadd.f32 %v590_v48, %v569_v58  ;;  %v646_v23 = vmul.f32 %v3434_v11, %v3320_v39 }
  0x3e   : > { %v848_v44 = vadd.f32 %v3476_v24, %v820_v43  ;;  %v737_v9 = vadd.f32 %v729_v59, %v709_v19  ;;  %v3581_v27 = vmul.f32 %v3530_v37, %v3365_v3  ;;  %v3585_v25 = vmul.f32 %v3538_v12, %v3368_v4  ;;  %v3593_v43 = vld [vmem:[#allocation2 + $0x60] sm:$0xff] }
  0x3f   : > { %v1017_v30 = vadd.f32 %v4528_v36, %v988_v47  ;;  %v626_v6 = vadd.f32 %v618_v41, %v598_v46  ;;  %v674_v48 = vmul.f32 %v3446_v8, %v3323_v40  ;;  %v450_v58 = vmul.f32 %v3422_v53, %v3278_v14  ;;  %v4529_v4 = vld [vmem:[#allocation15_spill] sm:$0xff] }
  0x40   : > { %v877_v24 = vadd.f32 %v3480_v26, %v848_v44  ;;  %v765_v59 = vadd.f32 %v757_v54, %v737_v9  ;;  %v478_v19 = vmul.f32 %v3432_v63, %v3281_v15  ;;  %v506_v5 = vmul.f32 %v3434_v11, %v3284_v16  ;;  %v3607_v44 = vld [vmem:[#allocation2 + $0x61] sm:$0xff] }
  0x41   : > { %v1045_v47 = vadd.f32 %v4529_v4, %v1017_v30  ;;  %v3602_v41 = vmul.f32 %v3371_v10, %v3593_v43  ;;  %v654_v46 = vadd.f32 %v646_v23, %v626_v6  ;;  %v702_v53 = vmul.f32 %v3448_v7, %v3326_v42  ;;  %v4530_v11 = vld [vmem:[#allocation16_spill] sm:$0xff]  ;;  %v4531_v6 = vld [vmem:[#allocation19_spill] sm:$0xff] }
  0x42   : > { %v905_v26 = vadd.f32 %v3484_v31, %v877_v24  ;;  %v793_v54 = vadd.f32 %v785_v29, %v765_v59  ;;  %v486_v9 = vadd.f32 %v478_v19, %v450_v58  ;;  %v534_v63 = vmul.f32 %v3446_v8, %v3290_v17  ;;  %v3619_v29 = vld [vmem:[#allocation2 + $0x62] sm:$0xff]  ;;  %v4532_v8 = vld [vmem:[#allocation17_spill] sm:$0xff] }
  0x43   : > { %v1073_v36 = vadd.f32 %v4530_v11, %v1045_v47  ;;  %v3614_v4 = vmul.f32 %v3376_v20, %v3607_v44  ;;  %v682_v30 = vadd.f32 %v674_v48, %v654_v46  ;;  %v730_v23 = vmul.f32 %v3500_v18, %v3333_v49  ;;  %v4533_v46 = vld [vmem:[#allocation20_spill] sm:$0xff]  ;;  %v4534_v11 = vld [vmem:[#allocation18_spill] sm:$0xff] }
  0x44   : > { %v933_v10 = vadd.f32 %v4531_v6, %v905_v26  ;;  %v821_v31 = vadd.f32 %v813_v62, %v793_v54  ;;  %v514_v24 = vadd.f32 %v506_v5, %v486_v9  ;;  %v562_v58 = vmul.f32 %v3448_v7, %v3302_v28  ;;  %v3633_v62 = vld [vmem:[%s4454_s2] ss:$0 sm:$0xff]  ;;  %v3636_v54 = vld [vmem:[#allocation2 + $0x63] sm:$0xff] }
  0x45   : > { %v1101_v59 = vadd.f32 %v4532_v8, %v1073_v36  ;;  %v3626_v19 = vmul.f32 %v3379_v21, %v3619_v29  ;;  %v710_v47 = vadd.f32 %v702_v53, %v682_v30  ;;  %v758_v48 = vmul.f32 %v3506_v34, %v3336_v50  ;;  %v4535_v8 = vld [vmem:[#allocation21_spill] sm:$0xff] }
  0x46   : > { %v961_v5 = vadd.f32 %v4533_v46, %v933_v10  ;;  %v849_v26 = vadd.f32 %v841_v55, %v821_v31  ;;  %v542_v7 = vadd.f32 %v534_v63, %v514_v24  ;;  %v591_v9 = vmul.f32 %v3500_v18, %v3306_v32  ;;  %v3648_v55 = vld [vmem:[#allocation2 + $0x64] sm:$0xff] }
  0x47   : > { %v1129_v36 = vadd.f32 %v4534_v11, %v1101_v59  ;;  %v3643_v53 = vmul.f32 %v3382_v22, %v3636_v54  ;;  %v738_v30 = vadd.f32 %v730_v23, %v710_v47  ;;  %v786_v6 = vmul.f32 %v3519_v57, %v3339_v51  ;;  %v4536_v47 = vld [vmem:[#allocation22_spill] sm:$0xff] }
  0x48   : > { %v989_v21 = vadd.f32 %v4535_v8, %v961_v5  ;;  %v878_v10 = vadd.f32 %v870_v2, %v849_v26  ;;  %v570_v31 = vadd.f32 %v562_v58, %v542_v7  ;;  %v619_v63 = vmul.f32 %v3506_v34, %v3311_v35  ;;  %v4537_v8 = vld [vmem:[#allocation23_spill] sm:$0xff] }
  0x49   : > { %v1143_v24 = vadd.f32 %v3633_v62, %v1129_v36  ;;  %v3655_v59 = vmul.f32 %v3405_v45, %v3648_v55  ;;  %v766_v46 = vadd.f32 %v758_v48, %v738_v30  ;;  %v814_v23 = vmul.f32 %v3530_v37, %v3342_v52 }
  0x4a   : > { %v1018_v11 = vadd.f32 %v4536_v47, %v989_v21  ;;  %v906_v5 = vadd.f32 %v898_v38, %v878_v10  ;;  %v599_v2 = vadd.f32 %v591_v9, %v570_v31  ;;  %v647_v58 = vmul.f32 %v3519_v57, %v3320_v39 }
  0x4b   : > { %vm1151_vm2 = vcmp.gt.f32.partialorder %v1143_v24, 0.0  ;;  %v1159_v26 = vmul.f32 0.25, %v1143_v24  ;;  %v794_v7 = vadd.f32 %v786_v6, %v766_v46  ;;  %v842_v36 = vmul.f32 %v3538_v12, %v3352_v60 }
  0x4c   : > { %v1046_v45 = vadd.f32 %v4537_v8, %v1018_v11  ;;  %v934_v48 = vadd.f32 %v3574_v56, %v906_v5  ;;  %v627_v30 = vadd.f32 %v619_v63, %v599_v2  ;;  %v675_v22 = vmul.f32 %v3530_v37, %v3323_v40  ;;  %v4538_v11 = vld [vmem:[#allocation24_spill] sm:$0xff] }
  0x4d   : > { %v1167_v21 = vsel %vm1151_vm2, %v1143_v24, %v1159_v26  ;;  %v822_v38 = vadd.f32 %v814_v23, %v794_v7  ;;  %v871_v9 = vmul.f32 %v3593_v43, %v3355_v61  ;;  %v899_v10 = vmul.f32 %v3607_v44, %v3359_v0 }
  0x4e   : > { %3034 = vmatprep.mubr.msk.f32.mxu0 %vm385_vm0, %v1167_v21  ;;  %v1074_v6 = vadd.f32 %v3528_v33, %v1046_v45  ;;  %v962_v31 = vadd.f32 %v3581_v27, %v934_v48  ;;  %v655_v46 = vadd.f32 %v647_v58, %v627_v30  ;;  %v703_v56 = vmul.f32 %v3538_v12, %v3326_v42  ;;  %v4539_v48 = vld [vmem:[#allocation8_spill] sm:$0xff] }
  0x4f   : > { %v850_v63 = vadd.f32 %v842_v36, %v822_v38  ;;  %v927_v24 = vmul.f32 %v3619_v29, %v3362_v1  ;;  %v731_v23 = vmul.f32 %v3593_v43, %v3333_v49  ;;  %v451_v47 = vmul.f32 %v3500_v18, %v3278_v14 }
  0x50   : > { %v1102_v5 = vadd.f32 %v4538_v11, %v1074_v6  ;;  %v990_v45 = vadd.f32 %v3585_v25, %v962_v31  ;;  %v683_v33 = vadd.f32 %v675_v22, %v655_v46  ;;  %v479_v27 = vmul.f32 %v3506_v34, %v3281_v15 }
  0x51   : > { %v879_v2 = vadd.f32 %v871_v9, %v850_v63  ;;  %v955_v58 = vmul.f32 %v3636_v54, %v3365_v3  ;;  %v759_v26 = vmul.f32 %v3607_v44, %v3336_v50  ;;  %v507_v7 = vmul.f32 %v3519_v57, %v3284_v16  ;;  %v3703_v9 = vld [vmem:[#allocation2 + $0x70] sm:$0xff] }
  0x52   : > { %v1130_v18 = vadd.f32 %v3545_v13, %v1102_v5  ;;  %v1019_v36 = vadd.f32 %v3602_v41, %v990_v45  ;;  %v711_v8 = vadd.f32 %v703_v56, %v683_v33  ;;  %v487_v25 = vadd.f32 %v479_v27, %v451_v47  ;;  %v3712_v47 = vld [vmem:[#allocation2 + $0x71] sm:$0xff] }
  0x53   : > { %v907_v22 = vadd.f32 %v899_v10, %v879_v2  ;;  %v983_v34 = vmul.f32 %v3648_v55, %v4539_v48  ;;  %v787_v30 = vmul.f32 %v3619_v29, %v3339_v51  ;;  %v535_v21 = vmul.f32 %v3530_v37, %v3290_v17  ;;  %v4540_v10 = vld [vmem:[#allocation9_spill] sm:$0xff] }
  0x54   : > { %v1144_v38 = vadd.f32 %v3633_v62, %v1130_v18  ;;  %v1047_v57 = vadd.f32 %v3614_v4, %v1019_v36  ;;  %v739_v13 = vadd.f32 %v731_v23, %v711_v8  ;;  %v515_v41 = vadd.f32 %v507_v7, %v487_v25  ;;  %v3719_v27 = vld [vmem:[#allocation2 + $0x72] sm:$0xff]  ;;  %v4542_v8 = vld [vmem:[#allocation11_spill] sm:$0xff] }
  0x55   : > { %v935_v6 = vadd.f32 %v927_v24, %v907_v22  ;;  %v1012_v31 = vmul.f32 %v4540_v10, %v3703_v9  ;;  %v815_v46 = vmul.f32 %v3636_v54, %v3342_v52  ;;  %v563_v56 = vmul.f32 %v3538_v12, %v3302_v28  ;;  %v3726_v7 = vld [vmem:[#allocation2 + $0x73] sm:$0xff] }
  0x56   : > { %vm1152_vm3 = vcmp.gt.f32.partialorder %v1144_v38, 0.0  ;;  %v1160_v37 = vmul.f32 0.25, %v1144_v38  ;;  %v1075_v63 = vadd.f32 %v3626_v19, %v1047_v57  ;;  %v767_v4 = vadd.f32 %v759_v26, %v739_v13  ;;  %v3733_v22 = vld [vmem:[#allocation2 + $0x74] sm:$0xff] }
  0x57   : > { %v963_v11 = vadd.f32 %v955_v58, %v935_v6  ;;  %v1040_v24 = vmul.f32 %v3376_v20, %v3712_v47  ;;  %v543_v23 = vadd.f32 %v535_v21, %v515_v41  ;;  %v592_v5 = vmul.f32 %v3593_v43, %v3306_v32  ;;  %v4541_v58 = vld [vmem:[#allocation10_spill] sm:$0xff] }
  0x58   : > { %v1168_v45 = vsel %vm1152_vm3, %v1144_v38, %v1160_v37  ;;  %v1103_v33 = vadd.f32 %v3643_v53, %v1075_v63  ;;  %v795_v12 = vadd.f32 %v787_v30, %v767_v4  ;;  %v843_v19 = vmul.f32 %v3648_v55, %v3352_v60  ;;  %v4543_v38 = vld [vmem:[#allocation12_spill] sm:$0xff] }
  0x59   : > { %3035 = vmatmul.mubr.msk.f32.vlgmr.msra.gmra.mrb[0].mxu0 %vm385_vm0, %v1168_v45  ;;  %v991_v2 = vadd.f32 %v983_v34, %v963_v11  ;;  %v1068_v26 = vmul.f32 %v4541_v58, %v3719_v27  ;;  %v571_v18 = vadd.f32 %v563_v56, %v543_v23  ;;  %v620_v36 = vmul.f32 %v3607_v44, %v3311_v35 }
  0x5a   : > { %v1131_v53 = vadd.f32 %v3655_v59, %v1103_v33  ;;  %v1096_v25 = vmul.f32 %v4542_v8, %v3726_v7  ;;  %v823_v30 = vadd.f32 %v815_v46, %v795_v12  ;;  %v872_v34 = vmul.f32 %v3703_v9, %v3355_v61 }
  0x5b   : > { %v1020_v21 = vadd.f32 %v1012_v31, %v991_v2  ;;  %v1124_v57 = vmul.f32 %v4543_v38, %v3733_v22  ;;  %v600_v13 = vadd.f32 %v592_v5, %v571_v18  ;;  %v648_v41 = vmul.f32 %v3619_v29, %v3320_v39 }
  0x5c   : > { %v1145_v6 = vadd.f32 %v3633_v62, %v1131_v53  ;;  %v851_v59 = vadd.f32 %v843_v19, %v823_v30  ;;  %v900_v56 = vmul.f32 %v3712_v47, %v3359_v0  ;;  %v928_v46 = vmul.f32 %v3719_v27, %v3362_v1 }
  0x5d   : > { %v1048_v37 = vadd.f32 %v1040_v24, %v1020_v21  ;;  %v956_v31 = vmul.f32 %v3726_v7, %v3365_v3  ;;  %v628_v63 = vadd.f32 %v620_v36, %v600_v13  ;;  %v676_v4 = vmul.f32 %v3636_v54, %v3323_v40 }
  0x5e   : > { %vm1153_vm4 = vcmp.gt.f32.partialorder %v1145_v6, 0.0  ;;  %v1161_v11 = vmul.f32 0.25, %v1145_v6  ;;  %v880_v23 = vadd.f32 %v872_v34, %v851_v59  ;;  %v704_v5 = vmul.f32 %v3648_v55, %v3326_v42 }
  0x5f   : > { %v1076_v45 = vadd.f32 %v1068_v26, %v1048_v37  ;;  %v656_v33 = vadd.f32 %v648_v41, %v628_v63  ;;  %v452_v12 = vmul.f32 %v3593_v43, %v3278_v14  ;;  %v480_v24 = vmul.f32 %v3607_v44, %v3281_v15  ;;  %v1001_v41 = vld [vmem:[#allocation2 + $0x80] sm:$0xff] }
  0x60   : > { %v1169_v19 = vsel %vm1153_vm4, %v1145_v6, %v1161_v11  ;;  %v908_v2 = vadd.f32 %v900_v56, %v880_v23  ;;  %v732_v18 = vmul.f32 %v3703_v9, %v3333_v49  ;;  %v508_v36 = vmul.f32 %v3619_v29, %v3284_v16  ;;  %v3773_v37 = vld [vmem:[#allocation2 + $0x81] sm:$0xff] }
  0x61   : > { %3037 = vmatprep.mubr.msk.f32.mxu0 %vm385_vm0, %v1169_v19  ;;  %v1104_v53 = vadd.f32 %v1096_v25, %v1076_v45  ;;  %v684_v30 = vadd.f32 %v676_v4, %v656_v33  ;;  %v488_v26 = vadd.f32 %v480_v24, %v452_v12  ;;  %v536_v34 = vmul.f32 %v3636_v54, %v3290_v17  ;;  %v1057_v45 = vld [vmem:[#allocation2 + $0x82] sm:$0xff] }
  0x62   : > { %v936_v43 = vadd.f32 %v928_v46, %v908_v2  ;;  %v984_v44 = vmul.f32 %v3733_v22, %v4539_v48  ;;  %v760_v21 = vmul.f32 %v3712_v47, %v3336_v50  ;;  %v564_v29 = vmul.f32 %v3648_v55, %v3302_v28 }
  0x63   : > { %v1132_v13 = vadd.f32 %v1124_v57, %v1104_v53  ;;  %v712_v6 = vadd.f32 %v704_v5, %v684_v30  ;;  %v516_v59 = vadd.f32 %v508_v36, %v488_v26  ;;  %v1013_v56 = vmul.f32 %v4540_v10, %v1001_v41  ;;  %v1085_v36 = vld [vmem:[#allocation2 + $0x83] sm:$0xff] }
  0x64   : > { %v964_v25 = vadd.f32 %v956_v31, %v936_v43  ;;  %v788_v54 = vmul.f32 %v3719_v27, %v3339_v51  ;;  %v593_v57 = vmul.f32 %v3703_v9, %v3306_v32  ;;  %v1041_v23 = vmul.f32 %v3376_v20, %v3773_v37  ;;  %v3786_v53 = vld [vmem:[#allocation2 + $0x84] sm:$0xff] }
  0x65   : > { %v1146_v46 = vadd.f32 %v3633_v62, %v1132_v13  ;;  %v740_v63 = vadd.f32 %v732_v18, %v712_v6  ;;  %v544_v4 = vadd.f32 %v536_v34, %v516_v59  ;;  %v816_v55 = vmul.f32 %v3726_v7, %v3342_v52 }
  0x66   : > { %v992_v11 = vadd.f32 %v984_v44, %v964_v25  ;;  %v621_v31 = vmul.f32 %v3712_v47, %v3311_v35  ;;  %v1069_v19 = vmul.f32 %v4541_v58, %v1057_v45  ;;  %v844_v2 = vmul.f32 %v3733_v22, %v3352_v60 }
  0x67   : > { %vm1154_vm5 = vcmp.gt.f32.partialorder %v1146_v46, 0.0  ;;  %v1162_v5 = vmul.f32 0.25, %v1146_v46  ;;  %v768_v33 = vadd.f32 %v760_v21, %v740_v63  ;;  %v572_v12 = vadd.f32 %v564_v29, %v544_v4 }
  0x68   : > { %v1021_v24 = vadd.f32 %v1013_v56, %v992_v11  ;;  %v649_v34 = vmul.f32 %v3719_v27, %v3320_v39  ;;  %v1097_v44 = vmul.f32 %v4542_v8, %v1085_v36  ;;  %v1125_v21 = vmul.f32 %v4543_v38, %v3786_v53 }
  0x69   : > { %v1170_v18 = vsel %vm1154_vm5, %v1146_v46, %v1162_v5  ;;  %v796_v30 = vadd.f32 %v788_v54, %v768_v33  ;;  %v601_v26 = vadd.f32 %v593_v57, %v572_v12  ;;  %v873_v6 = vmul.f32 %v1001_v41, %v3355_v61 }
  0x6a   : > { %3038 = vmatmul.mubr.msk.f32.gmra.mrb[2].mxu0 %vm385_vm0, %v1170_v18  ;;  %v1049_v43 = vadd.f32 %v1041_v23, %v1021_v24  ;;  %v677_v29 = vmul.f32 %v3726_v7, %v3323_v40  ;;  %v453_v56 = vmul.f32 %v3703_v9, %v3278_v14  ;;  %v481_v54 = vmul.f32 %v3712_v47, %v3281_v15 }
  0x6b   : > { %v824_v13 = vadd.f32 %v816_v55, %v796_v30  ;;  %v629_v59 = vadd.f32 %v621_v31, %v601_v26  ;;  %v509_v46 = vmul.f32 %v3719_v27, %v3284_v16  ;;  %v901_v4 = vmul.f32 %v3773_v37, %v3359_v0 }
  0x6c   : > { %v1077_v25 = vadd.f32 %v1069_v19, %v1049_v43  ;;  %v705_v11 = vmul.f32 %v3733_v22, %v3326_v42  ;;  %v489_v55 = vadd.f32 %v481_v54, %v453_v56  ;;  %v537_v31 = vmul.f32 %v3726_v7, %v3290_v17 }
  0x6d   : > { %v852_v63 = vadd.f32 %v844_v2, %v824_v13  ;;  %v657_v57 = vadd.f32 %v649_v34, %v629_v59  ;;  %v929_v9 = vmul.f32 %v1057_v45, %v3362_v1  ;;  %v733_v47 = vmul.f32 %v1001_v41, %v3333_v49  ;;  %v1030_v59 = vld [vmem:[#allocation2 + $0x91] sm:$0xff] }
  0x6e   : > { %v1105_v23 = vadd.f32 %v1097_v44, %v1077_v25  ;;  %v517_v27 = vadd.f32 %v509_v46, %v489_v55  ;;  %v565_v5 = vmul.f32 %v3733_v22, %v3302_v28  ;;  %v957_v12 = vmul.f32 %v1085_v36, %v3365_v3  ;;  %v1002_v22 = vld [vmem:[#allocation2 + $0x90] sm:$0xff] }
  0x6f   : > { %v881_v14 = vadd.f32 %v873_v6, %v852_v63  ;;  %v685_v15 = vadd.f32 %v677_v29, %v657_v57  ;;  %v761_v19 = vmul.f32 %v3773_v37, %v3336_v50  ;;  %v594_v2 = vmul.f32 %v1001_v41, %v3306_v32 }
  0x70   : > { %v1133_v16 = vadd.f32 %v1125_v21, %v1105_v23  ;;  %v545_v7 = vadd.f32 %v537_v31, %v517_v27  ;;  %v985_v30 = vmul.f32 %v3786_v53, %v4539_v48  ;;  %v789_v34 = vmul.f32 %v1057_v45, %v3339_v51 }
  0x71   : > { %v909_v33 = vadd.f32 %v901_v4, %v881_v14  ;;  %v713_v24 = vadd.f32 %v705_v11, %v685_v15  ;;  %v622_v44 = vmul.f32 %v3773_v37, %v3311_v35  ;;  %v1014_v13 = vmul.f32 %v4540_v10, %v1002_v22  ;;  %v1058_v37 = vld [vmem:[#allocation2 + $0x92] sm:$0xff] }
  0x72   : > { %v1147_v17 = vadd.f32 %v3633_v62, %v1133_v16  ;;  %v573_v43 = vadd.f32 %v565_v5, %v545_v7  ;;  %v817_v32 = vmul.f32 %v1085_v36, %v3342_v52  ;;  %v650_v25 = vmul.f32 %v1057_v45, %v3320_v39  ;;  %v1086_v39 = vld [vmem:[#allocation2 + $0x93] sm:$0xff] }
  0x73   : > { %v937_v18 = vadd.f32 %v929_v9, %v909_v33  ;;  %v741_v26 = vadd.f32 %v733_v47, %v713_v24  ;;  %v1042_v54 = vmul.f32 %v3376_v20, %v1030_v59  ;;  %v845_v35 = vmul.f32 %v3786_v53, %v3352_v60  ;;  %v1114_v16 = vld [vmem:[#allocation2 + $0x94] sm:$0xff] }
  0x74   : > { %vm1155_vm6 = vcmp.gt.f32.partialorder %v1147_v17, 0.0  ;;  %v1163_v28 = vmul.f32 0.25, %v1147_v17  ;;  %v602_v29 = vadd.f32 %v594_v2, %v573_v43  ;;  %v678_v4 = vmul.f32 %v1085_v36, %v3323_v40 }
  0x75   : > { %v965_v21 = vadd.f32 %v957_v12, %v937_v18  ;;  %v769_v6 = vadd.f32 %v761_v19, %v741_v26  ;;  %v1070_v11 = vmul.f32 %v4541_v58, %v1058_v37  ;;  %v874_v55 = vmul.f32 %v1002_v22, %v3355_v61  ;;  %v1003_v26 = vld [vmem:[#allocation2 + $0xa0] sm:$0xff] }
  0x76   : > { %v1171_v41 = vsel %vm1155_vm6, %v1147_v17, %v1163_v28  ;;  %v630_v63 = vadd.f32 %v622_v44, %v602_v29  ;;  %v706_v31 = vmul.f32 %v3786_v53, %v3326_v42  ;;  %v1098_v9 = vmul.f32 %v4542_v8, %v1086_v39  ;;  %v1031_v44 = vld [vmem:[#allocation2 + $0xa1] sm:$0xff] }
  0x77   : > { %3040 = vmatprep.mubr.msk.f32.mxu0 %vm385_vm0, %v1171_v41  ;;  %v993_v56 = vadd.f32 %v985_v30, %v965_v21  ;;  %v797_v46 = vadd.f32 %v789_v34, %v769_v6  ;;  %v902_v47 = vmul.f32 %v1030_v59, %v3359_v0  ;;  %v734_v40 = vmul.f32 %v1002_v22, %v3333_v49  ;;  %v1059_v41 = vld [vmem:[#allocation2 + $0xa2] sm:$0xff] }
  0x78   : > { %v658_v45 = vadd.f32 %v650_v25, %v630_v63  ;;  %v1126_v5 = vmul.f32 %v4543_v38, %v1114_v16  ;;  %v930_v12 = vmul.f32 %v1058_v37, %v3362_v1  ;;  %v762_v19 = vmul.f32 %v1030_v59, %v3336_v50  ;;  %v1115_v63 = vld [vmem:[#allocation2 + $0xa4] sm:$0xff] }
  0x79   : > { %v1022_v57 = vadd.f32 %v1014_v13, %v993_v56  ;;  %v825_v23 = vadd.f32 %v817_v32, %v797_v46  ;;  %v958_v17 = vmul.f32 %v1086_v39, %v3365_v3  ;;  %v790_v2 = vmul.f32 %v1058_v37, %v3339_v51 }
  0x7a   : > { %v686_v27 = vadd.f32 %v678_v4, %v658_v45  ;;  %v986_v49 = vmul.f32 %v1114_v16, %v4539_v48  ;;  %v818_v28 = vmul.f32 %v1086_v39, %v3342_v52  ;;  %v1015_v50 = vmul.f32 %v4540_v10, %v1003_v26  ;;  %v1004_v45 = vld [vmem:[#allocation2 + $0xb0] sm:$0xff] }
  0x7b   : > { %v1050_v14 = vadd.f32 %v1042_v54, %v1022_v57  ;;  %v853_v15 = vadd.f32 %v845_v35, %v825_v23  ;;  %v846_v13 = vmul.f32 %v1114_v16, %v3352_v60  ;;  %v1043_v32 = vmul.f32 %v3376_v20, %v1031_v44  ;;  %v1087_v54 = vld [vmem:[#allocation2 + $0xa3] sm:$0xff] }
  0x7c   : > { %v714_v24 = vadd.f32 %v706_v31, %v686_v27  ;;  %v875_v29 = vmul.f32 %v1003_v26, %v3355_v61  ;;  %v1071_v56 = vmul.f32 %v4541_v58, %v1059_v41  ;;  %v903_v35 = vmul.f32 %v1031_v44, %v3359_v0  ;;  %v1032_v0 = vld [vmem:[#allocation2 + $0xb1] sm:$0xff]  ;;  %v1350_v26 = vld [vmem:[#allocation2] sm:$0xff] }
  0x7d   : > { %v1078_v36 = vadd.f32 %v1070_v11, %v1050_v14  ;;  %v882_v33 = vadd.f32 %v874_v55, %v853_v15  ;;  %v1099_v37 = vmul.f32 %v4542_v8, %v1087_v54  ;;  %v931_v57 = vmul.f32 %v1059_v41, %v3362_v1  ;;  %v1060_v27 = vld [vmem:[#allocation2 + $0xb2] sm:$0xff]  ;;  %v1406_v44 = vld [vmem:[#allocation2 + $0x2] sm:$0xff] }
  0x7e   : > { %v742_v7 = vadd.f32 %v734_v40, %v714_v24  ;;  %v1127_v61 = vmul.f32 %v4543_v38, %v1115_v63  ;;  %v959_v55 = vmul.f32 %v1087_v54, %v3365_v3  ;;  %v987_v14 = vmul.f32 %v1115_v63, %v4539_v48  ;;  %v1116_v24 = vld [vmem:[#allocation2 + $0xb4] sm:$0xff] }
  0x7f   : > { %v1106_v42 = vadd.f32 %v1098_v9, %v1078_v36  ;;  %v910_v53 = vadd.f32 %v902_v47, %v882_v33  ;;  %v1016_v47 = vmul.f32 %v4540_v10, %v1004_v45  ;;  %v1044_v40 = vmul.f32 %v3376_v20, %v1032_v0 }
  0x80   : > { %v770_v34 = vadd.f32 %v762_v19, %v742_v7  ;;  %v1072_v33 = vmul.f32 %v4541_v58, %v1060_v27  ;;  %v2088_v58 = vld [vmem:[%s4459_s7] sm:$0xff]  ;;  %v1574_v27 = vld [vmem:[#allocation2 + $0x13] sm:$0xff] }
  0x81   : > { %v1134_v18 = vadd.f32 %v1126_v5, %v1106_v42  ;;  %v938_v30 = vadd.f32 %v930_v12, %v910_v53  ;;  %v1088_v5 = vld [vmem:[#allocation2 + $0xb3] sm:$0xff]  ;;  %v1128_v42 = vmul.f32 %v4543_v38, %v1116_v24  ;;  %3046 = vmatprep.subr.mxu1 %v2088_v58  ;;  %v4545_v38 = vld [vmem:[#allocation3_spill] sm:$0xff] }
  0x82   : > { %v798_v21 = vadd.f32 %v790_v2, %v770_v34  ;;  %v1100_v19 = vmul.f32 %v4542_v8, %v1088_v5  ;;  %3047 = vmatpush3.msra.mxu1 %v2088_v58  ;;  %v1336_v8 = vld [vmem:[%s4457_s5] sm:$0x1f] }
  0x83   : > { %v1148_v22 = vadd.f32 %v3633_v62, %v1134_v18  ;;  %v966_v43 = vadd.f32 %v958_v17, %v938_v30  ;;  %v4544_v18 = vmov 0.0   ;;  %v3875_v30 = vrot.slane %v1336_v8, %v4545_v38  ;;  %v1378_v34 = vld [vmem:[#allocation2 + $0x1] sm:$0xff] }
  0x84   : > { %v826_v59 = vadd.f32 %v818_v28, %v798_v21  ;;  %3065 = vmatprep.subr.mxu1 %v4544_v18 }
  0x85   : > { %vm1156_vm7 = vcmp.gt.f32.partialorder %v1148_v22, 0.0  ;;  %v1164_v6 = vmul.f32 0.25, %v1148_v22  ;;  %v994_v51 = vadd.f32 %v986_v49, %v966_v43  ;;  %v1362_v28 = vmul.f32 %v3875_v30, %v1350_v26  ;;  %v4547_v43 = vld [vmem:[#allocation5_spill] sm:$0xff] }
  0x86   : > { %v854_v46 = vadd.f32 %v846_v13, %v826_v59 }
  0x87   : > { %v1172_v25 = vsel %vm1156_vm7, %v1148_v22, %v1164_v6  ;;  %v1023_v52 = vadd.f32 %v1015_v50, %v994_v51  ;;  %v3883_v50 = vrot.slane %v1336_v8, %v4547_v43  ;;  %v4548_v6 = vld [vmem:[#allocation6_spill] sm:$0xff] }
  0x88   : > { %3041 = vmatmul.mubr.msk.f32.gmra.mrb[4].mxu0 %vm385_vm0, %v1172_v25  ;;  %v883_v4 = vadd.f32 %v875_v29, %v854_v46  ;;  %v3887_v51 = vrot.slane %v1336_v8, %v4548_v6  ;;  %v4549_v29 = vld [vmem:[#allocation7_spill] sm:$0xff] }
  0x89   : > { %v1051_v60 = vadd.f32 %v1043_v32, %v1023_v52  ;;  %v1418_v13 = vmul.f32 %v3883_v50, %v1406_v44  ;;  %v1434_v32 = vld [vmem:[#allocation2 + $0x3] sm:$0xff]  ;;  %v3891_v25 = vrot.slane %v1336_v8, %v4549_v29 }
  0x8a   : > { %v911_v23 = vadd.f32 %v903_v35, %v883_v4  ;;  %v1446_v59 = vmul.f32 %v3887_v51, %v1434_v32  ;;  %v1337_v52 = vld [vmem:[%s4457_s5 + $0x8] sm:$0x1f] }
  0x8b   : > { %v1079_v11 = vadd.f32 %v1071_v56, %v1051_v60  ;;  %v1462_v56 = vld [vmem:[#allocation2 + $0x4] sm:$0xff]  ;;  %v3898_v35 = vrot.slane %v1337_v52, %v4545_v38  ;;  %v1490_v60 = vld [vmem:[#allocation2 + $0x10] sm:$0xff] }
  0x8c   : > { %v939_v31 = vadd.f32 %v931_v57, %v911_v23  ;;  %v1474_v46 = vmul.f32 %v3891_v25, %v1462_v56  ;;  %v1518_v57 = vld [vmem:[#allocation2 + $0x11] sm:$0xff]  ;;  %v3906_v23 = vrot.slane %v1337_v52, %v4547_v43 }
  0x8d   : > { %v1107_v39 = vadd.f32 %v1099_v37, %v1079_v11  ;;  %v1502_v63 = vmul.f32 %v3898_v35, %v1490_v60 }
  0x8e   : > { %v967_v15 = vadd.f32 %v959_v55, %v939_v31  ;;  %v1546_v55 = vld [vmem:[#allocation2 + $0x12] sm:$0xff]  ;;  %v3913_v31 = vld [vmem:[%s4456_s4] ss:$0 sm:$0xff] }
  0x8f   : > { %v1135_v9 = vadd.f32 %v1127_v61, %v1107_v39  ;;  %v1363_v39 = vmul.f32 %v1490_v60, %v3875_v30  ;;  %v1558_v0 = vmul.f32 %v3906_v23, %v1546_v55 }
  0x90   : > { %v995_v1 = vadd.f32 %v987_v14, %v967_v15  ;;  %v3917_v15 = vrot.slane %v1337_v52, %v4548_v6 }
  0x91   : > { %v1149_v16 = vadd.f32 %v3633_v62, %v1135_v9 }
  0x92   : > { %v1024_v3 = vadd.f32 %v1016_v47, %v995_v1  ;;  %4550 = vst [vmem:[#allocation13_spill] sm:$0xff] %v3917_v15 }
  0x93   : > { %vm1157_vm8 = vcmp.gt.f32.partialorder %v1149_v16, 0.0  ;;  %v1165_v36 = vmul.f32 0.25, %v1149_v16 }
  0x94   : > { %v1052_v48 = vadd.f32 %v1044_v40, %v1024_v3  ;;  %v1419_v40 = vmul.f32 %v1546_v55, %v3883_v50 }
  0x95   : > { %v1173_v12 = vsel %vm1157_vm8, %v1149_v16, %v1165_v36 }
  0x96   : > { %3043 = vmatprep.mubr.msk.f32.mxu0 %vm385_vm0, %v1173_v12  ;;  %v1080_v10 = vadd.f32 %v1072_v33, %v1052_v48  ;;  %v1586_v12 = vmul.f32 %v3917_v15, %v1574_v27  ;;  %v3924_v48 = vrot.slane %v1337_v52, %v4549_v29 }
  0x98   : > { %v1108_v53 = vadd.f32 %v1100_v19, %v1080_v10  ;;  %v1447_v10 = vmul.f32 %v1574_v27, %v3887_v51 }
  0x9a   : > { %v1136_v17 = vadd.f32 %v1128_v42, %v1108_v53  ;;  %v1602_v53 = vld [vmem:[#allocation2 + $0x14] sm:$0xff] }
  0x9b   : > { %v1475_v58 = vmul.f32 %v1602_v53, %v3891_v25 }
  0x9c   : > { %v1150_v20 = vadd.f32 %v3633_v62, %v1136_v17  ;;  %v4546_v62 = vld [vmem:[#allocation4_spill] sm:$0xff]  ;;  %v1338_v17 = vld [vmem:[%s4457_s5 + $0x10] sm:$0x1f] }
  0x9d   : > { %v3878_v49 = vrot.slane %v1336_v8, %v4546_v62  ;;  %v3902_v4 = vrot.slane %v1337_v52, %v4546_v62  ;;  %v1339_v8 = vld [vmem:[%s4457_s5 + $0x18] sm:$0x1f]  ;;  %v3938_v26 = vrot.slane %v1338_v17, %v4545_v38  ;;  %v3947_v32 = vrot.slane %v1338_v17, %v4547_v43 }
  0x9e   : > { %vm1158_vm9 = vcmp.gt.f32.partialorder %v1150_v20, 0.0  ;;  %v1166_v7 = vmul.f32 0.25, %v1150_v20  ;;  %v3956_v52 = vrot.slane %v1339_v8, %v4545_v38  ;;  %v3963_v60 = vrot.slane %v1339_v8, %v4547_v43 }
  0x9f   : > { %v1390_v22 = vmul.f32 %v3878_v49, %v1378_v34  ;;  %v1530_v61 = vmul.f32 %v3902_v4, %v1518_v57  ;;  %v1391_v45 = vmul.f32 %v1518_v57, %v3878_v49  ;;  %4551 = vst [vmem:[#allocation14_spill] sm:$0xff] %v3938_v26  ;;  %v1340_v34 = vld [vmem:[%s4457_s5 + $0x20] sm:$0x1f]  ;;  %v3970_v57 = vrot.slane %v1339_v8, %v4549_v29 }
  0xa0   : > { %v1174_v2 = vsel %vm1158_vm9, %v1150_v20, %v1166_v7  ;;  %v1614_v7 = vmul.f32 %v3924_v48, %v1602_v53 }
  0xa1   : > { %3044 = vmatmul.mubr.msk.f32.gmra.mrb[6].mxu0 %vm385_vm0, %v1174_v2  ;;  %v1398_v21 = vadd.f32 %v1390_v22, %v1362_v28  ;;  %v1399_v1 = vadd.f32 %v1391_v45, %v1363_v39  ;;  %v3944_v22 = vrot.slane %v1338_v17, %v4546_v62  ;;  %4552 = vst [vmem:[#allocation15_spill] sm:$0xff] %v3970_v57 }
  0xa3   : > { %v1426_v41 = vadd.f32 %v1418_v13, %v1398_v21  ;;  %v1427_v19 = vadd.f32 %v1419_v40, %v1399_v1  ;;  %v3983_v1 = vrot.slane %v1340_v34, %v4547_v43 }
  0xa5   : > { %v1454_v54 = vadd.f32 %v1446_v59, %v1426_v41  ;;  %v1455_v2 = vadd.f32 %v1447_v10, %v1427_v19  ;;  %v3950_v41 = vrot.slane %v1338_v17, %v4548_v6  ;;  %v3953_v59 = vrot.slane %v1338_v17, %v4549_v29  ;;  %4555 = vst [vmem:[#allocation17_spill] sm:$0xff] %v3983_v1 }
  0xa7   : > { %v1482_v37 = vadd.f32 %v1474_v46, %v1454_v54  ;;  %v1483_v44 = vadd.f32 %v1475_v58, %v1455_v2  ;;  %v3960_v46 = vrot.slane %v1339_v8, %v4546_v62 }
  0xa9   : > { %v1510_v11 = vadd.f32 %v1502_v63, %v1482_v37  ;;  %v3967_v63 = vrot.slane %v1339_v8, %v4548_v6 }
  0xab   : > { %v1538_v9 = vadd.f32 %v1530_v61, %v1510_v11  ;;  %v3973_v11 = vrot.slane %v1340_v34, %v4545_v38  ;;  %v3976_v61 = vrot.slane %v1340_v34, %v4546_v62  ;;  %v3986_v38 = vrot.slane %v1340_v34, %v4548_v6 }
  0xad   : > { %v1566_v33 = vadd.f32 %v1558_v0, %v1538_v9  ;;  %4553 = vst [vmem:[#allocation16_spill] sm:$0xff] %v3973_v11  ;;  %4554 = vst [vmem:[#allocation19_spill] sm:$0xff] %v3976_v61 }
  0xae   : > { %4556 = vst [vmem:[#allocation20_spill] sm:$0xff] %v3986_v38 }
  0xaf   : > { %v1594_v20 = vadd.f32 %v1586_v12, %v1566_v33 }
  0xb1   : > { %v1622_v28 = vadd.f32 %v1614_v7, %v1594_v20 }
 0x12c   : > { %v3036_v14 = vpop.f32.mrb[0].mxu0 }
 0x12d   : > { %v1279_v47 = vadd.f32 %v3036_v14, %v3913_v31  ;;  %v1273_v16 = vpop.f32.mrb[1].mxu0 }
 0x12e   : > { %v1274_v36 = vadd.f32 %v3913_v31, %v1273_v16 }
 0x12f   : > { %vm1313_vm10 = vcmp.gt.f32.partialorder %v1279_v47, 0.0  ;;  %v1321_v5 = vmul.f32 0.25, %v1279_v47 }
 0x130   : > { %vm1312_vm11 = vcmp.gt.f32.partialorder %v1274_v36, 0.0  ;;  %v1320_v3 = vmul.f32 0.25, %v1274_v36 }
 0x131   : > { %v1329_v24 = vsel %vm1313_vm10, %v1279_v47, %v1321_v5 }
 0x132   : > { %1343 = vst.msk [vmem:[#allocation2 + $0x32] sm:$0xff] %vm385_vm0, %v1329_v24  ;;  %v1328_v42 = vsel %vm1312_vm11, %v1274_v36, %v1320_v3 }
 0x133   : > { %1342 = vst.msk [vmem:[#allocation2 + $0x22] sm:$0xff] %vm385_vm0, %v1328_v42 }
 0x139   : > { %v1770_v10 = vld [vmem:[#allocation2 + $0x30] sm:$0xff] }
 0x13a   : > { %v1630_v21 = vld [vmem:[#allocation2 + $0x20] sm:$0xff]  ;;  %v1798_v17 = vld [vmem:[#allocation2 + $0x31] sm:$0xff] }
 0x13b   : > { %v1658_v13 = vld [vmem:[#allocation2 + $0x21] sm:$0xff]  ;;  %v1642_v56 = vmul.f32 %v3938_v26, %v1630_v21  ;;  %v1503_v37 = vmul.f32 %v1630_v21, %v3898_v35  ;;  %v1364_v20 = vmul.f32 %v1630_v21, %v3875_v30 }
 0x13c   : > { %v1686_v54 = vld [vmem:[#allocation2 + $0x22] sm:$0xff]  ;;  %v1670_v45 = vmul.f32 %v3944_v22, %v1658_v13  ;;  %v1531_v0 = vmul.f32 %v1658_v13, %v3902_v4  ;;  %v1392_v7 = vmul.f32 %v1658_v13, %v3878_v49  ;;  %v1810_v13 = vmul.f32 %v3960_v46, %v1798_v17 }
 0x13d   : > { %v3039_v55 = vpop.f32.mrb[2].mxu0  ;;  %v1650_v39 = vadd.f32 %v1642_v56, %v1622_v28  ;;  %v1714_v14 = vld [vmem:[#allocation2 + $0x23] sm:$0xff]  ;;  %v1511_v9 = vadd.f32 %v1503_v37, %v1483_v44  ;;  %v1698_v27 = vmul.f32 %v3947_v32, %v1686_v54  ;;  %v1559_v3 = vmul.f32 %v1686_v54, %v3906_v23  ;;  %v1826_v56 = vld [vmem:[#allocation2 + $0x32] sm:$0xff] }
 0x13e   : > { %v1289_v47 = vadd.f32 %v3039_v55, %v3913_v31  ;;  %v1283_v16 = vpop.f32.mrb[3].mxu0  ;;  %v1742_v36 = vld [vmem:[#allocation2 + $0x24] sm:$0xff]  ;;  %v1726_v12 = vmul.f32 %v3950_v41, %v1714_v14  ;;  %v1587_v24 = vmul.f32 %v1714_v14, %v3917_v15  ;;  %v1782_v44 = vmul.f32 %v3956_v52, %v1770_v10 }
 0x13f   : > { %v1284_v62 = vadd.f32 %v3913_v31, %v1283_v16  ;;  %v1678_v40 = vadd.f32 %v1670_v45, %v1650_v39  ;;  %v1539_v5 = vadd.f32 %v1531_v0, %v1511_v9  ;;  %v1754_v53 = vmul.f32 %v3953_v59, %v1742_v36  ;;  %v1854_v45 = vld [vmem:[#allocation2 + $0x33] sm:$0xff] }
 0x140   : > { %vm1315_vm12 = vcmp.gt.f32.partialorder %v1289_v47, 0.0  ;;  %v1323_v33 = vmul.f32 0.25, %v1289_v47  ;;  %v1615_v28 = vmul.f32 %v1742_v36, %v3924_v48  ;;  %v4000_v37 = vrot.slane %v1340_v34, %v4549_v29  ;;  %v1882_v9 = vld [vmem:[#allocation2 + $0x34] sm:$0xff]  ;;  %v2971_v29 = vld [vmem:[%s4461_s9 + $0x4] sm:$0xf] }
 0x141   : > { %vm1314_vm13 = vcmp.gt.f32.partialorder %v1284_v62, 0.0  ;;  %v1322_v19 = vmul.f32 0.25, %v1284_v62  ;;  %v1706_v43 = vadd.f32 %v1698_v27, %v1678_v40  ;;  %v1567_v42 = vadd.f32 %v1559_v3, %v1539_v5  ;;  %3061 = vmatpush3.msk.msra.mxu0 %vm2256_vm14, %v2971_v29 }
 0x142   : > { %v1331_v6 = vsel %vm1315_vm12, %v1289_v47, %v1323_v33  ;;  %4557 = vst [vmem:[#allocation18_spill] sm:$0xff] %v4000_v37  ;;  %v1400_v55 = vadd.f32 %v1392_v7, %v1364_v20  ;;  %v1420_v21 = vmul.f32 %v1686_v54, %v3883_v50  ;;  %v1643_v47 = vmul.f32 %v1770_v10, %v3938_v26 }
 0x143   : > { %1345 = vst.msk [vmem:[#allocation2 + $0x52] sm:$0xff] %vm385_vm0, %v1331_v6  ;;  %v1330_v2 = vsel %vm1314_vm13, %v1284_v62, %v1322_v19  ;;  %v1734_v58 = vadd.f32 %v1726_v12, %v1706_v43  ;;  %v1595_v8 = vadd.f32 %v1587_v24, %v1567_v42  ;;  %v1448_v27 = vmul.f32 %v1714_v14, %v3887_v51 }
 0x144   : > { %1344 = vst.msk [vmem:[#allocation2 + $0x42] sm:$0xff] %vm385_vm0, %v1330_v2  ;;  %v1428_v16 = vadd.f32 %v1420_v21, %v1400_v55  ;;  %v1365_v62 = vmul.f32 %v1770_v10, %v3875_v30  ;;  %v1393_v40 = vmul.f32 %v1798_v17, %v3878_v49  ;;  %v1838_v54 = vmul.f32 %v3963_v60, %v1826_v56 }
 0x145   : > { %v1762_v39 = vadd.f32 %v1754_v53, %v1734_v58  ;;  %v1623_v0 = vadd.f32 %v1615_v28, %v1595_v8  ;;  %v1671_v3 = vmul.f32 %v1798_v17, %v3944_v22  ;;  %v1866_v33 = vmul.f32 %v3967_v63, %v1854_v45  ;;  %3070 = vmatprep.subr.mxu0 %v4544_v18 }
 0x146   : > { %v1894_v12 = vmul.f32 %v3970_v57, %v1882_v9  ;;  %v1456_v24 = vadd.f32 %v1448_v27, %v1428_v16  ;;  %v1699_v43 = vmul.f32 %v1826_v56, %v3947_v32  ;;  %v1727_v42 = vmul.f32 %v1854_v45, %v3950_v41 }
 0x147   : > { %v1790_v34 = vadd.f32 %v1782_v44, %v1762_v39  ;;  %v1651_v5 = vadd.f32 %v1643_v47, %v1623_v0  ;;  %v1755_v6 = vmul.f32 %v1882_v9, %v3953_v59  ;;  %v1476_v53 = vmul.f32 %v1742_v36, %v3891_v25 }
 0x148   : > { %v1504_v20 = vmul.f32 %v1770_v10, %v3898_v35  ;;  %v1401_v7 = vadd.f32 %v1393_v40, %v1365_v62  ;;  %v1532_v55 = vmul.f32 %v1798_v17, %v3902_v4  ;;  %v1560_v21 = vmul.f32 %v1826_v56, %v3906_v23 }
 0x149   : > { %v1818_v14 = vadd.f32 %v1810_v13, %v1790_v34  ;;  %v1679_v19 = vadd.f32 %v1671_v3, %v1651_v5  ;;  %v1484_v36 = vadd.f32 %v1476_v53, %v1456_v24  ;;  %v1588_v10 = vmul.f32 %v1854_v45, %v3917_v15 }
 0x14a   : > { %v4024_v28 = vld [vmem:[#allocation2 + $0x50] sm:$0xff]  ;;  %v1616_v13 = vmul.f32 %v1882_v9, %v3924_v48  ;;  %v1421_v0 = vmul.f32 %v1826_v56, %v3883_v50  ;;  %v1449_v17 = vmul.f32 %v1854_v45, %v3887_v51  ;;  %v1477_v29 = vmul.f32 %v1882_v9, %v3891_v25 }
 0x14b   : > { %v1846_v2 = vadd.f32 %v1838_v54, %v1818_v14  ;;  %v4022_v58 = vld [vmem:[#allocation2 + $0x40] sm:$0xff]  ;;  %v1707_v8 = vadd.f32 %v1699_v43, %v1679_v19  ;;  %v4026_v44 = vld [vmem:[#allocation2 + $0x51] sm:$0xff]  ;;  %v1923_v54 = vmul.f32 %v3973_v11, %v4024_v28  ;;  %v1512_v53 = vadd.f32 %v1504_v20, %v1484_v36 }
 0x14c   : > { %v4030_v39 = vld [vmem:[#allocation2 + $0x41] sm:$0xff]  ;;  %v1922_v34 = vmul.f32 %v3973_v11, %v4022_v58  ;;  %v4049_v56 = vmul.f32 %v3976_v61, %v4026_v44  ;;  %v1429_v5 = vadd.f32 %v1421_v0, %v1401_v7  ;;  %v1783_v45 = vmul.f32 %v4022_v58, %v3956_v52  ;;  %v4055_v9 = vld [vmem:[#allocation2 + $0x52] sm:$0xff] }
 0x14d   : > { %v1874_v47 = vadd.f32 %v1866_v33, %v1846_v2  ;;  %v4035_v16 = vld [vmem:[#allocation2 + $0x42] sm:$0xff]  ;;  %v1735_v40 = vadd.f32 %v1727_v42, %v1707_v8  ;;  %v1950_v33 = vmul.f32 %v3976_v61, %v4030_v39  ;;  %v4063_v42 = vld [vmem:[#allocation2 + $0x53] sm:$0xff]  ;;  %v1811_v2 = vmul.f32 %v4030_v39, %v3960_v46 }
 0x14e   : > { %v4037_v27 = vld [vmem:[#allocation2 + $0x43] sm:$0xff]  ;;  %v1978_v14 = vmul.f32 %v3983_v1, %v4035_v16  ;;  %v1839_v8 = vmul.f32 %v4035_v16, %v3963_v60  ;;  %v1540_v18 = vadd.f32 %v1532_v55, %v1512_v53  ;;  %v2007_v36 = vmul.f32 %v3986_v38, %v4063_v42 }
 0x14f   : > { %v4039_v62 = vld [vmem:[#allocation2 + $0x44] sm:$0xff]  ;;  %v1902_v3 = vadd.f32 %v1894_v12, %v1874_v47  ;;  %v1763_v24 = vadd.f32 %v1755_v6, %v1735_v40  ;;  %v2006_v19 = vmul.f32 %v3986_v38, %v4037_v27  ;;  %v4065_v12 = vld [vmem:[#allocation2 + $0x54] sm:$0xff]  ;;  %v1867_v0 = vmul.f32 %v4037_v27, %v3967_v63 }
 0x150   : > { %v2034_v43 = vmul.f32 %v4000_v37, %v4039_v62  ;;  %v1895_v47 = vmul.f32 %v4039_v62, %v3970_v57  ;;  %v1979_v40 = vmul.f32 %v3983_v1, %v4055_v9  ;;  %v1505_v11 = vmul.f32 %v4022_v58, %v3898_v35 }
 0x151   : > { %v1930_v6 = vadd.f32 %v1922_v34, %v1902_v3  ;;  %v1791_v7 = vadd.f32 %v1783_v45, %v1763_v24  ;;  %v4081_v34 = vmul.f32 %v4000_v37, %v4065_v12  ;;  %v1568_v3 = vadd.f32 %v1560_v21, %v1540_v18 }
 0x152   : > { %v1644_v24 = vmul.f32 %v4022_v58, %v3938_v26  ;;  %v1457_v45 = vadd.f32 %v1449_v17, %v1429_v5  ;;  %v1672_v55 = vmul.f32 %v4030_v39, %v3944_v22  ;;  %v1756_v18 = vmul.f32 %v4039_v62, %v3953_v59 }
 0x153   : > { %v1958_v61 = vadd.f32 %v1950_v33, %v1930_v6  ;;  %v1819_v20 = vadd.f32 %v1811_v2, %v1791_v7  ;;  %v1700_v33 = vmul.f32 %v4035_v16, %v3947_v32  ;;  %v1596_v53 = vadd.f32 %v1588_v10, %v1568_v3  ;;  %v4102_v7 = vld [vmem:[%s4458_s6] ss:$0 sm:$0xff] }
 0x154   : > { %v1728_v6 = vmul.f32 %v4037_v27, %v3950_v41  ;;  %v1485_v21 = vadd.f32 %v1477_v29, %v1457_v45  ;;  %vm3119_vm12 = vmmov 0   ;;  %vm2252_vm13 = vcmask 31744  }
 0x155   : > { %v1986_v57 = vadd.f32 %v1978_v14, %v1958_v61  ;;  %v1847_v1 = vadd.f32 %v1839_v8, %v1819_v20  ;;  %v1784_v61 = vmul.f32 %v4024_v28, %v3956_v52  ;;  %v1533_v14 = vmul.f32 %v4030_v39, %v3902_v4 }
 0x156   : > { %v1624_v10 = vadd.f32 %v1616_v13, %v1596_v53  ;;  %v1513_v2 = vadd.f32 %v1505_v11, %v1485_v21  ;;  %v1561_v8 = vmul.f32 %v4035_v16, %v3906_v23  ;;  %v1645_v13 = vmul.f32 %v4024_v28, %v3938_v26 }
 0x157   : > { %v2014_v17 = vadd.f32 %v2006_v19, %v1986_v57  ;;  %v1875_v5 = vadd.f32 %v1867_v0, %v1847_v1  ;;  %v1589_v57 = vmul.f32 %v4037_v27, %v3917_v15  ;;  %v1617_v19 = vmul.f32 %v4039_v62, %v3924_v48 }
 0x158   : > { %v1366_v0 = vmul.f32 %v4022_v58, %v3875_v30  ;;  %v1652_v20 = vadd.f32 %v1644_v24, %v1624_v10  ;;  %v1541_v3 = vadd.f32 %v1533_v14, %v1513_v2  ;;  %v1394_v11 = vmul.f32 %v4030_v39, %v3878_v49 }
 0x159   : > { %v2042_v1 = vadd.f32 %v2034_v43, %v2014_v17  ;;  %v1903_v29 = vadd.f32 %v1895_v47, %v1875_v5  ;;  %v1422_v43 = vmul.f32 %v4035_v16, %v3883_v50  ;;  %v1450_v47 = vmul.f32 %v4037_v27, %v3887_v51 }
 0x15a   : > { %v1680_v17 = vadd.f32 %v1672_v55, %v1652_v20  ;;  %v1569_v5 = vadd.f32 %v1561_v8, %v1541_v3  ;;  %v1402_v14 = vadd.f32 %v1394_v11, %v1366_v0 }
 0x15b   : > { %v3042_v45 = vpop.f32.mrb[4].mxu0  ;;  %v2056_v53 = vadd.f32 %v4102_v7, %v2042_v1  ;;  %v1931_v21 = vadd.f32 %v1923_v54, %v1903_v29 }
 0x15c   : > { %v1299_v58 = vadd.f32 %v3042_v45, %v3913_v31  ;;  %v1293_v24 = vpop.f32.mrb[5].mxu0  ;;  %v1708_v1 = vadd.f32 %v1700_v33, %v1680_v17  ;;  %v1597_v29 = vadd.f32 %v1589_v57, %v1569_v5  ;;  %v1430_v0 = vadd.f32 %v1422_v43, %v1402_v14 }
 0x15d   : > { %v1294_v10 = vadd.f32 %v3913_v31, %v1293_v24  ;;  %vm2064_vm15 = vcmp.gt.f32.partialorder %v2056_v53, 0.0  ;;  %v2072_v39 = vmul.f32 0.25, %v2056_v53  ;;  %v1959_v2 = vadd.f32 %v4049_v56, %v1931_v21 }
 0x15e   : > { %vm1317_vm1 = vcmp.gt.f32.partialorder %v1299_v58, 0.0  ;;  %v1325_v54 = vmul.f32 0.25, %v1299_v58  ;;  %v1736_v55 = vadd.f32 %v1728_v6, %v1708_v1  ;;  %v1625_v8 = vadd.f32 %v1617_v19, %v1597_v29 }
 0x15f   : > { %vm1316_vm2 = vcmp.gt.f32.partialorder %v1294_v10, 0.0  ;;  %v1324_v16 = vmul.f32 0.25, %v1294_v10  ;;  %v2080_v26 = vsel %vm2064_vm15, %v2056_v53, %v2072_v39  ;;  %v1987_v27 = vadd.f32 %v1979_v40, %v1959_v2  ;;  %v4558_v39 = vld [vmem:[#allocation15_spill] sm:$0xff] }
 0x160   : > { %v1333_v37 = vsel %vm1317_vm1, %v1299_v58, %v1325_v54  ;;  %3048 = vmatprep.mubr.msk.f32.mxu1 %vm385_vm0, %v2080_v26  ;;  %v1812_v56 = vmul.f32 %v4026_v44, %v3960_v46  ;;  %v1673_v33 = vmul.f32 %v4026_v44, %v3944_v22  ;;  %v1764_v57 = vadd.f32 %v1756_v18, %v1736_v55 }
 0x161   : > { %1347 = vst.msk [vmem:[#allocation2 + $0x72] sm:$0xff] %vm385_vm0, %v1333_v37  ;;  %v1332_v20 = vsel %vm1316_vm2, %v1294_v10, %v1324_v16  ;;  %v2015_v3 = vadd.f32 %v2007_v36, %v1987_v27  ;;  %v1653_v40 = vadd.f32 %v1645_v13, %v1625_v8  ;;  %v1458_v11 = vadd.f32 %v1450_v47, %v1430_v0 }
 0x162   : > { %1346 = vst.msk [vmem:[#allocation2 + $0x62] sm:$0xff] %vm385_vm0, %v1332_v20  ;;  %v1478_v26 = vmul.f32 %v4039_v62, %v3891_v25  ;;  %v1701_v37 = vmul.f32 %v4055_v9, %v3947_v32  ;;  %v1506_v36 = vmul.f32 %v4024_v28, %v3898_v35  ;;  %v1367_v19 = vmul.f32 %v4024_v28, %v3875_v30 }
 0x163   : > { %v2043_v6 = vadd.f32 %v4081_v34, %v2015_v3  ;;  %v1792_v45 = vadd.f32 %v1784_v61, %v1764_v57  ;;  %v1681_v53 = vadd.f32 %v1673_v33, %v1653_v40  ;;  %v1395_v18 = vmul.f32 %v4026_v44, %v3878_v49 }
 0x164   : > { %v1486_v21 = vadd.f32 %v1478_v26, %v1458_v11  ;;  %v1840_v62 = vmul.f32 %v4055_v9, %v3963_v60  ;;  %v1729_v47 = vmul.f32 %v4063_v42, %v3950_v41  ;;  %v1868_v28 = vmul.f32 %v4063_v42, %v3967_v63  ;;  %v4559_v26 = vld [vmem:[#allocation16_spill] sm:$0xff] }
 0x165   : > { %v2057_v13 = vadd.f32 %v4102_v7, %v2043_v6  ;;  %v1820_v34 = vadd.f32 %v1812_v56, %v1792_v45  ;;  %v1709_v43 = vadd.f32 %v1701_v37, %v1681_v53  ;;  %v1534_v5 = vmul.f32 %v4026_v44, %v3902_v4 }
 0x166   : > { %v1514_v58 = vadd.f32 %v1506_v36, %v1486_v21  ;;  %v1403_v14 = vadd.f32 %v1395_v18, %v1367_v19  ;;  %v1896_v2 = vmul.f32 %v4065_v12, %v4558_v39  ;;  %v1757_v1 = vmul.f32 %v4065_v12, %v3953_v59  ;;  %v4560_v18 = vld [vmem:[#allocation19_spill] sm:$0xff] }
 0x167   : > { %vm2065_vm3 = vcmp.gt.f32.partialorder %v2057_v13, 0.0  ;;  %v2073_v24 = vmul.f32 0.25, %v2057_v13  ;;  %v1848_v61 = vadd.f32 %v1840_v62, %v1820_v34  ;;  %v1737_v17 = vadd.f32 %v1729_v47, %v1709_v43  ;;  %v4561_v43 = vld [vmem:[#allocation17_spill] sm:$0xff] }
 0x168   : > { %v1562_v29 = vmul.f32 %v4055_v9, %v3906_v23  ;;  %v4162_v55 = vld [vmem:[#allocation2 + $0x70] sm:$0xff]  ;;  %v1542_v8 = vadd.f32 %v1534_v5, %v1514_v58  ;;  %v1590_v0 = vmul.f32 %v4063_v42, %v3917_v15  ;;  %v1423_v20 = vmul.f32 %v4055_v9, %v3883_v50 }
 0x169   : > { %v2081_v10 = vsel %vm2065_vm3, %v2057_v13, %v2073_v24  ;;  %v4153_v54 = vld [vmem:[#allocation2 + $0x60] sm:$0xff]  ;;  %v1876_v16 = vadd.f32 %v1868_v28, %v1848_v61  ;;  %v4164_v44 = vld [vmem:[#allocation2 + $0x71] sm:$0xff]  ;;  %v1765_v3 = vadd.f32 %v1757_v1, %v1737_v17  ;;  %v1618_v57 = vmul.f32 %v4065_v12, %v3924_v48 }
 0x16a   : > { %3049 = vmatmul.mubr.msk.f32.vlgmr.msra.gmra.mrb[0].mxu1 %vm385_vm0, %v2081_v10  ;;  %v4160_v27 = vld [vmem:[#allocation2 + $0x61] sm:$0xff]  ;;  %v1785_v56 = vmul.f32 %v4153_v54, %v3956_v52  ;;  %v4172_v33 = vld [vmem:[#allocation2 + $0x72] sm:$0xff]  ;;  %v1451_v40 = vmul.f32 %v4063_v42, %v3887_v51  ;;  %v1924_v6 = vmul.f32 %v4559_v26, %v4153_v54  ;;  %v1431_v9 = vadd.f32 %v1423_v20, %v1403_v14 }
 0x16b   : > { %v1904_v11 = vadd.f32 %v1896_v2, %v1876_v16  ;;  %v4180_v37 = vld [vmem:[#allocation2 + $0x62] sm:$0xff]  ;;  %v1479_v19 = vmul.f32 %v4065_v12, %v3891_v25  ;;  %v1813_v21 = vmul.f32 %v4160_v27, %v3960_v46  ;;  %v1925_v42 = vmul.f32 %v4559_v26, %v4162_v55  ;;  %v4198_v12 = vld [vmem:[#allocation2 + $0x73] sm:$0xff] }
 0x16c   : > { %v4182_v36 = vld [vmem:[#allocation2 + $0x63] sm:$0xff]  ;;  %v1793_v53 = vadd.f32 %v1785_v56, %v1765_v3  ;;  %v1953_v13 = vmul.f32 %v4560_v18, %v4164_v44  ;;  %v1952_v34 = vmul.f32 %v4560_v18, %v4160_v27  ;;  %v1981_v47 = vmul.f32 %v4561_v43, %v4172_v33  ;;  %v4200_v58 = vld [vmem:[#allocation2 + $0x74] sm:$0xff] }
 0x16d   : > { %v4186_v45 = vld [vmem:[#allocation2 + $0x64] sm:$0xff]  ;;  %v1932_v62 = vadd.f32 %v1924_v6, %v1904_v11  ;;  %v1570_v24 = vadd.f32 %v1562_v29, %v1542_v8  ;;  %v1980_v28 = vmul.f32 %v4561_v43, %v4180_v37  ;;  %v2008_v61 = vmul.f32 %v3986_v38, %v4182_v36  ;;  %v4562_v10 = vld [vmem:[#allocation18_spill] sm:$0xff] }
 0x16e   : > { %v1821_v17 = vadd.f32 %v1813_v21, %v1793_v53  ;;  %v1841_v5 = vmul.f32 %v4180_v37, %v3963_v60  ;;  %v2036_v2 = vmul.f32 %v4562_v10, %v4186_v45  ;;  %v1869_v1 = vmul.f32 %v4182_v36, %v3967_v63  ;;  %v4563_v6 = vld [vmem:[#allocation14_spill] sm:$0xff] }
 0x16f   : > { %v1960_v14 = vadd.f32 %v1952_v34, %v1932_v62  ;;  %v1598_v16 = vadd.f32 %v1590_v0, %v1570_v24  ;;  %v1897_v29 = vmul.f32 %v4186_v45, %v4558_v39  ;;  %v2009_v8 = vmul.f32 %v3986_v38, %v4198_v12 }
 0x170   : > { %v1849_v20 = vadd.f32 %v1841_v5, %v1821_v17  ;;  %v2037_v3 = vmul.f32 %v4562_v10, %v4200_v58  ;;  %v1646_v53 = vmul.f32 %v4153_v54, %v4563_v6  ;;  %v1459_v21 = vadd.f32 %v1451_v40, %v1431_v9 }
 0x171   : > { %v1988_v56 = vadd.f32 %v1980_v28, %v1960_v14  ;;  %v1626_v11 = vadd.f32 %v1618_v57, %v1598_v16  ;;  %v1674_v0 = vmul.f32 %v4160_v27, %v3944_v22  ;;  %v1702_v34 = vmul.f32 %v4180_v37, %v3947_v32 }
 0x172   : > { %v1877_v62 = vadd.f32 %v1869_v1, %v1849_v20  ;;  %v1730_v24 = vmul.f32 %v4182_v36, %v3950_v41  ;;  %v1487_v38 = vadd.f32 %v1479_v19, %v1459_v21  ;;  %v1507_v57 = vmul.f32 %v4153_v54, %v3898_v35 }
 0x173   : > { %v2016_v17 = vadd.f32 %v2008_v61, %v1988_v56  ;;  %v1654_v5 = vadd.f32 %v1646_v53, %v1626_v11  ;;  %v1758_v40 = vmul.f32 %v4186_v45, %v3953_v59  ;;  %v1786_v9 = vmul.f32 %v4162_v55, %v3956_v52 }
 0x174   : > { %v1905_v28 = vadd.f32 %v1897_v29, %v1877_v62  ;;  %v1535_v14 = vmul.f32 %v4160_v27, %v3902_v4  ;;  %v3045_v1 = vpop.f32.mrb[6].mxu0  ;;  %v1515_v10 = vadd.f32 %v1507_v57, %v1487_v38  ;;  %v1563_v19 = vmul.f32 %v4180_v37, %v3906_v23 }
 0x175   : > { %v2044_v16 = vadd.f32 %v2036_v2, %v2016_v17  ;;  %v1682_v20 = vadd.f32 %v1674_v0, %v1654_v5  ;;  %v1309_v61 = vadd.f32 %v3045_v1, %v3913_v31  ;;  %v1303_v56 = vpop.f32.mrb[7].mxu0  ;;  %v1591_v11 = vmul.f32 %v4182_v36, %v3917_v15 }
 0x176   : > { %v1933_v29 = vadd.f32 %v1925_v42, %v1905_v28  ;;  %v1368_v53 = vmul.f32 %v4153_v54, %v3875_v30  ;;  %v1304_v21 = vadd.f32 %v3913_v31, %v1303_v56  ;;  %v1543_v0 = vadd.f32 %v1535_v14, %v1515_v10 }
 0x177   : > { %v2058_v62 = vadd.f32 %v4102_v7, %v2044_v16  ;;  %v1710_v2 = vadd.f32 %v1702_v34, %v1682_v20  ;;  %vm1319_vm4 = vcmp.gt.f32.partialorder %v1309_v61, 0.0  ;;  %v1327_v38 = vmul.f32 0.25, %v1309_v61 }
 0x178   : > { %v1961_v17 = vadd.f32 %v1953_v13, %v1933_v29  ;;  %v1396_v5 = vmul.f32 %v4160_v27, %v3878_v49  ;;  %vm1318_vm5 = vcmp.gt.f32.partialorder %v1304_v21, 0.0  ;;  %v1326_v42 = vmul.f32 0.25, %v1304_v21 }
 0x179   : > { %vm2066_vm6 = vcmp.gt.f32.partialorder %v2058_v62, 0.0  ;;  %v2074_v57 = vmul.f32 0.25, %v2058_v62  ;;  %v1335_v28 = vsel %vm1319_vm4, %v1309_v61, %v1327_v38  ;;  %v1738_v15 = vadd.f32 %v1730_v24, %v1710_v2 }
 0x17a   : > { %v1989_v1 = vadd.f32 %v1981_v47, %v1961_v17  ;;  %v1571_v54 = vadd.f32 %v1563_v19, %v1543_v0  ;;  %1349 = vst.msk [vmem:[#allocation2 + $0x92] sm:$0xff] %vm385_vm0, %v1335_v28  ;;  %v1334_v31 = vsel %vm1318_vm5, %v1304_v21, %v1326_v42  ;;  %v1404_v34 = vadd.f32 %v1396_v5, %v1368_v53 }
 0x17b   : > { %v2082_v16 = vsel %vm2066_vm6, %v2058_v62, %v2074_v57  ;;  %v1424_v10 = vmul.f32 %v4180_v37, %v3883_v50  ;;  %1348 = vst.msk [vmem:[#allocation2 + $0x82] sm:$0xff] %vm385_vm0, %v1334_v31  ;;  %v1766_v13 = vadd.f32 %v1758_v40, %v1738_v15  ;;  %v1619_v47 = vmul.f32 %v4186_v45, %v3924_v48 }
 0x17c   : > { %3051 = vmatprep.mubr.msk.f32.mxu1 %vm385_vm0, %v2082_v16  ;;  %v2017_v27 = vadd.f32 %v2009_v8, %v1989_v1  ;;  %v1599_v14 = vadd.f32 %v1591_v11, %v1571_v54  ;;  %v1814_v24 = vmul.f32 %v4164_v44, %v3960_v46  ;;  %v1452_v19 = vmul.f32 %v4182_v36, %v3887_v51 }
 0x17d   : > { %v1432_v20 = vadd.f32 %v1424_v10, %v1404_v34  ;;  %v1794_v56 = vadd.f32 %v1786_v9, %v1766_v13  ;;  %v1647_v29 = vmul.f32 %v4162_v55, %v4563_v6  ;;  %v1842_v15 = vmul.f32 %v4172_v33, %v3963_v60 }
 0x17e   : > { %v2045_v61 = vadd.f32 %v2037_v3, %v2017_v27  ;;  %v1627_v37 = vadd.f32 %v1619_v47, %v1599_v14  ;;  %v1480_v40 = vmul.f32 %v4186_v45, %v3891_v25  ;;  %v1675_v36 = vmul.f32 %v4164_v44, %v3944_v22 }
 0x17f   : > { %v1460_v8 = vadd.f32 %v1452_v19, %v1432_v20  ;;  %v1822_v53 = vadd.f32 %v1814_v24, %v1794_v56  ;;  %v1870_v3 = vmul.f32 %v4198_v12, %v3967_v63  ;;  %v1508_v62 = vmul.f32 %v4162_v55, %v3898_v35 }
 0x180   : > { %v2059_v11 = vadd.f32 %v4102_v7, %v2045_v61  ;;  %v1655_v21 = vadd.f32 %v1647_v29, %v1627_v37  ;;  %v1703_v45 = vmul.f32 %v4172_v33, %v3947_v32  ;;  %v1898_v57 = vmul.f32 %v4200_v58, %v4558_v39 }
 0x181   : > { %v1488_v9 = vadd.f32 %v1480_v40, %v1460_v8  ;;  %v1850_v0 = vadd.f32 %v1842_v15, %v1822_v53  ;;  %v1731_v31 = vmul.f32 %v4198_v12, %v3950_v41  ;;  %v1536_v10 = vmul.f32 %v4164_v44, %v3902_v4 }
 0x182   : > { %vm2067_vm7 = vcmp.gt.f32.partialorder %v2059_v11, 0.0  ;;  %v2075_v2 = vmul.f32 0.25, %v2059_v11  ;;  %v1683_v38 = vadd.f32 %v1675_v36, %v1655_v21  ;;  %v1914_v17 = vld [vmem:[#allocation2 + $0x80] sm:$0xff]  ;;  %v1759_v14 = vmul.f32 %v4200_v58, %v3953_v59 }
 0x183   : > { %v1878_v42 = vadd.f32 %v1870_v3, %v1850_v0  ;;  %v1516_v28 = vadd.f32 %v1508_v62, %v1488_v9  ;;  %v1942_v1 = vld [vmem:[#allocation2 + $0x81] sm:$0xff]  ;;  %v1926_v34 = vmul.f32 %v4559_v26, %v1914_v17  ;;  %v1564_v47 = vmul.f32 %v4172_v33, %v3906_v23 }
 0x184   : > { %v2083_v5 = vsel %vm2067_vm7, %v2059_v11, %v2075_v2  ;;  %v1711_v54 = vadd.f32 %v1703_v45, %v1683_v38  ;;  %v4279_v27 = vld [vmem:[#allocation2 + $0x82] sm:$0xff]  ;;  %v1369_v24 = vmul.f32 %v4162_v55, %v3875_v30  ;;  %v1954_v19 = vmul.f32 %v4560_v18, %v1942_v1  ;;  %v4564_v30 = vld [vmem:[#allocation13_spill] sm:$0xff]  ;;  %v4566_v38 = vld [vmem:[#allocation18_spill] sm:$0xff] }
 0x185   : > { %3052 = vmatmul.mubr.msk.f32.gmra.mrb[2].mxu1 %vm385_vm0, %v2083_v5  ;;  %v1906_v16 = vadd.f32 %v1898_v57, %v1878_v42  ;;  %v1544_v61 = vadd.f32 %v1536_v10, %v1516_v28  ;;  %v1397_v56 = vmul.f32 %v4164_v44, %v3878_v49  ;;  %v4290_v37 = vld [vmem:[#allocation2 + $0x83] sm:$0xff]  ;;  %v1787_v15 = vmul.f32 %v1914_v17, %v3956_v52 }
 0x186   : > { %v1739_v13 = vadd.f32 %v1731_v31, %v1711_v54  ;;  %v1982_v40 = vmul.f32 %v4561_v43, %v4279_v27  ;;  %v4295_v11 = vld [vmem:[#allocation2 + $0x84] sm:$0xff]  ;;  %v1592_v55 = vmul.f32 %v4198_v12, %v4564_v30  ;;  %v1815_v36 = vmul.f32 %v1942_v1, %v3960_v46 }
 0x187   : > { %v1934_v20 = vadd.f32 %v1926_v34, %v1906_v16  ;;  %v1572_v53 = vadd.f32 %v1564_v47, %v1544_v61  ;;  %v1620_v49 = vmul.f32 %v4200_v58, %v3924_v48  ;;  %v1425_v44 = vmul.f32 %v4172_v33, %v3883_v50  ;;  %v4565_v9 = vld [vmem:[#allocation20_spill] sm:$0xff]  ;;  %v1943_v61 = vld [vmem:[#allocation2 + $0x91] sm:$0xff] }
 0x188   : > { %v1767_v29 = vadd.f32 %v1759_v14, %v1739_v13  ;;  %v2010_v62 = vmul.f32 %v4565_v9, %v4290_v37  ;;  %v1405_v0 = vadd.f32 %v1397_v56, %v1369_v24  ;;  %v2038_v45 = vmul.f32 %v4566_v38, %v4295_v11  ;;  %v1915_v14 = vld [vmem:[#allocation2 + $0x90] sm:$0xff] }
 0x189   : > { %v1962_v8 = vadd.f32 %v1954_v19, %v1934_v20  ;;  %v1600_v2 = vadd.f32 %v1592_v55, %v1572_v53  ;;  %v1843_v42 = vmul.f32 %v4279_v27, %v3963_v60  ;;  %v1453_v57 = vmul.f32 %v4198_v12, %v3887_v51 }
 0x18a   : > { %v1795_v21 = vadd.f32 %v1787_v15, %v1767_v29  ;;  %v1648_v50 = vmul.f32 %v1914_v17, %v4563_v6  ;;  %v1433_v33 = vadd.f32 %v1425_v44, %v1405_v0  ;;  %v1871_v16 = vmul.f32 %v4290_v37, %v3967_v63 }
 0x18b   : > { %v1990_v3 = vadd.f32 %v1982_v40, %v1962_v8  ;;  %v1628_v54 = vadd.f32 %v1620_v49, %v1600_v2  ;;  %v1676_v34 = vmul.f32 %v1942_v1, %v3944_v22  ;;  %v1481_v10 = vmul.f32 %v4200_v58, %v3891_v25  ;;  %v1971_v40 = vld [vmem:[#allocation2 + $0x92] sm:$0xff] }
 0x18c   : > { %v1823_v5 = vadd.f32 %v1815_v36, %v1795_v21  ;;  %v1461_v24 = vadd.f32 %v1453_v57, %v1433_v33  ;;  %v1509_v51 = vmul.f32 %v1914_v17, %v3898_v35  ;;  %v1899_v20 = vmul.f32 %v4295_v11, %v4558_v39 }
 0x18d   : > { %v2018_v28 = vadd.f32 %v2010_v62, %v1990_v3  ;;  %v1656_v47 = vadd.f32 %v1648_v50, %v1628_v54  ;;  %v1704_v29 = vmul.f32 %v4279_v27, %v3947_v32  ;;  %v1927_v25 = vmul.f32 %v4559_v26, %v1915_v14  ;;  %v1999_v3 = vld [vmem:[#allocation2 + $0x93] sm:$0xff] }
 0x18e   : > { %v1851_v31 = vadd.f32 %v1843_v42, %v1823_v5  ;;  %v1489_v15 = vadd.f32 %v1481_v10, %v1461_v24  ;;  %v1732_v58 = vmul.f32 %v4290_v37, %v3950_v41  ;;  %v1537_v35 = vmul.f32 %v1942_v1, %v3902_v4 }
 0x18f   : > { %v2046_v13 = vadd.f32 %v2038_v45, %v2018_v28  ;;  %v1684_v56 = vadd.f32 %v1676_v34, %v1656_v47  ;;  %v1955_v36 = vmul.f32 %v4560_v18, %v1943_v61  ;;  %v1760_v49 = vmul.f32 %v4295_v11, %v3953_v59  ;;  %v2027_v45 = vld [vmem:[#allocation2 + $0x94] sm:$0xff] }
 0x190   : > { %v1879_v12 = vadd.f32 %v1871_v16, %v1851_v31  ;;  %v1517_v55 = vadd.f32 %v1509_v51, %v1489_v15  ;;  %v1565_v0 = vmul.f32 %v4279_v27, %v3906_v23  ;;  %v1983_v1 = vmul.f32 %v4561_v43, %v1971_v40 }
 0x191   : > { %v2060_v19 = vadd.f32 %v4102_v7, %v2046_v13  ;;  %v1712_v53 = vadd.f32 %v1704_v29, %v1684_v56  ;;  %v1788_v42 = vmul.f32 %v1915_v14, %v3956_v52  ;;  %v1593_v28 = vmul.f32 %v4290_v37, %v4564_v30 }
 0x192   : > { %v1907_v8 = vadd.f32 %v1899_v20, %v1879_v12  ;;  %v1545_v2 = vadd.f32 %v1537_v35, %v1517_v55  ;;  %v2011_v50 = vmul.f32 %v4565_v9, %v1999_v3  ;;  %v1816_v31 = vmul.f32 %v1943_v61, %v3960_v46  ;;  %v1916_v12 = vld [vmem:[#allocation2 + $0xa0] sm:$0xff] }
 0x193   : > { %vm2068_vm8 = vcmp.gt.f32.partialorder %v2060_v19, 0.0  ;;  %v2076_v17 = vmul.f32 0.25, %v2060_v19  ;;  %v1740_v62 = vadd.f32 %v1732_v58, %v1712_v53  ;;  %v1621_v27 = vmul.f32 %v4295_v11, %v3924_v48  ;;  %v1972_v35 = vld [vmem:[#allocation2 + $0xa2] sm:$0xff] }
 0x194   : > { %v1935_v21 = vadd.f32 %v1927_v25, %v1907_v8  ;;  %v1573_v57 = vadd.f32 %v1565_v0, %v1545_v2  ;;  %v2039_v34 = vmul.f32 %v4566_v38, %v2027_v45  ;;  %v1844_v13 = vmul.f32 %v1971_v40, %v3963_v60  ;;  %v2028_v0 = vld [vmem:[#allocation2 + $0xa4] sm:$0xff] }
 0x195   : > { %v2084_v44 = vsel %vm2068_vm8, %v2060_v19, %v2076_v17  ;;  %v1768_v5 = vadd.f32 %v1760_v49, %v1740_v62  ;;  %v1649_v24 = vmul.f32 %v1915_v14, %v4563_v6  ;;  %v1872_v51 = vmul.f32 %v1999_v3, %v3967_v63  ;;  %v1944_v14 = vld [vmem:[#allocation2 + $0xa1] sm:$0xff] }
 0x196   : > { %3054 = vmatprep.mubr.msk.f32.mxu1 %vm385_vm0, %v2084_v44  ;;  %v1963_v4 = vadd.f32 %v1955_v36, %v1935_v21  ;;  %v1601_v23 = vadd.f32 %v1593_v28, %v1573_v57  ;;  %v1677_v19 = vmul.f32 %v1943_v61, %v3944_v22  ;;  %v1928_v48 = vmul.f32 %v4559_v26, %v1916_v12 }
 0x197   : > { %v1796_v33 = vadd.f32 %v1788_v42, %v1768_v5  ;;  %v1900_v29 = vmul.f32 %v2027_v45, %v4558_v39  ;;  %v1705_v8 = vmul.f32 %v1971_v40, %v3947_v32  ;;  %v1956_v58 = vmul.f32 %v4560_v18, %v1944_v14  ;;  %v2000_v40 = vld [vmem:[#allocation2 + $0xa3] sm:$0xff] }
 0x198   : > { %v1991_v54 = vadd.f32 %v1983_v1, %v1963_v4  ;;  %v1629_v47 = vadd.f32 %v1621_v27, %v1601_v23  ;;  %v1733_v22 = vmul.f32 %v1999_v3, %v3950_v41  ;;  %v1984_v53 = vmul.f32 %v4561_v43, %v1972_v35 }
 0x199   : > { %v1824_v10 = vadd.f32 %v1816_v31, %v1796_v33  ;;  %v1761_v36 = vmul.f32 %v2027_v45, %v3953_v59  ;;  %v1789_v32 = vmul.f32 %v1916_v12, %v3956_v52  ;;  %v2012_v44 = vmul.f32 %v4565_v9, %v2000_v40  ;;  %v1917_v45 = vld [vmem:[#allocation2 + $0xb0] sm:$0xff] }
 0x19a   : > { %v2019_v16 = vadd.f32 %v2011_v50, %v1991_v54  ;;  %v1657_v20 = vadd.f32 %v1649_v24, %v1629_v47  ;;  %v1817_v2 = vmul.f32 %v1944_v14, %v3960_v46  ;;  %v2040_v3 = vmul.f32 %v4566_v38, %v2028_v0  ;;  %v1945_v54 = vld [vmem:[#allocation2 + $0xb1] sm:$0xff] }
 0x19b   : > { %v1852_v30 = vadd.f32 %v1844_v13, %v1824_v10  ;;  %v1845_v1 = vmul.f32 %v1972_v35, %v3963_v60  ;;  %v1873_v59 = vmul.f32 %v2000_v40, %v3967_v63  ;;  %v1901_v28 = vmul.f32 %v2028_v0, %v4558_v39  ;;  %v1973_v31 = vld [vmem:[#allocation2 + $0xb2] sm:$0xff] }
 0x19c   : > { %v2047_v37 = vadd.f32 %v2039_v34, %v2019_v16  ;;  %v1685_v15 = vadd.f32 %v1677_v19, %v1657_v20  ;;  %v1929_v33 = vmul.f32 %v4559_v26, %v1917_v45  ;;  %v1957_v60 = vmul.f32 %v4560_v18, %v1945_v54  ;;  %v2001_v16 = vld [vmem:[#allocation2 + $0xb3] sm:$0xff] }
 0x19d   : > { %v1880_v11 = vadd.f32 %v1872_v51, %v1852_v30  ;;  %v1985_v10 = vmul.f32 %v4561_v43, %v1973_v31  ;;  %v2029_v39 = vld [vmem:[#allocation2 + $0xb4] sm:$0xff]  ;;  %v2013_v47 = vmul.f32 %v4565_v9, %v2001_v16  ;;  %v2249_v43 = vld [vmem:[%s4461_s9] sm:$0xf]  ;;  %v4567_v9 = vmov 0.0  }
 0x19e   : > { %v2061_v56 = vadd.f32 %v4102_v7, %v2047_v37  ;;  %v1713_v17 = vadd.f32 %v1705_v8, %v1685_v15  ;;  %v2041_v26 = vmul.f32 %v4566_v38, %v2029_v39  ;;  %3066 = vmatpush3.msk.msra.mxu1 %vm2256_vm14, %v2249_v43  ;;  %3062 = vmatprep.mubr.msk.f32.mxu0 %vm3119_vm12, %v4567_v9  ;;  %v2979_v8 = vld [vmem:[%s4461_s9 + $0xc] sm:$0xf] }
 0x19f   : > { %v1908_v25 = vadd.f32 %v1900_v29, %v1880_v11  ;;  %3075 = vmatprep.subr.mxu1 %v4567_v9  ;;  %v2976_v29 = vld [vmem:[%s4461_s9 + $0x8] sm:$0xf] }
 0x1a0   : > { %vm2069_vm9 = vcmp.gt.f32.partialorder %v2061_v56, 0.0  ;;  %v2077_v6 = vmul.f32 0.25, %v2061_v56  ;;  %v1741_v21 = vadd.f32 %v1733_v22, %v1713_v17 }
 0x1a1   : > { %v1936_v55 = vadd.f32 %v1928_v48, %v1908_v25 }
 0x1a2   : > { %v2085_v61 = vsel %vm2069_vm9, %v2061_v56, %v2077_v6  ;;  %v1769_v62 = vadd.f32 %v1761_v36, %v1741_v21 }
 0x1a3   : > { %3055 = vmatmul.mubr.msk.f32.gmra.mrb[4].mxu1 %vm385_vm0, %v2085_v61  ;;  %v1964_v49 = vadd.f32 %v1956_v58, %v1936_v55  ;;  %v2985_v61 = vld [vmem:[%s4461_s9 + $0x14] sm:$0xf]  ;;  %v2982_v55 = vld [vmem:[%s4461_s9 + $0x10] sm:$0xf] }
 0x1a4   : > { %v1797_v4 = vadd.f32 %v1789_v32, %v1769_v62 }
 0x1a5   : > { %v1992_v41 = vadd.f32 %v1984_v53, %v1964_v49 }
 0x1a6   : > { %v1825_v42 = vadd.f32 %v1817_v2, %v1797_v4  ;;  %v2991_v2 = vld [vmem:[%s4461_s9 + $0x1c] sm:$0xf] }
 0x1a7   : > { %v2020_v5 = vadd.f32 %v2012_v44, %v1992_v41  ;;  %v2988_v41 = vld [vmem:[%s4461_s9 + $0x18] sm:$0xf] }
 0x1a8   : > { %v1853_v57 = vadd.f32 %v1845_v1, %v1825_v42 }
 0x1a9   : > { %v2048_v52 = vadd.f32 %v2040_v3, %v2020_v5 }
 0x1aa   : > { %v1881_v46 = vadd.f32 %v1873_v59, %v1853_v57 }
 0x1ab   : > { %v2062_v50 = vadd.f32 %v4102_v7, %v2048_v52 }
 0x1ac   : > { %v1909_v27 = vadd.f32 %v1901_v28, %v1881_v46 }
 0x1ad   : > { %vm2070_vm10 = vcmp.gt.f32.partialorder %v2062_v50, 0.0  ;;  %v2078_v23 = vmul.f32 0.25, %v2062_v50 }
 0x1ae   : > { %v1937_v63 = vadd.f32 %v1929_v33, %v1909_v27 }
 0x1af   : > { %v2086_v34 = vsel %vm2070_vm10, %v2062_v50, %v2078_v23 }
 0x1b0   : > { %3057 = vmatprep.mubr.msk.f32.mxu1 %vm385_vm0, %v2086_v34  ;;  %v1965_v13 = vadd.f32 %v1957_v60, %v1937_v63 }
 0x1b2   : > { %v1993_v24 = vadd.f32 %v1985_v10, %v1965_v13 }
 0x1b4   : > { %v2021_v37 = vadd.f32 %v2013_v47, %v1993_v24 }
 0x1b6   : > { %v2049_v30 = vadd.f32 %v2041_v26, %v2021_v37 }
 0x1b8   : > { %v2063_v51 = vadd.f32 %v4102_v7, %v2049_v30  ;;  %v4384_v7 = vld [vmem:[%s4460_s8] ss:$0 sm:$0xff] }
 0x1ba   : > { %vm2071_vm11 = vcmp.gt.f32.partialorder %v2063_v51, 0.0  ;;  %v2079_v18 = vmul.f32 0.25, %v2063_v51 }
 0x1bc   : > { %v2087_v12 = vsel %vm2071_vm11, %v2063_v51, %v2079_v18 }
 0x1bd   : > { %3058 = vmatmul.mubr.msk.f32.gmra.mrb[6].mxu1 %vm385_vm0, %v2087_v12  ;;  %v2994_v12 = vld [vmem:[%s4462_s10] ss:$0 sm:$0xff] }
 0x1be   : > { %3067 = vmatprep.mubr.msk.f32.mxu1 %vm3119_vm12, %v4567_v9 }
 0x23d   : > { %v3050_v38 = vpop.f32.mrb[0].mxu1 }
 0x23e   : > { %v2192_v20 = vadd.f32 %v3050_v38, %v4384_v7  ;;  %v2186_v19 = vpop.f32.mrb[1].mxu1 }
 0x23f   : > { %v2187_v56 = vadd.f32 %v4384_v7, %v2186_v19 }
 0x240   : > { %vm2226_vm0 = vcmp.gt.f32.partialorder %v2192_v20, 0.0  ;;  %v2234_v48 = vmul.f32 0.25, %v2192_v20 }
 0x241   : > { %vm2225_vm15 = vcmp.gt.f32.partialorder %v2187_v56, 0.0  ;;  %v2233_v11 = vmul.f32 0.25, %v2187_v56 }
 0x242   : > { %v2242_v15 = vsel %vm2226_vm0, %v2192_v20, %v2234_v48 }
 0x243   : > { %v2241_v6 = vsel %vm2225_vm15, %v2187_v56, %v2233_v11  ;;  %3063 = vmatmul.mubr.msk.f32.vlgmr.msra.gmra.mrb[8].mxu0 %vm2252_vm13, %v2242_v15 }
 0x244   : > { %3068 = vmatmul.mubr.msk.f32.vlgmr.msra.gmra.mrb[8].mxu1 %vm2252_vm13, %v2241_v6  ;;  %3071 = vmatpush3.msk.msra.mxu0 %vm2256_vm14, %v2976_v29 }
 0x245   : > { %3076 = vmatpush3.msk.msra.mxu1 %vm2256_vm14, %v2979_v8  ;;  %3077 = vmatprep.mubr.msk.f32.mxu1 %vm3119_vm12, %v4567_v9 }
 0x246   : > { %3072 = vmatprep.mubr.msk.f32.mxu0 %vm3119_vm12, %v4567_v9  ;;  %3080 = vmatprep.subr.mxu0 %v4567_v9 }
 0x247   : > { %3085 = vmatprep.subr.mxu1 %v4567_v9 }
 0x258   : > { %v3053_v14 = vpop.f32.mrb[2].mxu1 }
 0x259   : > { %v2202_v25 = vadd.f32 %v3053_v14, %v4384_v7  ;;  %v2196_v58 = vpop.f32.mrb[3].mxu1 }
 0x25a   : > { %v2197_v35 = vadd.f32 %v4384_v7, %v2196_v58 }
 0x25b   : > { %vm2228_vm1 = vcmp.gt.f32.partialorder %v2202_v25, 0.0  ;;  %v2236_v17 = vmul.f32 0.25, %v2202_v25 }
 0x25c   : > { %vm2227_vm2 = vcmp.gt.f32.partialorder %v2197_v35, 0.0  ;;  %v2235_v22 = vmul.f32 0.25, %v2197_v35 }
 0x25d   : > { %v2244_v53 = vsel %vm2228_vm1, %v2202_v25, %v2236_v17 }
 0x25e   : > { %v2243_v21 = vsel %vm2227_vm2, %v2197_v35, %v2235_v22  ;;  %3078 = vmatmul.mubr.msk.f32.vlgmr.msra.gmra.mrb[10].mxu1 %vm2252_vm13, %v2244_v53 }
 0x25f   : > { %3073 = vmatmul.mubr.msk.f32.vlgmr.msra.gmra.mrb[10].mxu0 %vm2252_vm13, %v2243_v21  ;;  %3086 = vmatpush3.msk.msra.mxu1 %vm2256_vm14, %v2985_v61 }
 0x260   : > { %3081 = vmatpush3.msk.msra.mxu0 %vm2256_vm14, %v2982_v55  ;;  %3087 = vmatprep.mubr.msk.f32.mxu1 %vm3119_vm12, %v4567_v9 }
 0x261   : > { %3082 = vmatprep.mubr.msk.f32.mxu0 %vm3119_vm12, %v4567_v9  ;;  %3090 = vmatprep.subr.mxu0 %v4567_v9 }
 0x262   : > { %3095 = vmatprep.subr.mxu1 %v4567_v9 }
 0x276   : > { %v3056_v36 = vpop.f32.mrb[4].mxu1 }
 0x277   : > { %v2212_v32 = vadd.f32 %v3056_v36, %v4384_v7  ;;  %v2206_v40 = vpop.f32.mrb[5].mxu1 }
 0x278   : > { %v2207_v49 = vadd.f32 %v4384_v7, %v2206_v40 }
 0x279   : > { %vm2230_vm3 = vcmp.gt.f32.partialorder %v2212_v32, 0.0  ;;  %v2238_v44 = vmul.f32 0.25, %v2212_v32 }
 0x27a   : > { %vm2229_vm4 = vcmp.gt.f32.partialorder %v2207_v49, 0.0  ;;  %v2237_v62 = vmul.f32 0.25, %v2207_v49 }
 0x27b   : > { %v2246_v0 = vsel %vm2230_vm3, %v2212_v32, %v2238_v44 }
 0x27c   : > { %v2245_v3 = vsel %vm2229_vm4, %v2207_v49, %v2237_v62  ;;  %3088 = vmatmul.mubr.msk.f32.vlgmr.msra.gmra.mrb[12].mxu1 %vm2252_vm13, %v2246_v0 }
 0x27d   : > { %3083 = vmatmul.mubr.msk.f32.vlgmr.msra.gmra.mrb[12].mxu0 %vm2252_vm13, %v2245_v3  ;;  %3096 = vmatpush3.msk.msra.mxu1 %vm2256_vm14, %v2991_v2 }
 0x27e   : > { %3091 = vmatpush3.msk.msra.mxu0 %vm2256_vm14, %v2988_v41  ;;  %3097 = vmatprep.mubr.msk.f32.mxu1 %vm3119_vm12, %v4567_v9  ;;  %vm2888_vm14 = vcmask 130048  }
 0x27f   : > { %3092 = vmatprep.mubr.msk.f32.mxu0 %vm3119_vm12, %v4567_v9 }
 0x290   : > { %v3059_v4 = vpop.f32.mrb[6].mxu1 }
 0x291   : > { %v2222_v1 = vadd.f32 %v3059_v4, %v4384_v7  ;;  %v2216_v5 = vpop.f32.mrb[7].mxu1 }
 0x292   : > { %v2217_v42 = vadd.f32 %v4384_v7, %v2216_v5 }
 0x293   : > { %vm2232_vm5 = vcmp.gt.f32.partialorder %v2222_v1, 0.0  ;;  %v2240_v59 = vmul.f32 0.25, %v2222_v1 }
 0x294   : > { %vm2231_vm6 = vcmp.gt.f32.partialorder %v2217_v42, 0.0  ;;  %v2239_v45 = vmul.f32 0.25, %v2217_v42 }
 0x295   : > { %v2248_v52 = vsel %vm2232_vm5, %v2222_v1, %v2240_v59 }
 0x296   : > { %v2247_v57 = vsel %vm2231_vm6, %v2217_v42, %v2239_v45  ;;  %3098 = vmatmul.mubr.msk.f32.vlgmr.msra.gmra.mrb[14].mxu1 %vm2252_vm13, %v2248_v52 }
 0x297   : > { %3093 = vmatmul.mubr.msk.f32.vlgmr.msra.gmra.mrb[14].mxu0 %vm2252_vm13, %v2247_v57 }
 0x316   : > { %v2326_v28 = vpop.f32.mrb[8].mxu0 }
 0x317   : > { %v3064_v54 = vpop.f32.mrb[9].mxu0  ;;  %v2402_v50 = vpop.f32.mrb[8].mxu1 }
 0x318   : > { %v2403_v46 = vadd.f32 %v2402_v50, %v2326_v28  ;;  %v3069_v33 = vpop.f32.mrb[9].mxu1 }
 0x331   : > { %v2559_v31 = vpop.f32.mrb[10].mxu1 }
 0x332   : > { %v2480_v23 = vpop.f32.mrb[10].mxu0  ;;  %v3079_v27 = vpop.f32.mrb[11].mxu1 }
 0x333   : > { %v2484_v60 = vadd.f32 %v2480_v23, %v2403_v46  ;;  %v3074_v16 = vpop.f32.mrb[11].mxu0 }
 0x335   : > { %v2563_v34 = vadd.f32 %v2559_v31, %v2484_v60 }
 0x34f   : > { %v2717_v63 = vpop.f32.mrb[12].mxu1 }
 0x350   : > { %v2638_v10 = vpop.f32.mrb[12].mxu0  ;;  %v3089_v39 = vpop.f32.mrb[13].mxu1 }
 0x351   : > { %v2642_v13 = vadd.f32 %v2638_v10, %v2563_v34  ;;  %v3084_v47 = vpop.f32.mrb[13].mxu0 }
 0x353   : > { %v2721_v24 = vadd.f32 %v2717_v63, %v2642_v13 }
 0x369   : > { %v2875_v26 = vpop.f32.mrb[14].mxu1 }
 0x36a   : > { %v2796_v37 = vpop.f32.mrb[14].mxu0  ;;  %v3099_v30 = vpop.f32.mrb[15].mxu1 }
 0x36b   : > { %v2800_v51 = vadd.f32 %v2796_v37, %v2721_v24  ;;  %v3094_v18 = vpop.f32.mrb[15].mxu0 }
 0x36d   : > { %v2879_v43 = vadd.f32 %v2875_v26, %v2800_v51 }
 0x36f   : > { %v2887_v9 = vadd.f32 %v2994_v12, %v2879_v43 }
 0x371   : > { %2889 = vst.msk [vmem:[%s384_s26] sm:$0xff] %vm2888_vm14, %v2887_v9 }
 0x372 PF: > { %s21_s17 = sadd.s32 1, %s3116_s17  }
 0x373   : > { %p18_p4 = scmp.ge.s32.totalorder %s21_s17, 4  }
 0x375   :  { %20 = sbr.rel (!%p18_p4) target bundleno = 1 (0x1), region = 105 }

</bundles_post_ra>
